<compile_context>
chip_gen: v5e
topology: v5e:2x2
jax: 0.10.0
libtpu: 0.0.40
codegen_flags: <defaults>
</compile_context>

<pallas_src>
import functools

import jax
import jax.numpy as jnp
from jax.experimental import pallas as pl
from jax.experimental.pallas import tpu as pltpu


# ----------------------------- Pallas kernel --------------------------------
def bilstm_classifier_kernel(
    x_ref,      # (S*B, E)  bf16  embedded inputs, time-major, flattened
    len_ref,    # (B, 1)    i32   index of last valid token (mask.sum - 1)
    wi_ref,     # (E, 8H)   bf16  [W_ih_fwd^T | W_ih_bwd^T], gate order [i,f,g,o]
    b_ref,      # (1, 8H)   f32   [b_fwd | b_bwd]  (b_ih + b_hh folded)
    whf_ref,    # (H, 4H)   bf16  forward  W_hh^T
    whb_ref,    # (H, 4H)   bf16  backward W_hh^T
    wc_ref,     # (2H, Cp)  bf16  classifier weight^T, lane-padded to Cp
    bc_ref,     # (1, Cp)   f32   classifier bias, lane-padded
    out_ref,    # (B, Cp)   f32   logits (padded)
    proj_ref,   # scratch (S*B, 8H) f32 — precomputed input projections
    *, seq_len, batch,
):
    S, B = seq_len, batch
    H = whf_ref.shape[0]
    G = 4 * H

    # ---- (1) hoisted input projection: one big, well-shaped MXU matmul -----
    #      X (S*B,E) @ [W_ih_fwd | W_ih_bwd] (E,8H) + biases, all timesteps.
    proj_ref[...] = (
        jnp.dot(x_ref[...], wi_ref[...], preferred_element_type=jnp.float32)
        + b_ref[...]
    )

    # ---- hoisted loop invariants --------------------------------------------
    whf = whf_ref[...]                 # (H, 4H) bf16, stays resident
    whb = whb_ref[...]                 # (H, 4H) bf16
    lengths = len_ref[...]             # (B, 1)  i32

    zeros = jnp.zeros((B, H), jnp.float32)
    h_f, c_f, h_b, c_b = zeros, zeros, zeros, zeros
    sel_f, sel_b = zeros, zeros

    def cell(gates, c_prev):
        # gates: (B, 4H) f32, PyTorch gate order [i, f, g, o]
        i_g = jax.nn.sigmoid(gates[:, 0 * H:1 * H])
        f_g = jax.nn.sigmoid(gates[:, 1 * H:2 * H])
        g_g = jnp.tanh(gates[:, 2 * H:3 * H])
        o_g = jax.nn.sigmoid(gates[:, 3 * H:4 * H])
        c_new = f_g * c_prev + i_g * g_g
        h_new = o_g * jnp.tanh(c_new)
        return h_new, c_new

    # ---- (2) fused, fully-unrolled recurrence -------------------------------
    # Forward step t and backward step S-1-t are data-independent; only the
    # tiny (B,H)@(H,4H) recurrent matmuls remain inside the loop.
    for t in range(S):
        tb = S - 1 - t
        g_f = proj_ref[t * B:(t + 1) * B, 0:G] + jnp.dot(
            h_f.astype(jnp.bfloat16), whf, preferred_element_type=jnp.float32)
        g_b = proj_ref[tb * B:(tb + 1) * B, G:2 * G] + jnp.dot(
            h_b.astype(jnp.bfloat16), whb, preferred_element_type=jnp.float32)
        h_f, c_f = cell(g_f, c_f)
        h_b, c_b = cell(g_b, c_b)
        # capture hidden state at each example's last valid position
        sel_f = jnp.where(lengths == t, h_f, sel_f)
        sel_b = jnp.where(lengths == tb, h_b, sel_b)

    # ---- (3) classifier (Dropout(0.3) is identity in eval mode) -------------
    last = jnp.concatenate([sel_f, sel_b], axis=-1).astype(jnp.bfloat16)  # (B, 2H)
    out_ref[...] = (
        jnp.dot(last, wc_ref[...], preferred_element_type=jnp.float32) + bc_ref[...]
    )


# ------------------------------- wrapper -------------------------------------
@jax.jit
def simple_emotion_forward(input_ids, attention_mask, params):
    emb_table = params["embedding"]                    # (V, E)
    B, S = input_ids.shape
    E = emb_table.shape[1]
    H = params["whf"].shape[0]
    C = params["bc"].shape[1]
    C_PAD = ((C + 127) // 128) * 128                   # lane-dense output store

    # glue: embedding gather + time-major layout, flattened to (S*B, E)
    embedded = jnp.take(emb_table, input_ids, axis=0)            # (B, S, E)
    x_tm = jnp.transpose(embedded, (1, 0, 2)).reshape(S * B, E)  # (S*B, E)
    x_bf = x_tm.astype(jnp.bfloat16)

    lengths = (jnp.sum(attention_mask, axis=1) - 1).astype(jnp.int32).reshape(B, 1)

    # combined input-projection weights/biases for both directions
    wi = jnp.concatenate([params["wif"], params["wib"]], axis=1).astype(jnp.bfloat16)  # (E, 8H)
    b = jnp.concatenate([params["bf"], params["bb"]], axis=1)                           # (1, 8H) f32

    whf = params["whf"].astype(jnp.bfloat16)
    whb = params["whb"].astype(jnp.bfloat16)
    wc_pad = jnp.pad(params["wc"], ((0, 0), (0, C_PAD - C))).astype(jnp.bfloat16)       # (2H, Cp)
    bc_pad = jnp.pad(params["bc"], ((0, 0), (0, C_PAD - C)))                            # (1, Cp) f32

    vmem = pl.BlockSpec(memory_space=pltpu.MemorySpace.VMEM)
    kernel = functools.partial(bilstm_classifier_kernel, seq_len=S, batch=B)

    logits_pad = pl.pallas_call(
        kernel,
        out_shape=jax.ShapeDtypeStruct((B, C_PAD), jnp.float32),
        in_specs=[vmem] * 8,
        out_specs=vmem,
        scratch_shapes=[pltpu.VMEM((S * B, 8 * H), jnp.float32)],
    )(x_bf, lengths, wi, b, whf, whb, wc_pad, bc_pad)

    return logits_pad[:, :C]


# --------------------------- pure-JAX reference -------------------------------
def reference_forward(input_ids, attention_mask, params, matmul_dtype=jnp.float32):
    emb = jnp.take(params["embedding"], input_ids, axis=0)  # (B, S, E)
    H = params["whf"].shape[0]

    def mm(a, b):
        return jnp.dot(a.astype(matmul_dtype), b.astype(matmul_dtype),
                       preferred_element_type=jnp.float32)

    def run_dir(x_seq, wi, wh, b):  # x_seq: (S, B, E)
        def cell(carry, x_t):
            h, c = carry
            gates = mm(x_t, wi) + mm(h, wh) + b
            i_g = jax.nn.sigmoid(gates[:, 0 * H:1 * H])
            f_g = jax.nn.sigmoid(gates[:, 1 * H:2 * H])
            g_g = jnp.tanh(gates[:, 2 * H:3 * H])
            o_g = jax.nn.sigmoid(gates[:, 3 * H:4 * H])
            c = f_g * c + i_g * g_g
            h = o_g * jnp.tanh(c)
            return (h, c), h

        Bsz = x_seq.shape[1]
        init = (jnp.zeros((Bsz, H), jnp.float32), jnp.zeros((Bsz, H), jnp.float32))
        _, hs = jax.lax.scan(cell, init, x_seq)
        return hs  # (S, B, H)

    x_tm = jnp.transpose(emb, (1, 0, 2))
    h_f = run_dir(x_tm, params["wif"], params["whf"], params["bf"])
    h_b = run_dir(x_tm[::-1], params["wib"], params["whb"], params["bb"])[::-1]
    lstm_out = jnp.concatenate([h_f, h_b], axis=-1).transpose(1, 0, 2)  # (B, S, 2H)

    lengths = jnp.sum(attention_mask, axis=1) - 1
    last = lstm_out[jnp.arange(lstm_out.shape[0]), lengths]             # (B, 2H)
    return mm(last, params["wc"]) + params["bc"]


# --------------------------------- main ---------------------------------------
if __name__ == "__main__":
    # small, module-consistent shapes
    VOCAB, EMBED, HIDDEN, NUM_EMOTIONS = 128, 128, 128, 27
    B, S = 8, 8

    key = jax.random.PRNGKey(0)
    ks = jax.random.split(key, 12)
    bound = 1.0 / (HIDDEN ** 0.5)

    def u(k, shape):
        return jax.random.uniform(k, shape, jnp.float32, -bound, bound)

    params = {
        "embedding": 0.02 * jax.random.normal(ks[0], (VOCAB, EMBED), jnp.float32),
        # forward direction (W_ih^T, W_hh^T, combined bias), gate order [i,f,g,o]
        "wif": u(ks[1], (EMBED, 4 * HIDDEN)),
        "whf": u(ks[2], (HIDDEN, 4 * HIDDEN)),
        "bf":  u(ks[3], (1, 4 * HIDDEN)) + u(ks[4], (1, 4 * HIDDEN)),
        # backward direction
        "wib": u(ks[5], (EMBED, 4 * HIDDEN)),
        "whb": u(ks[6], (HIDDEN, 4 * HIDDEN)),
        "bb":  u(ks[7], (1, 4 * HIDDEN)) + u(ks[8], (1, 4 * HIDDEN)),
        # classifier (W^T, b)
        "wc":  u(ks[9], (2 * HIDDEN, NUM_EMOTIONS)),
        "bc":  u(ks[10], (1, NUM_EMOTIONS)),
    }

    input_ids = jax.random.randint(ks[11], (B, S), 0, VOCAB, dtype=jnp.int32)
    # variable-length attention mask (contiguous prefix of ones)
    lens = jnp.array([8, 6, 4, 8, 2, 7, 5, 3], dtype=jnp.int32)
    attention_mask = (jnp.arange(S)[None, :] < lens[:, None]).astype(jnp.int32)

    logits = simple_emotion_forward(input_ids, attention_mask, params)
    logits = jax.block_until_ready(logits)

    # tight check against a reference that uses the same bf16 matmul operands
    ref_bf16 = reference_forward(input_ids, attention_mask, params,
                                 matmul_dtype=jnp.bfloat16)
    # loose check against the full-f32 module semantics
    ref_f32 = reference_forward(input_ids, attention_mask, params,
                                matmul_dtype=jnp.float32)

    assert logits.shape == (B, NUM_EMOTIONS)
    assert jnp.allclose(logits, ref_bf16, rtol=2e-3, atol=2e-3), \
        "mismatch vs bf16-matched reference"
    assert jnp.allclose(logits, ref_f32, rtol=5e-2, atol=5e-2), \
        "mismatch vs f32 reference"

    print("KERNEL_OK")
</pallas_src>

<mosaic_0001>
module attributes {stable_mosaic.version = 11 : i64} {
  func.func @bilstm_classifier_kernel(%arg0: memref<64x128xbf16, #tpu.memory_space<vmem>>, %arg1: memref<8x1xi32, #tpu.memory_space<vmem>>, %arg2: memref<128x1024xbf16, #tpu.memory_space<vmem>>, %arg3: memref<1x1024xf32, #tpu.memory_space<vmem>>, %arg4: memref<128x512xbf16, #tpu.memory_space<vmem>>, %arg5: memref<128x512xbf16, #tpu.memory_space<vmem>>, %arg6: memref<256x128xbf16, #tpu.memory_space<vmem>>, %arg7: memref<1x128xf32, #tpu.memory_space<vmem>>, %arg8: memref<8x128xf32, #tpu.memory_space<vmem>>, %arg9: memref<64x1024xf32, #tpu.memory_space<vmem>>) attributes {dimension_semantics = [], scalar_prefetch = 0 : i64, scratch_operands = 1 : i64, tpu.core_type = #tpu.core_type<tc>} {
    %c0 = arith.constant 0 : index
    %c0_0 = arith.constant 0 : index
    %0 = vector.load %arg0[%c0, %c0_0] : memref<64x128xbf16, #tpu.memory_space<vmem>>, vector<64x128xbf16>
    %c0_1 = arith.constant 0 : index
    %c0_2 = arith.constant 0 : index
    %1 = vector.load %arg2[%c0_1, %c0_2] : memref<128x1024xbf16, #tpu.memory_space<vmem>>, vector<128x1024xbf16>
    %cst = arith.constant dense<0.000000e+00> : vector<64x1024xf32>
    %2 = tpu.matmul %0, %1, %cst {dimension_numbers = #tpu.dot_dimension_numbers<[1], [0], [0], [1], [0, 0, 1, 1], [], []>} : vector<64x128xbf16>, vector<128x1024xbf16>, vector<64x1024xf32> -> vector<64x1024xf32>
    %c0_3 = arith.constant 0 : index
    %c0_4 = arith.constant 0 : index
    %3 = vector.load %arg3[%c0_3, %c0_4] : memref<1x1024xf32, #tpu.memory_space<vmem>>, vector<1x1024xf32>
    %4 = vector.broadcast %3 : vector<1x1024xf32> to vector<64x1024xf32>
    %5 = arith.addf %2, %4 : vector<64x1024xf32>
    %c0_5 = arith.constant 0 : index
    %c0_6 = arith.constant 0 : index
    %6 = vector.load %arg9[%c0_5, %c0_6] : memref<64x1024xf32, #tpu.memory_space<vmem>>, vector<64x1024xf32>
    tpu.vector_store %arg9[%c0_5, %c0_6], %5 {strides = array<i32>} : memref<64x1024xf32, #tpu.memory_space<vmem>>, vector<64x1024xf32>,
    %c0_7 = arith.constant 0 : index
    %c0_8 = arith.constant 0 : index
    %7 = vector.load %arg4[%c0_7, %c0_8] : memref<128x512xbf16, #tpu.memory_space<vmem>>, vector<128x512xbf16>
    %c0_9 = arith.constant 0 : index
    %c0_10 = arith.constant 0 : index
    %8 = vector.load %arg5[%c0_9, %c0_10] : memref<128x512xbf16, #tpu.memory_space<vmem>>, vector<128x512xbf16>
    %c0_11 = arith.constant 0 : index
    %c0_12 = arith.constant 0 : index
    %9 = vector.load %arg1[%c0_11, %c0_12] : memref<8x1xi32, #tpu.memory_space<vmem>>, vector<8x1xi32>
    %cst_13 = arith.constant 0.000000e+00 : f32
    %10 = vector.broadcast %cst_13 : f32 to vector<8x128xf32>
    %c0_14 = arith.constant 0 : index
    %c0_15 = arith.constant 0 : index
    %11 = vector.load %arg9[%c0_14, %c0_15] : memref<64x1024xf32, #tpu.memory_space<vmem>>, vector<8x512xf32>
    %12 = arith.truncf %10 : vector<8x128xf32> to vector<8x128xbf16>
    %cst_16 = arith.constant dense<0.000000e+00> : vector<8x512xf32>
    %13 = tpu.matmul %12, %7, %cst_16 {dimension_numbers = #tpu.dot_dimension_numbers<[1], [0], [0], [1], [0, 0, 1, 1], [], []>} : vector<8x128xbf16>, vector<128x512xbf16>, vector<8x512xf32> -> vector<8x512xf32>
    %14 = arith.addf %11, %13 : vector<8x512xf32>
    %c56 = arith.constant 56 : index
    %c512 = arith.constant 512 : index
    %15 = vector.load %arg9[%c56, %c512] : memref<64x1024xf32, #tpu.memory_space<vmem>>, vector<8x512xf32>
    %16 = arith.truncf %10 : vector<8x128xf32> to vector<8x128xbf16>
    %cst_17 = arith.constant dense<0.000000e+00> : vector<8x512xf32>
    %17 = tpu.matmul %16, %8, %cst_17 {dimension_numbers = #tpu.dot_dimension_numbers<[1], [0], [0], [1], [0, 0, 1, 1], [], []>} : vector<8x128xbf16>, vector<128x512xbf16>, vector<8x512xf32> -> vector<8x512xf32>
    %18 = arith.addf %15, %17 : vector<8x512xf32>
    %19 = vector.extract_strided_slice %14 {offsets = [0, 0], sizes = [8, 128], strides = [1, 1]} : vector<8x512xf32> to vector<8x128xf32>
    %20 = arith.negf %19 : vector<8x128xf32>
    %21 = math.exp %20 : vector<8x128xf32>
    %cst_18 = arith.constant 1.000000e+00 : f32
    %22 = vector.broadcast %cst_18 : f32 to vector<8x128xf32>
    %23 = arith.addf %22, %21 : vector<8x128xf32>
    %24 = arith.divf %22, %23 : vector<8x128xf32>
    %25 = vector.extract_strided_slice %14 {offsets = [0, 128], sizes = [8, 128], strides = [1, 1]} : vector<8x512xf32> to vector<8x128xf32>
    %26 = arith.negf %25 : vector<8x128xf32>
    %27 = math.exp %26 : vector<8x128xf32>
    %cst_19 = arith.constant 1.000000e+00 : f32
    %28 = vector.broadcast %cst_19 : f32 to vector<8x128xf32>
    %29 = arith.addf %28, %27 : vector<8x128xf32>
    %30 = arith.divf %28, %29 : vector<8x128xf32>
    %31 = vector.extract_strided_slice %14 {offsets = [0, 256], sizes = [8, 128], strides = [1, 1]} : vector<8x512xf32> to vector<8x128xf32>
    %32 = math.tanh %31 : vector<8x128xf32>
    %33 = vector.extract_strided_slice %14 {offsets = [0, 384], sizes = [8, 128], strides = [1, 1]} : vector<8x512xf32> to vector<8x128xf32>
    %34 = arith.negf %33 : vector<8x128xf32>
    %35 = math.exp %34 : vector<8x128xf32>
    %cst_20 = arith.constant 1.000000e+00 : f32
    %36 = vector.broadcast %cst_20 : f32 to vector<8x128xf32>
    %37 = arith.addf %36, %35 : vector<8x128xf32>
    %38 = arith.divf %36, %37 : vector<8x128xf32>
    %39 = arith.mulf %30, %10 : vector<8x128xf32>
    %40 = arith.mulf %24, %32 : vector<8x128xf32>
    %41 = arith.addf %39, %40 : vector<8x128xf32>
    %42 = math.tanh %41 : vector<8x128xf32>
    %43 = arith.mulf %38, %42 : vector<8x128xf32>
    %44 = vector.extract_strided_slice %18 {offsets = [0, 0], sizes = [8, 128], strides = [1, 1]} : vector<8x512xf32> to vector<8x128xf32>
    %45 = arith.negf %44 : vector<8x128xf32>
    %46 = math.exp %45 : vector<8x128xf32>
    %cst_21 = arith.constant 1.000000e+00 : f32
    %47 = vector.broadcast %cst_21 : f32 to vector<8x128xf32>
    %48 = arith.addf %47, %46 : vector<8x128xf32>
    %49 = arith.divf %47, %48 : vector<8x128xf32>
    %50 = vector.extract_strided_slice %18 {offsets = [0, 128], sizes = [8, 128], strides = [1, 1]} : vector<8x512xf32> to vector<8x128xf32>
    %51 = arith.negf %50 : vector<8x128xf32>
    %52 = math.exp %51 : vector<8x128xf32>
    %cst_22 = arith.constant 1.000000e+00 : f32
    %53 = vector.broadcast %cst_22 : f32 to vector<8x128xf32>
    %54 = arith.addf %53, %52 : vector<8x128xf32>
    %55 = arith.divf %53, %54 : vector<8x128xf32>
    %56 = vector.extract_strided_slice %18 {offsets = [0, 256], sizes = [8, 128], strides = [1, 1]} : vector<8x512xf32> to vector<8x128xf32>
    %57 = math.tanh %56 : vector<8x128xf32>
    %58 = vector.extract_strided_slice %18 {offsets = [0, 384], sizes = [8, 128], strides = [1, 1]} : vector<8x512xf32> to vector<8x128xf32>
    %59 = arith.negf %58 : vector<8x128xf32>
    %60 = math.exp %59 : vector<8x128xf32>
    %cst_23 = arith.constant 1.000000e+00 : f32
    %61 = vector.broadcast %cst_23 : f32 to vector<8x128xf32>
    %62 = arith.addf %61, %60 : vector<8x128xf32>
    %63 = arith.divf %61, %62 : vector<8x128xf32>
    %64 = arith.mulf %55, %10 : vector<8x128xf32>
    %65 = arith.mulf %49, %57 : vector<8x128xf32>
    %66 = arith.addf %64, %65 : vector<8x128xf32>
    %67 = math.tanh %66 : vector<8x128xf32>
    %68 = arith.mulf %63, %67 : vector<8x128xf32>
    %c0_i32 = arith.constant 0 : i32
    %69 = vector.broadcast %c0_i32 : i32 to vector<8x1xi32>
    %70 = arith.cmpi eq, %9, %69 : vector<8x1xi32>
    %71 = vector.shape_cast %70 : vector<8x1xi1> to vector<8x1xi1>
    %72 = vector.broadcast %71 : vector<8x1xi1> to vector<8x128xi1>
    %73 = arith.select %72, %43, %10 : vector<8x128xi1>, vector<8x128xf32>
    %c7_i32 = arith.constant 7 : i32
    %74 = vector.broadcast %c7_i32 : i32 to vector<8x1xi32>
    %75 = arith.cmpi eq, %9, %74 : vector<8x1xi32>
    %76 = vector.shape_cast %75 : vector<8x1xi1> to vector<8x1xi1>
    %77 = vector.broadcast %76 : vector<8x1xi1> to vector<8x128xi1>
    %78 = arith.select %77, %68, %10 : vector<8x128xi1>, vector<8x128xf32>
    %c8 = arith.constant 8 : index
    %c0_24 = arith.constant 0 : index
    %79 = vector.load %arg9[%c8, %c0_24] : memref<64x1024xf32, #tpu.memory_space<vmem>>, vector<8x512xf32>
    %80 = arith.truncf %43 : vector<8x128xf32> to vector<8x128xbf16>
    %cst_25 = arith.constant dense<0.000000e+00> : vector<8x512xf32>
    %81 = tpu.matmul %80, %7, %cst_25 {dimension_numbers = #tpu.dot_dimension_numbers<[1], [0], [0], [1], [0, 0, 1, 1], [], []>} : vector<8x128xbf16>, vector<128x512xbf16>, vector<8x512xf32> -> vector<8x512xf32>
    %82 = arith.addf %79, %81 : vector<8x512xf32>
    %c48 = arith.constant 48 : index
    %c512_26 = arith.constant 512 : index
    %83 = vector.load %arg9[%c48, %c512_26] : memref<64x1024xf32, #tpu.memory_space<vmem>>, vector<8x512xf32>
    %84 = arith.truncf %68 : vector<8x128xf32> to vector<8x128xbf16>
    %cst_27 = arith.constant dense<0.000000e+00> : vector<8x512xf32>
    %85 = tpu.matmul %84, %8, %cst_27 {dimension_numbers = #tpu.dot_dimension_numbers<[1], [0], [0], [1], [0, 0, 1, 1], [], []>} : vector<8x128xbf16>, vector<128x512xbf16>, vector<8x512xf32> -> vector<8x512xf32>
    %86 = arith.addf %83, %85 : vector<8x512xf32>
    %87 = vector.extract_strided_slice %82 {offsets = [0, 0], sizes = [8, 128], strides = [1, 1]} : vector<8x512xf32> to vector<8x128xf32>
    %88 = arith.negf %87 : vector<8x128xf32>
    %89 = math.exp %88 : vector<8x128xf32>
    %cst_28 = arith.constant 1.000000e+00 : f32
    %90 = vector.broadcast %cst_28 : f32 to vector<8x128xf32>
    %91 = arith.addf %90, %89 : vector<8x128xf32>
    %92 = arith.divf %90, %91 : vector<8x128xf32>
    %93 = vector.extract_strided_slice %82 {offsets = [0, 128], sizes = [8, 128], strides = [1, 1]} : vector<8x512xf32> to vector<8x128xf32>
    %94 = arith.negf %93 : vector<8x128xf32>
    %95 = math.exp %94 : vector<8x128xf32>
    %cst_29 = arith.constant 1.000000e+00 : f32
    %96 = vector.broadcast %cst_29 : f32 to vector<8x128xf32>
    %97 = arith.addf %96, %95 : vector<8x128xf32>
    %98 = arith.divf %96, %97 : vector<8x128xf32>
    %99 = vector.extract_strided_slice %82 {offsets = [0, 256], sizes = [8, 128], strides = [1, 1]} : vector<8x512xf32> to vector<8x128xf32>
    %100 = math.tanh %99 : vector<8x128xf32>
    %101 = vector.extract_strided_slice %82 {offsets = [0, 384], sizes = [8, 128], strides = [1, 1]} : vector<8x512xf32> to vector<8x128xf32>
    %102 = arith.negf %101 : vector<8x128xf32>
    %103 = math.exp %102 : vector<8x128xf32>
    %cst_30 = arith.constant 1.000000e+00 : f32
    %104 = vector.broadcast %cst_30 : f32 to vector<8x128xf32>
    %105 = arith.addf %104, %103 : vector<8x128xf32>
    %106 = arith.divf %104, %105 : vector<8x128xf32>
    %107 = arith.mulf %98, %41 : vector<8x128xf32>
    %108 = arith.mulf %92, %100 : vector<8x128xf32>
    %109 = arith.addf %107, %108 : vector<8x128xf32>
    %110 = math.tanh %109 : vector<8x128xf32>
    %111 = arith.mulf %106, %110 : vector<8x128xf32>
    %112 = vector.extract_strided_slice %86 {offsets = [0, 0], sizes = [8, 128], strides = [1, 1]} : vector<8x512xf32> to vector<8x128xf32>
    %113 = arith.negf %112 : vector<8x128xf32>
    %114 = math.exp %113 : vector<8x128xf32>
    %cst_31 = arith.constant 1.000000e+00 : f32
    %115 = vector.broadcast %cst_31 : f32 to vector<8x128xf32>
    %116 = arith.addf %115, %114 : vector<8x128xf32>
    %117 = arith.divf %115, %116 : vector<8x128xf32>
    %118 = vector.extract_strided_slice %86 {offsets = [0, 128], sizes = [8, 128], strides = [1, 1]} : vector<8x512xf32> to vector<8x128xf32>
    %119 = arith.negf %118 : vector<8x128xf32>
    %120 = math.exp %119 : vector<8x128xf32>
    %cst_32 = arith.constant 1.000000e+00 : f32
    %121 = vector.broadcast %cst_32 : f32 to vector<8x128xf32>
    %122 = arith.addf %121, %120 : vector<8x128xf32>
    %123 = arith.divf %121, %122 : vector<8x128xf32>
    %124 = vector.extract_strided_slice %86 {offsets = [0, 256], sizes = [8, 128], strides = [1, 1]} : vector<8x512xf32> to vector<8x128xf32>
    %125 = math.tanh %124 : vector<8x128xf32>
    %126 = vector.extract_strided_slice %86 {offsets = [0, 384], sizes = [8, 128], strides = [1, 1]} : vector<8x512xf32> to vector<8x128xf32>
    %127 = arith.negf %126 : vector<8x128xf32>
    %128 = math.exp %127 : vector<8x128xf32>
    %cst_33 = arith.constant 1.000000e+00 : f32
    %129 = vector.broadcast %cst_33 : f32 to vector<8x128xf32>
    %130 = arith.addf %129, %128 : vector<8x128xf32>
    %131 = arith.divf %129, %130 : vector<8x128xf32>
    %132 = arith.mulf %123, %66 : vector<8x128xf32>
    %133 = arith.mulf %117, %125 : vector<8x128xf32>
    %134 = arith.addf %132, %133 : vector<8x128xf32>
    %135 = math.tanh %134 : vector<8x128xf32>
    %136 = arith.mulf %131, %135 : vector<8x128xf32>
    %c1_i32 = arith.constant 1 : i32
    %137 = vector.broadcast %c1_i32 : i32 to vector<8x1xi32>
    %138 = arith.cmpi eq, %9, %137 : vector<8x1xi32>
    %139 = vector.shape_cast %138 : vector<8x1xi1> to vector<8x1xi1>
    %140 = vector.broadcast %139 : vector<8x1xi1> to vector<8x128xi1>
    %141 = arith.select %140, %111, %73 : vector<8x128xi1>, vector<8x128xf32>
    %c6_i32 = arith.constant 6 : i32
    %142 = vector.broadcast %c6_i32 : i32 to vector<8x1xi32>
    %143 = arith.cmpi eq, %9, %142 : vector<8x1xi32>
    %144 = vector.shape_cast %143 : vector<8x1xi1> to vector<8x1xi1>
    %145 = vector.broadcast %144 : vector<8x1xi1> to vector<8x128xi1>
    %146 = arith.select %145, %136, %78 : vector<8x128xi1>, vector<8x128xf32>
    %c16 = arith.constant 16 : index
    %c0_34 = arith.constant 0 : index
    %147 = vector.load %arg9[%c16, %c0_34] : memref<64x1024xf32, #tpu.memory_space<vmem>>, vector<8x512xf32>
    %148 = arith.truncf %111 : vector<8x128xf32> to vector<8x128xbf16>
    %cst_35 = arith.constant dense<0.000000e+00> : vector<8x512xf32>
    %149 = tpu.matmul %148, %7, %cst_35 {dimension_numbers = #tpu.dot_dimension_numbers<[1], [0], [0], [1], [0, 0, 1, 1], [], []>} : vector<8x128xbf16>, vector<128x512xbf16>, vector<8x512xf32> -> vector<8x512xf32>
    %150 = arith.addf %147, %149 : vector<8x512xf32>
    %c40 = arith.constant 40 : index
    %c512_36 = arith.constant 512 : index
    %151 = vector.load %arg9[%c40, %c512_36] : memref<64x1024xf32, #tpu.memory_space<vmem>>, vector<8x512xf32>
    %152 = arith.truncf %136 : vector<8x128xf32> to vector<8x128xbf16>
    %cst_37 = arith.constant dense<0.000000e+00> : vector<8x512xf32>
    %153 = tpu.matmul %152, %8, %cst_37 {dimension_numbers = #tpu.dot_dimension_numbers<[1], [0], [0], [1], [0, 0, 1, 1], [], []>} : vector<8x128xbf16>, vector<128x512xbf16>, vector<8x512xf32> -> vector<8x512xf32>
    %154 = arith.addf %151, %153 : vector<8x512xf32>
    %155 = vector.extract_strided_slice %150 {offsets = [0, 0], sizes = [8, 128], strides = [1, 1]} : vector<8x512xf32> to vector<8x128xf32>
    %156 = arith.negf %155 : vector<8x128xf32>
    %157 = math.exp %156 : vector<8x128xf32>
    %cst_38 = arith.constant 1.000000e+00 : f32
    %158 = vector.broadcast %cst_38 : f32 to vector<8x128xf32>
    %159 = arith.addf %158, %157 : vector<8x128xf32>
    %160 = arith.divf %158, %159 : vector<8x128xf32>
    %161 = vector.extract_strided_slice %150 {offsets = [0, 128], sizes = [8, 128], strides = [1, 1]} : vector<8x512xf32> to vector<8x128xf32>
    %162 = arith.negf %161 : vector<8x128xf32>
    %163 = math.exp %162 : vector<8x128xf32>
    %cst_39 = arith.constant 1.000000e+00 : f32
    %164 = vector.broadcast %cst_39 : f32 to vector<8x128xf32>
    %165 = arith.addf %164, %163 : vector<8x128xf32>
    %166 = arith.divf %164, %165 : vector<8x128xf32>
    %167 = vector.extract_strided_slice %150 {offsets = [0, 256], sizes = [8, 128], strides = [1, 1]} : vector<8x512xf32> to vector<8x128xf32>
    %168 = math.tanh %167 : vector<8x128xf32>
    %169 = vector.extract_strided_slice %150 {offsets = [0, 384], sizes = [8, 128], strides = [1, 1]} : vector<8x512xf32> to vector<8x128xf32>
    %170 = arith.negf %169 : vector<8x128xf32>
    %171 = math.exp %170 : vector<8x128xf32>
    %cst_40 = arith.constant 1.000000e+00 : f32
    %172 = vector.broadcast %cst_40 : f32 to vector<8x128xf32>
    %173 = arith.addf %172, %171 : vector<8x128xf32>
    %174 = arith.divf %172, %173 : vector<8x128xf32>
    %175 = arith.mulf %166, %109 : vector<8x128xf32>
    %176 = arith.mulf %160, %168 : vector<8x128xf32>
    %177 = arith.addf %175, %176 : vector<8x128xf32>
    %178 = math.tanh %177 : vector<8x128xf32>
    %179 = arith.mulf %174, %178 : vector<8x128xf32>
    %180 = vector.extract_strided_slice %154 {offsets = [0, 0], sizes = [8, 128], strides = [1, 1]} : vector<8x512xf32> to vector<8x128xf32>
    %181 = arith.negf %180 : vector<8x128xf32>
    %182 = math.exp %181 : vector<8x128xf32>
    %cst_41 = arith.constant 1.000000e+00 : f32
    %183 = vector.broadcast %cst_41 : f32 to vector<8x128xf32>
    %184 = arith.addf %183, %182 : vector<8x128xf32>
    %185 = arith.divf %183, %184 : vector<8x128xf32>
    %186 = vector.extract_strided_slice %154 {offsets = [0, 128], sizes = [8, 128], strides = [1, 1]} : vector<8x512xf32> to vector<8x128xf32>
    %187 = arith.negf %186 : vector<8x128xf32>
    %188 = math.exp %187 : vector<8x128xf32>
    %cst_42 = arith.constant 1.000000e+00 : f32
    %189 = vector.broadcast %cst_42 : f32 to vector<8x128xf32>
    %190 = arith.addf %189, %188 : vector<8x128xf32>
    %191 = arith.divf %189, %190 : vector<8x128xf32>
    %192 = vector.extract_strided_slice %154 {offsets = [0, 256], sizes = [8, 128], strides = [1, 1]} : vector<8x512xf32> to vector<8x128xf32>
    %193 = math.tanh %192 : vector<8x128xf32>
    %194 = vector.extract_strided_slice %154 {offsets = [0, 384], sizes = [8, 128], strides = [1, 1]} : vector<8x512xf32> to vector<8x128xf32>
    %195 = arith.negf %194 : vector<8x128xf32>
    %196 = math.exp %195 : vector<8x128xf32>
    %cst_43 = arith.constant 1.000000e+00 : f32
    %197 = vector.broadcast %cst_43 : f32 to vector<8x128xf32>
    %198 = arith.addf %197, %196 : vector<8x128xf32>
    %199 = arith.divf %197, %198 : vector<8x128xf32>
    %200 = arith.mulf %191, %134 : vector<8x128xf32>
    %201 = arith.mulf %185, %193 : vector<8x128xf32>
    %202 = arith.addf %200, %201 : vector<8x128xf32>
    %203 = math.tanh %202 : vector<8x128xf32>
    %204 = arith.mulf %199, %203 : vector<8x128xf32>
    %c2_i32 = arith.constant 2 : i32
    %205 = vector.broadcast %c2_i32 : i32 to vector<8x1xi32>
    %206 = arith.cmpi eq, %9, %205 : vector<8x1xi32>
    %207 = vector.shape_cast %206 : vector<8x1xi1> to vector<8x1xi1>
    %208 = vector.broadcast %207 : vector<8x1xi1> to vector<8x128xi1>
    %209 = arith.select %208, %179, %141 : vector<8x128xi1>, vector<8x128xf32>
    %c5_i32 = arith.constant 5 : i32
    %210 = vector.broadcast %c5_i32 : i32 to vector<8x1xi32>
    %211 = arith.cmpi eq, %9, %210 : vector<8x1xi32>
    %212 = vector.shape_cast %211 : vector<8x1xi1> to vector<8x1xi1>
    %213 = vector.broadcast %212 : vector<8x1xi1> to vector<8x128xi1>
    %214 = arith.select %213, %204, %146 : vector<8x128xi1>, vector<8x128xf32>
    %c24 = arith.constant 24 : index
    %c0_44 = arith.constant 0 : index
    %215 = vector.load %arg9[%c24, %c0_44] : memref<64x1024xf32, #tpu.memory_space<vmem>>, vector<8x512xf32>
    %216 = arith.truncf %179 : vector<8x128xf32> to vector<8x128xbf16>
    %cst_45 = arith.constant dense<0.000000e+00> : vector<8x512xf32>
    %217 = tpu.matmul %216, %7, %cst_45 {dimension_numbers = #tpu.dot_dimension_numbers<[1], [0], [0], [1], [0, 0, 1, 1], [], []>} : vector<8x128xbf16>, vector<128x512xbf16>, vector<8x512xf32> -> vector<8x512xf32>
    %218 = arith.addf %215, %217 : vector<8x512xf32>
    %c32 = arith.constant 32 : index
    %c512_46 = arith.constant 512 : index
    %219 = vector.load %arg9[%c32, %c512_46] : memref<64x1024xf32, #tpu.memory_space<vmem>>, vector<8x512xf32>
    %220 = arith.truncf %204 : vector<8x128xf32> to vector<8x128xbf16>
    %cst_47 = arith.constant dense<0.000000e+00> : vector<8x512xf32>
    %221 = tpu.matmul %220, %8, %cst_47 {dimension_numbers = #tpu.dot_dimension_numbers<[1], [0], [0], [1], [0, 0, 1, 1], [], []>} : vector<8x128xbf16>, vector<128x512xbf16>, vector<8x512xf32> -> vector<8x512xf32>
    %222 = arith.addf %219, %221 : vector<8x512xf32>
    %223 = vector.extract_strided_slice %218 {offsets = [0, 0], sizes = [8, 128], strides = [1, 1]} : vector<8x512xf32> to vector<8x128xf32>
    %224 = arith.negf %223 : vector<8x128xf32>
    %225 = math.exp %224 : vector<8x128xf32>
    %cst_48 = arith.constant 1.000000e+00 : f32
    %226 = vector.broadcast %cst_48 : f32 to vector<8x128xf32>
    %227 = arith.addf %226, %225 : vector<8x128xf32>
    %228 = arith.divf %226, %227 : vector<8x128xf32>
    %229 = vector.extract_strided_slice %218 {offsets = [0, 128], sizes = [8, 128], strides = [1, 1]} : vector<8x512xf32> to vector<8x128xf32>
    %230 = arith.negf %229 : vector<8x128xf32>
    %231 = math.exp %230 : vector<8x128xf32>
    %cst_49 = arith.constant 1.000000e+00 : f32
    %232 = vector.broadcast %cst_49 : f32 to vector<8x128xf32>
    %233 = arith.addf %232, %231 : vector<8x128xf32>
    %234 = arith.divf %232, %233 : vector<8x128xf32>
    %235 = vector.extract_strided_slice %218 {offsets = [0, 256], sizes = [8, 128], strides = [1, 1]} : vector<8x512xf32> to vector<8x128xf32>
    %236 = math.tanh %235 : vector<8x128xf32>
    %237 = vector.extract_strided_slice %218 {offsets = [0, 384], sizes = [8, 128], strides = [1, 1]} : vector<8x512xf32> to vector<8x128xf32>
    %238 = arith.negf %237 : vector<8x128xf32>
    %239 = math.exp %238 : vector<8x128xf32>
    %cst_50 = arith.constant 1.000000e+00 : f32
    %240 = vector.broadcast %cst_50 : f32 to vector<8x128xf32>
    %241 = arith.addf %240, %239 : vector<8x128xf32>
    %242 = arith.divf %240, %241 : vector<8x128xf32>
    %243 = arith.mulf %234, %177 : vector<8x128xf32>
    %244 = arith.mulf %228, %236 : vector<8x128xf32>
    %245 = arith.addf %243, %244 : vector<8x128xf32>
    %246 = math.tanh %245 : vector<8x128xf32>
    %247 = arith.mulf %242, %246 : vector<8x128xf32>
    %248 = vector.extract_strided_slice %222 {offsets = [0, 0], sizes = [8, 128], strides = [1, 1]} : vector<8x512xf32> to vector<8x128xf32>
    %249 = arith.negf %248 : vector<8x128xf32>
    %250 = math.exp %249 : vector<8x128xf32>
    %cst_51 = arith.constant 1.000000e+00 : f32
    %251 = vector.broadcast %cst_51 : f32 to vector<8x128xf32>
    %252 = arith.addf %251, %250 : vector<8x128xf32>
    %253 = arith.divf %251, %252 : vector<8x128xf32>
    %254 = vector.extract_strided_slice %222 {offsets = [0, 128], sizes = [8, 128], strides = [1, 1]} : vector<8x512xf32> to vector<8x128xf32>
    %255 = arith.negf %254 : vector<8x128xf32>
    %256 = math.exp %255 : vector<8x128xf32>
    %cst_52 = arith.constant 1.000000e+00 : f32
    %257 = vector.broadcast %cst_52 : f32 to vector<8x128xf32>
    %258 = arith.addf %257, %256 : vector<8x128xf32>
    %259 = arith.divf %257, %258 : vector<8x128xf32>
    %260 = vector.extract_strided_slice %222 {offsets = [0, 256], sizes = [8, 128], strides = [1, 1]} : vector<8x512xf32> to vector<8x128xf32>
    %261 = math.tanh %260 : vector<8x128xf32>
    %262 = vector.extract_strided_slice %222 {offsets = [0, 384], sizes = [8, 128], strides = [1, 1]} : vector<8x512xf32> to vector<8x128xf32>
    %263 = arith.negf %262 : vector<8x128xf32>
    %264 = math.exp %263 : vector<8x128xf32>
    %cst_53 = arith.constant 1.000000e+00 : f32
    %265 = vector.broadcast %cst_53 : f32 to vector<8x128xf32>
    %266 = arith.addf %265, %264 : vector<8x128xf32>
    %267 = arith.divf %265, %266 : vector<8x128xf32>
    %268 = arith.mulf %259, %202 : vector<8x128xf32>
    %269 = arith.mulf %253, %261 : vector<8x128xf32>
    %270 = arith.addf %268, %269 : vector<8x128xf32>
    %271 = math.tanh %270 : vector<8x128xf32>
    %272 = arith.mulf %267, %271 : vector<8x128xf32>
    %c3_i32 = arith.constant 3 : i32
    %273 = vector.broadcast %c3_i32 : i32 to vector<8x1xi32>
    %274 = arith.cmpi eq, %9, %273 : vector<8x1xi32>
    %275 = vector.shape_cast %274 : vector<8x1xi1> to vector<8x1xi1>
    %276 = vector.broadcast %275 : vector<8x1xi1> to vector<8x128xi1>
    %277 = arith.select %276, %247, %209 : vector<8x128xi1>, vector<8x128xf32>
    %c4_i32 = arith.constant 4 : i32
    %278 = vector.broadcast %c4_i32 : i32 to vector<8x1xi32>
    %279 = arith.cmpi eq, %9, %278 : vector<8x1xi32>
    %280 = vector.shape_cast %279 : vector<8x1xi1> to vector<8x1xi1>
    %281 = vector.broadcast %280 : vector<8x1xi1> to vector<8x128xi1>
    %282 = arith.select %281, %272, %214 : vector<8x128xi1>, vector<8x128xf32>
    %c32_54 = arith.constant 32 : index
    %c0_55 = arith.constant 0 : index
    %283 = vector.load %arg9[%c32_54, %c0_55] : memref<64x1024xf32, #tpu.memory_space<vmem>>, vector<8x512xf32>
    %284 = arith.truncf %247 : vector<8x128xf32> to vector<8x128xbf16>
    %cst_56 = arith.constant dense<0.000000e+00> : vector<8x512xf32>
    %285 = tpu.matmul %284, %7, %cst_56 {dimension_numbers = #tpu.dot_dimension_numbers<[1], [0], [0], [1], [0, 0, 1, 1], [], []>} : vector<8x128xbf16>, vector<128x512xbf16>, vector<8x512xf32> -> vector<8x512xf32>
    %286 = arith.addf %283, %285 : vector<8x512xf32>
    %c24_57 = arith.constant 24 : index
    %c512_58 = arith.constant 512 : index
    %287 = vector.load %arg9[%c24_57, %c512_58] : memref<64x1024xf32, #tpu.memory_space<vmem>>, vector<8x512xf32>
    %288 = arith.truncf %272 : vector<8x128xf32> to vector<8x128xbf16>
    %cst_59 = arith.constant dense<0.000000e+00> : vector<8x512xf32>
    %289 = tpu.matmul %288, %8, %cst_59 {dimension_numbers = #tpu.dot_dimension_numbers<[1], [0], [0], [1], [0, 0, 1, 1], [], []>} : vector<8x128xbf16>, vector<128x512xbf16>, vector<8x512xf32> -> vector<8x512xf32>
    %290 = arith.addf %287, %289 : vector<8x512xf32>
    %291 = vector.extract_strided_slice %286 {offsets = [0, 0], sizes = [8, 128], strides = [1, 1]} : vector<8x512xf32> to vector<8x128xf32>
    %292 = arith.negf %291 : vector<8x128xf32>
    %293 = math.exp %292 : vector<8x128xf32>
    %cst_60 = arith.constant 1.000000e+00 : f32
    %294 = vector.broadcast %cst_60 : f32 to vector<8x128xf32>
    %295 = arith.addf %294, %293 : vector<8x128xf32>
    %296 = arith.divf %294, %295 : vector<8x128xf32>
    %297 = vector.extract_strided_slice %286 {offsets = [0, 128], sizes = [8, 128], strides = [1, 1]} : vector<8x512xf32> to vector<8x128xf32>
    %298 = arith.negf %297 : vector<8x128xf32>
    %299 = math.exp %298 : vector<8x128xf32>
    %cst_61 = arith.constant 1.000000e+00 : f32
    %300 = vector.broadcast %cst_61 : f32 to vector<8x128xf32>
    %301 = arith.addf %300, %299 : vector<8x128xf32>
    %302 = arith.divf %300, %301 : vector<8x128xf32>
    %303 = vector.extract_strided_slice %286 {offsets = [0, 256], sizes = [8, 128], strides = [1, 1]} : vector<8x512xf32> to vector<8x128xf32>
    %304 = math.tanh %303 : vector<8x128xf32>
    %305 = vector.extract_strided_slice %286 {offsets = [0, 384], sizes = [8, 128], strides = [1, 1]} : vector<8x512xf32> to vector<8x128xf32>
    %306 = arith.negf %305 : vector<8x128xf32>
    %307 = math.exp %306 : vector<8x128xf32>
    %cst_62 = arith.constant 1.000000e+00 : f32
    %308 = vector.broadcast %cst_62 : f32 to vector<8x128xf32>
    %309 = arith.addf %308, %307 : vector<8x128xf32>
    %310 = arith.divf %308, %309 : vector<8x128xf32>
    %311 = arith.mulf %302, %245 : vector<8x128xf32>
    %312 = arith.mulf %296, %304 : vector<8x128xf32>
    %313 = arith.addf %311, %312 : vector<8x128xf32>
    %314 = math.tanh %313 : vector<8x128xf32>
    %315 = arith.mulf %310, %314 : vector<8x128xf32>
    %316 = vector.extract_strided_slice %290 {offsets = [0, 0], sizes = [8, 128], strides = [1, 1]} : vector<8x512xf32> to vector<8x128xf32>
    %317 = arith.negf %316 : vector<8x128xf32>
    %318 = math.exp %317 : vector<8x128xf32>
    %cst_63 = arith.constant 1.000000e+00 : f32
    %319 = vector.broadcast %cst_63 : f32 to vector<8x128xf32>
    %320 = arith.addf %319, %318 : vector<8x128xf32>
    %321 = arith.divf %319, %320 : vector<8x128xf32>
    %322 = vector.extract_strided_slice %290 {offsets = [0, 128], sizes = [8, 128], strides = [1, 1]} : vector<8x512xf32> to vector<8x128xf32>
    %323 = arith.negf %322 : vector<8x128xf32>
    %324 = math.exp %323 : vector<8x128xf32>
    %cst_64 = arith.constant 1.000000e+00 : f32
    %325 = vector.broadcast %cst_64 : f32 to vector<8x128xf32>
    %326 = arith.addf %325, %324 : vector<8x128xf32>
    %327 = arith.divf %325, %326 : vector<8x128xf32>
    %328 = vector.extract_strided_slice %290 {offsets = [0, 256], sizes = [8, 128], strides = [1, 1]} : vector<8x512xf32> to vector<8x128xf32>
    %329 = math.tanh %328 : vector<8x128xf32>
    %330 = vector.extract_strided_slice %290 {offsets = [0, 384], sizes = [8, 128], strides = [1, 1]} : vector<8x512xf32> to vector<8x128xf32>
    %331 = arith.negf %330 : vector<8x128xf32>
    %332 = math.exp %331 : vector<8x128xf32>
    %cst_65 = arith.constant 1.000000e+00 : f32
    %333 = vector.broadcast %cst_65 : f32 to vector<8x128xf32>
    %334 = arith.addf %333, %332 : vector<8x128xf32>
    %335 = arith.divf %333, %334 : vector<8x128xf32>
    %336 = arith.mulf %327, %270 : vector<8x128xf32>
    %337 = arith.mulf %321, %329 : vector<8x128xf32>
    %338 = arith.addf %336, %337 : vector<8x128xf32>
    %339 = math.tanh %338 : vector<8x128xf32>
    %340 = arith.mulf %335, %339 : vector<8x128xf32>
    %c4_i32_66 = arith.constant 4 : i32
    %341 = vector.broadcast %c4_i32_66 : i32 to vector<8x1xi32>
    %342 = arith.cmpi eq, %9, %341 : vector<8x1xi32>
    %343 = vector.shape_cast %342 : vector<8x1xi1> to vector<8x1xi1>
    %344 = vector.broadcast %343 : vector<8x1xi1> to vector<8x128xi1>
    %345 = arith.select %344, %315, %277 : vector<8x128xi1>, vector<8x128xf32>
    %c3_i32_67 = arith.constant 3 : i32
    %346 = vector.broadcast %c3_i32_67 : i32 to vector<8x1xi32>
    %347 = arith.cmpi eq, %9, %346 : vector<8x1xi32>
    %348 = vector.shape_cast %347 : vector<8x1xi1> to vector<8x1xi1>
    %349 = vector.broadcast %348 : vector<8x1xi1> to vector<8x128xi1>
    %350 = arith.select %349, %340, %282 : vector<8x128xi1>, vector<8x128xf32>
    %c40_68 = arith.constant 40 : index
    %c0_69 = arith.constant 0 : index
    %351 = vector.load %arg9[%c40_68, %c0_69] : memref<64x1024xf32, #tpu.memory_space<vmem>>, vector<8x512xf32>
    %352 = arith.truncf %315 : vector<8x128xf32> to vector<8x128xbf16>
    %cst_70 = arith.constant dense<0.000000e+00> : vector<8x512xf32>
    %353 = tpu.matmul %352, %7, %cst_70 {dimension_numbers = #tpu.dot_dimension_numbers<[1], [0], [0], [1], [0, 0, 1, 1], [], []>} : vector<8x128xbf16>, vector<128x512xbf16>, vector<8x512xf32> -> vector<8x512xf32>
    %354 = arith.addf %351, %353 : vector<8x512xf32>
    %c16_71 = arith.constant 16 : index
    %c512_72 = arith.constant 512 : index
    %355 = vector.load %arg9[%c16_71, %c512_72] : memref<64x1024xf32, #tpu.memory_space<vmem>>, vector<8x512xf32>
    %356 = arith.truncf %340 : vector<8x128xf32> to vector<8x128xbf16>
    %cst_73 = arith.constant dense<0.000000e+00> : vector<8x512xf32>
    %357 = tpu.matmul %356, %8, %cst_73 {dimension_numbers = #tpu.dot_dimension_numbers<[1], [0], [0], [1], [0, 0, 1, 1], [], []>} : vector<8x128xbf16>, vector<128x512xbf16>, vector<8x512xf32> -> vector<8x512xf32>
    %358 = arith.addf %355, %357 : vector<8x512xf32>
    %359 = vector.extract_strided_slice %354 {offsets = [0, 0], sizes = [8, 128], strides = [1, 1]} : vector<8x512xf32> to vector<8x128xf32>
    %360 = arith.negf %359 : vector<8x128xf32>
    %361 = math.exp %360 : vector<8x128xf32>
    %cst_74 = arith.constant 1.000000e+00 : f32
    %362 = vector.broadcast %cst_74 : f32 to vector<8x128xf32>
    %363 = arith.addf %362, %361 : vector<8x128xf32>
    %364 = arith.divf %362, %363 : vector<8x128xf32>
    %365 = vector.extract_strided_slice %354 {offsets = [0, 128], sizes = [8, 128], strides = [1, 1]} : vector<8x512xf32> to vector<8x128xf32>
    %366 = arith.negf %365 : vector<8x128xf32>
    %367 = math.exp %366 : vector<8x128xf32>
    %cst_75 = arith.constant 1.000000e+00 : f32
    %368 = vector.broadcast %cst_75 : f32 to vector<8x128xf32>
    %369 = arith.addf %368, %367 : vector<8x128xf32>
    %370 = arith.divf %368, %369 : vector<8x128xf32>
    %371 = vector.extract_strided_slice %354 {offsets = [0, 256], sizes = [8, 128], strides = [1, 1]} : vector<8x512xf32> to vector<8x128xf32>
    %372 = math.tanh %371 : vector<8x128xf32>
    %373 = vector.extract_strided_slice %354 {offsets = [0, 384], sizes = [8, 128], strides = [1, 1]} : vector<8x512xf32> to vector<8x128xf32>
    %374 = arith.negf %373 : vector<8x128xf32>
    %375 = math.exp %374 : vector<8x128xf32>
    %cst_76 = arith.constant 1.000000e+00 : f32
    %376 = vector.broadcast %cst_76 : f32 to vector<8x128xf32>
    %377 = arith.addf %376, %375 : vector<8x128xf32>
    %378 = arith.divf %376, %377 : vector<8x128xf32>
    %379 = arith.mulf %370, %313 : vector<8x128xf32>
    %380 = arith.mulf %364, %372 : vector<8x128xf32>
    %381 = arith.addf %379, %380 : vector<8x128xf32>
    %382 = math.tanh %381 : vector<8x128xf32>
    %383 = arith.mulf %378, %382 : vector<8x128xf32>
    %384 = vector.extract_strided_slice %358 {offsets = [0, 0], sizes = [8, 128], strides = [1, 1]} : vector<8x512xf32> to vector<8x128xf32>
    %385 = arith.negf %384 : vector<8x128xf32>
    %386 = math.exp %385 : vector<8x128xf32>
    %cst_77 = arith.constant 1.000000e+00 : f32
    %387 = vector.broadcast %cst_77 : f32 to vector<8x128xf32>
    %388 = arith.addf %387, %386 : vector<8x128xf32>
    %389 = arith.divf %387, %388 : vector<8x128xf32>
    %390 = vector.extract_strided_slice %358 {offsets = [0, 128], sizes = [8, 128], strides = [1, 1]} : vector<8x512xf32> to vector<8x128xf32>
    %391 = arith.negf %390 : vector<8x128xf32>
    %392 = math.exp %391 : vector<8x128xf32>
    %cst_78 = arith.constant 1.000000e+00 : f32
    %393 = vector.broadcast %cst_78 : f32 to vector<8x128xf32>
    %394 = arith.addf %393, %392 : vector<8x128xf32>
    %395 = arith.divf %393, %394 : vector<8x128xf32>
    %396 = vector.extract_strided_slice %358 {offsets = [0, 256], sizes = [8, 128], strides = [1, 1]} : vector<8x512xf32> to vector<8x128xf32>
    %397 = math.tanh %396 : vector<8x128xf32>
    %398 = vector.extract_strided_slice %358 {offsets = [0, 384], sizes = [8, 128], strides = [1, 1]} : vector<8x512xf32> to vector<8x128xf32>
    %399 = arith.negf %398 : vector<8x128xf32>
    %400 = math.exp %399 : vector<8x128xf32>
    %cst_79 = arith.constant 1.000000e+00 : f32
    %401 = vector.broadcast %cst_79 : f32 to vector<8x128xf32>
    %402 = arith.addf %401, %400 : vector<8x128xf32>
    %403 = arith.divf %401, %402 : vector<8x128xf32>
    %404 = arith.mulf %395, %338 : vector<8x128xf32>
    %405 = arith.mulf %389, %397 : vector<8x128xf32>
    %406 = arith.addf %404, %405 : vector<8x128xf32>
    %407 = math.tanh %406 : vector<8x128xf32>
    %408 = arith.mulf %403, %407 : vector<8x128xf32>
    %c5_i32_80 = arith.constant 5 : i32
    %409 = vector.broadcast %c5_i32_80 : i32 to vector<8x1xi32>
    %410 = arith.cmpi eq, %9, %409 : vector<8x1xi32>
    %411 = vector.shape_cast %410 : vector<8x1xi1> to vector<8x1xi1>
    %412 = vector.broadcast %411 : vector<8x1xi1> to vector<8x128xi1>
    %413 = arith.select %412, %383, %345 : vector<8x128xi1>, vector<8x128xf32>
    %c2_i32_81 = arith.constant 2 : i32
    %414 = vector.broadcast %c2_i32_81 : i32 to vector<8x1xi32>
    %415 = arith.cmpi eq, %9, %414 : vector<8x1xi32>
    %416 = vector.shape_cast %415 : vector<8x1xi1> to vector<8x1xi1>
    %417 = vector.broadcast %416 : vector<8x1xi1> to vector<8x128xi1>
    %418 = arith.select %417, %408, %350 : vector<8x128xi1>, vector<8x128xf32>
    %c48_82 = arith.constant 48 : index
    %c0_83 = arith.constant 0 : index
    %419 = vector.load %arg9[%c48_82, %c0_83] : memref<64x1024xf32, #tpu.memory_space<vmem>>, vector<8x512xf32>
    %420 = arith.truncf %383 : vector<8x128xf32> to vector<8x128xbf16>
    %cst_84 = arith.constant dense<0.000000e+00> : vector<8x512xf32>
    %421 = tpu.matmul %420, %7, %cst_84 {dimension_numbers = #tpu.dot_dimension_numbers<[1], [0], [0], [1], [0, 0, 1, 1], [], []>} : vector<8x128xbf16>, vector<128x512xbf16>, vector<8x512xf32> -> vector<8x512xf32>
    %422 = arith.addf %419, %421 : vector<8x512xf32>
    %c8_85 = arith.constant 8 : index
    %c512_86 = arith.constant 512 : index
    %423 = vector.load %arg9[%c8_85, %c512_86] : memref<64x1024xf32, #tpu.memory_space<vmem>>, vector<8x512xf32>
    %424 = arith.truncf %408 : vector<8x128xf32> to vector<8x128xbf16>
    %cst_87 = arith.constant dense<0.000000e+00> : vector<8x512xf32>
    %425 = tpu.matmul %424, %8, %cst_87 {dimension_numbers = #tpu.dot_dimension_numbers<[1], [0], [0], [1], [0, 0, 1, 1], [], []>} : vector<8x128xbf16>, vector<128x512xbf16>, vector<8x512xf32> -> vector<8x512xf32>
    %426 = arith.addf %423, %425 : vector<8x512xf32>
    %427 = vector.extract_strided_slice %422 {offsets = [0, 0], sizes = [8, 128], strides = [1, 1]} : vector<8x512xf32> to vector<8x128xf32>
    %428 = arith.negf %427 : vector<8x128xf32>
    %429 = math.exp %428 : vector<8x128xf32>
    %cst_88 = arith.constant 1.000000e+00 : f32
    %430 = vector.broadcast %cst_88 : f32 to vector<8x128xf32>
    %431 = arith.addf %430, %429 : vector<8x128xf32>
    %432 = arith.divf %430, %431 : vector<8x128xf32>
    %433 = vector.extract_strided_slice %422 {offsets = [0, 128], sizes = [8, 128], strides = [1, 1]} : vector<8x512xf32> to vector<8x128xf32>
    %434 = arith.negf %433 : vector<8x128xf32>
    %435 = math.exp %434 : vector<8x128xf32>
    %cst_89 = arith.constant 1.000000e+00 : f32
    %436 = vector.broadcast %cst_89 : f32 to vector<8x128xf32>
    %437 = arith.addf %436, %435 : vector<8x128xf32>
    %438 = arith.divf %436, %437 : vector<8x128xf32>
    %439 = vector.extract_strided_slice %422 {offsets = [0, 256], sizes = [8, 128], strides = [1, 1]} : vector<8x512xf32> to vector<8x128xf32>
    %440 = math.tanh %439 : vector<8x128xf32>
    %441 = vector.extract_strided_slice %422 {offsets = [0, 384], sizes = [8, 128], strides = [1, 1]} : vector<8x512xf32> to vector<8x128xf32>
    %442 = arith.negf %441 : vector<8x128xf32>
    %443 = math.exp %442 : vector<8x128xf32>
    %cst_90 = arith.constant 1.000000e+00 : f32
    %444 = vector.broadcast %cst_90 : f32 to vector<8x128xf32>
    %445 = arith.addf %444, %443 : vector<8x128xf32>
    %446 = arith.divf %444, %445 : vector<8x128xf32>
    %447 = arith.mulf %438, %381 : vector<8x128xf32>
    %448 = arith.mulf %432, %440 : vector<8x128xf32>
    %449 = arith.addf %447, %448 : vector<8x128xf32>
    %450 = math.tanh %449 : vector<8x128xf32>
    %451 = arith.mulf %446, %450 : vector<8x128xf32>
    %452 = vector.extract_strided_slice %426 {offsets = [0, 0], sizes = [8, 128], strides = [1, 1]} : vector<8x512xf32> to vector<8x128xf32>
    %453 = arith.negf %452 : vector<8x128xf32>
    %454 = math.exp %453 : vector<8x128xf32>
    %cst_91 = arith.constant 1.000000e+00 : f32
    %455 = vector.broadcast %cst_91 : f32 to vector<8x128xf32>
    %456 = arith.addf %455, %454 : vector<8x128xf32>
    %457 = arith.divf %455, %456 : vector<8x128xf32>
    %458 = vector.extract_strided_slice %426 {offsets = [0, 128], sizes = [8, 128], strides = [1, 1]} : vector<8x512xf32> to vector<8x128xf32>
    %459 = arith.negf %458 : vector<8x128xf32>
    %460 = math.exp %459 : vector<8x128xf32>
    %cst_92 = arith.constant 1.000000e+00 : f32
    %461 = vector.broadcast %cst_92 : f32 to vector<8x128xf32>
    %462 = arith.addf %461, %460 : vector<8x128xf32>
    %463 = arith.divf %461, %462 : vector<8x128xf32>
    %464 = vector.extract_strided_slice %426 {offsets = [0, 256], sizes = [8, 128], strides = [1, 1]} : vector<8x512xf32> to vector<8x128xf32>
    %465 = math.tanh %464 : vector<8x128xf32>
    %466 = vector.extract_strided_slice %426 {offsets = [0, 384], sizes = [8, 128], strides = [1, 1]} : vector<8x512xf32> to vector<8x128xf32>
    %467 = arith.negf %466 : vector<8x128xf32>
    %468 = math.exp %467 : vector<8x128xf32>
    %cst_93 = arith.constant 1.000000e+00 : f32
    %469 = vector.broadcast %cst_93 : f32 to vector<8x128xf32>
    %470 = arith.addf %469, %468 : vector<8x128xf32>
    %471 = arith.divf %469, %470 : vector<8x128xf32>
    %472 = arith.mulf %463, %406 : vector<8x128xf32>
    %473 = arith.mulf %457, %465 : vector<8x128xf32>
    %474 = arith.addf %472, %473 : vector<8x128xf32>
    %475 = math.tanh %474 : vector<8x128xf32>
    %476 = arith.mulf %471, %475 : vector<8x128xf32>
    %c6_i32_94 = arith.constant 6 : i32
    %477 = vector.broadcast %c6_i32_94 : i32 to vector<8x1xi32>
    %478 = arith.cmpi eq, %9, %477 : vector<8x1xi32>
    %479 = vector.shape_cast %478 : vector<8x1xi1> to vector<8x1xi1>
    %480 = vector.broadcast %479 : vector<8x1xi1> to vector<8x128xi1>
    %481 = arith.select %480, %451, %413 : vector<8x128xi1>, vector<8x128xf32>
    %c1_i32_95 = arith.constant 1 : i32
    %482 = vector.broadcast %c1_i32_95 : i32 to vector<8x1xi32>
    %483 = arith.cmpi eq, %9, %482 : vector<8x1xi32>
    %484 = vector.shape_cast %483 : vector<8x1xi1> to vector<8x1xi1>
    %485 = vector.broadcast %484 : vector<8x1xi1> to vector<8x128xi1>
    %486 = arith.select %485, %476, %418 : vector<8x128xi1>, vector<8x128xf32>
    %c56_96 = arith.constant 56 : index
    %c0_97 = arith.constant 0 : index
    %487 = vector.load %arg9[%c56_96, %c0_97] : memref<64x1024xf32, #tpu.memory_space<vmem>>, vector<8x512xf32>
    %488 = arith.truncf %451 : vector<8x128xf32> to vector<8x128xbf16>
    %cst_98 = arith.constant dense<0.000000e+00> : vector<8x512xf32>
    %489 = tpu.matmul %488, %7, %cst_98 {dimension_numbers = #tpu.dot_dimension_numbers<[1], [0], [0], [1], [0, 0, 1, 1], [], []>} : vector<8x128xbf16>, vector<128x512xbf16>, vector<8x512xf32> -> vector<8x512xf32>
    %490 = arith.addf %487, %489 : vector<8x512xf32>
    %c0_99 = arith.constant 0 : index
    %c512_100 = arith.constant 512 : index
    %491 = vector.load %arg9[%c0_99, %c512_100] : memref<64x1024xf32, #tpu.memory_space<vmem>>, vector<8x512xf32>
    %492 = arith.truncf %476 : vector<8x128xf32> to vector<8x128xbf16>
    %cst_101 = arith.constant dense<0.000000e+00> : vector<8x512xf32>
    %493 = tpu.matmul %492, %8, %cst_101 {dimension_numbers = #tpu.dot_dimension_numbers<[1], [0], [0], [1], [0, 0, 1, 1], [], []>} : vector<8x128xbf16>, vector<128x512xbf16>, vector<8x512xf32> -> vector<8x512xf32>
    %494 = arith.addf %491, %493 : vector<8x512xf32>
    %495 = vector.extract_strided_slice %490 {offsets = [0, 0], sizes = [8, 128], strides = [1, 1]} : vector<8x512xf32> to vector<8x128xf32>
    %496 = arith.negf %495 : vector<8x128xf32>
    %497 = math.exp %496 : vector<8x128xf32>
    %cst_102 = arith.constant 1.000000e+00 : f32
    %498 = vector.broadcast %cst_102 : f32 to vector<8x128xf32>
    %499 = arith.addf %498, %497 : vector<8x128xf32>
    %500 = arith.divf %498, %499 : vector<8x128xf32>
    %501 = vector.extract_strided_slice %490 {offsets = [0, 128], sizes = [8, 128], strides = [1, 1]} : vector<8x512xf32> to vector<8x128xf32>
    %502 = arith.negf %501 : vector<8x128xf32>
    %503 = math.exp %502 : vector<8x128xf32>
    %cst_103 = arith.constant 1.000000e+00 : f32
    %504 = vector.broadcast %cst_103 : f32 to vector<8x128xf32>
    %505 = arith.addf %504, %503 : vector<8x128xf32>
    %506 = arith.divf %504, %505 : vector<8x128xf32>
    %507 = vector.extract_strided_slice %490 {offsets = [0, 256], sizes = [8, 128], strides = [1, 1]} : vector<8x512xf32> to vector<8x128xf32>
    %508 = math.tanh %507 : vector<8x128xf32>
    %509 = vector.extract_strided_slice %490 {offsets = [0, 384], sizes = [8, 128], strides = [1, 1]} : vector<8x512xf32> to vector<8x128xf32>
    %510 = arith.negf %509 : vector<8x128xf32>
    %511 = math.exp %510 : vector<8x128xf32>
    %cst_104 = arith.constant 1.000000e+00 : f32
    %512 = vector.broadcast %cst_104 : f32 to vector<8x128xf32>
    %513 = arith.addf %512, %511 : vector<8x128xf32>
    %514 = arith.divf %512, %513 : vector<8x128xf32>
    %515 = arith.mulf %506, %449 : vector<8x128xf32>
    %516 = arith.mulf %500, %508 : vector<8x128xf32>
    %517 = arith.addf %515, %516 : vector<8x128xf32>
    %518 = math.tanh %517 : vector<8x128xf32>
    %519 = arith.mulf %514, %518 : vector<8x128xf32>
    %520 = vector.extract_strided_slice %494 {offsets = [0, 0], sizes = [8, 128], strides = [1, 1]} : vector<8x512xf32> to vector<8x128xf32>
    %521 = arith.negf %520 : vector<8x128xf32>
    %522 = math.exp %521 : vector<8x128xf32>
    %cst_105 = arith.constant 1.000000e+00 : f32
    %523 = vector.broadcast %cst_105 : f32 to vector<8x128xf32>
    %524 = arith.addf %523, %522 : vector<8x128xf32>
    %525 = arith.divf %523, %524 : vector<8x128xf32>
    %526 = vector.extract_strided_slice %494 {offsets = [0, 128], sizes = [8, 128], strides = [1, 1]} : vector<8x512xf32> to vector<8x128xf32>
    %527 = arith.negf %526 : vector<8x128xf32>
    %528 = math.exp %527 : vector<8x128xf32>
    %cst_106 = arith.constant 1.000000e+00 : f32
    %529 = vector.broadcast %cst_106 : f32 to vector<8x128xf32>
    %530 = arith.addf %529, %528 : vector<8x128xf32>
    %531 = arith.divf %529, %530 : vector<8x128xf32>
    %532 = vector.extract_strided_slice %494 {offsets = [0, 256], sizes = [8, 128], strides = [1, 1]} : vector<8x512xf32> to vector<8x128xf32>
    %533 = math.tanh %532 : vector<8x128xf32>
    %534 = vector.extract_strided_slice %494 {offsets = [0, 384], sizes = [8, 128], strides = [1, 1]} : vector<8x512xf32> to vector<8x128xf32>
    %535 = arith.negf %534 : vector<8x128xf32>
    %536 = math.exp %535 : vector<8x128xf32>
    %cst_107 = arith.constant 1.000000e+00 : f32
    %537 = vector.broadcast %cst_107 : f32 to vector<8x128xf32>
    %538 = arith.addf %537, %536 : vector<8x128xf32>
    %539 = arith.divf %537, %538 : vector<8x128xf32>
    %540 = arith.mulf %531, %474 : vector<8x128xf32>
    %541 = arith.mulf %525, %533 : vector<8x128xf32>
    %542 = arith.addf %540, %541 : vector<8x128xf32>
    %543 = math.tanh %542 : vector<8x128xf32>
    %544 = arith.mulf %539, %543 : vector<8x128xf32>
    %c7_i32_108 = arith.constant 7 : i32
    %545 = vector.broadcast %c7_i32_108 : i32 to vector<8x1xi32>
    %546 = arith.cmpi eq, %9, %545 : vector<8x1xi32>
    %547 = vector.shape_cast %546 : vector<8x1xi1> to vector<8x1xi1>
    %548 = vector.broadcast %547 : vector<8x1xi1> to vector<8x128xi1>
    %549 = arith.select %548, %519, %481 : vector<8x128xi1>, vector<8x128xf32>
    %c0_i32_109 = arith.constant 0 : i32
    %550 = vector.broadcast %c0_i32_109 : i32 to vector<8x1xi32>
    %551 = arith.cmpi eq, %9, %550 : vector<8x1xi32>
    %552 = vector.shape_cast %551 : vector<8x1xi1> to vector<8x1xi1>
    %553 = vector.broadcast %552 : vector<8x1xi1> to vector<8x128xi1>
    %554 = arith.select %553, %544, %486 : vector<8x128xi1>, vector<8x128xf32>
    %555 = tpu.concatenate %549, %554 in 1 : vector<8x128xf32>, vector<8x128xf32> -> vector<8x256xf32>
    %556 = arith.truncf %555 : vector<8x256xf32> to vector<8x256xbf16>
    %c0_110 = arith.constant 0 : index
    %c0_111 = arith.constant 0 : index
    %557 = vector.load %arg6[%c0_110, %c0_111] : memref<256x128xbf16, #tpu.memory_space<vmem>>, vector<256x128xbf16>
    %cst_112 = arith.constant dense<0.000000e+00> : vector<8x128xf32>
    %558 = tpu.matmul %556, %557, %cst_112 {dimension_numbers = #tpu.dot_dimension_numbers<[1], [0], [0], [1], [0, 0, 1, 1], [], []>} : vector<8x256xbf16>, vector<256x128xbf16>, vector<8x128xf32> -> vector<8x128xf32>
    %c0_113 = arith.constant 0 : index
    %c0_114 = arith.constant 0 : index
    %559 = vector.load %arg7[%c0_113, %c0_114] : memref<1x128xf32, #tpu.memory_space<vmem>>, vector<1x128xf32>
    %560 = vector.broadcast %559 : vector<1x128xf32> to vector<8x128xf32>
    %561 = arith.addf %558, %560 : vector<8x128xf32>
    %c0_115 = arith.constant 0 : index
    %c0_116 = arith.constant 0 : index
    %562 = vector.load %arg8[%c0_115, %c0_116] : memref<8x128xf32, #tpu.memory_space<vmem>>, vector<8x128xf32>
    tpu.vector_store %arg8[%c0_115, %c0_116], %561 {strides = array<i32>} : memref<8x128xf32, #tpu.memory_space<vmem>>, vector<8x128xf32>,
    return
  }
}

</mosaic_0001>

<bundles_post_ra>
// kernel: simple_emotion_forward.1
= control target key start
LH: loop header
LB: loop body
LE: loop exit
PB: predicated region body
PF: predicated region fallthrough
CT: control target
= control target key end

     0   :  { %s6697_s0 = inlined_call_operand.vmem [shape: bf16[64,128], index: 0, kind: input, shape index: {}]   ;;  %s6698_s1 = inlined_call_operand.vmem [shape: s32[8,1], index: 1, kind: input, shape index: {}]   ;;  %s6699_s2 = inlined_call_operand.vmem [shape: bf16[128,1024], index: 2, kind: input, shape index: {}]   ;;  %s6700_s3 = inlined_call_operand.vmem [shape: f32[1,1024], index: 3, kind: input, shape index: {}]   ;;  %s6701_s4 = inlined_call_operand.vmem [shape: bf16[128,512], index: 4, kind: input, shape index: {}]   ;;  %s6702_s5 = inlined_call_operand.vmem [shape: bf16[128,512], index: 5, kind: input, shape index: {}]   ;;  %s6703_s6 = inlined_call_operand.vmem [shape: bf16[256,128], index: 6, kind: input, shape index: {}]   ;;  %s6704_s7 = inlined_call_operand.vmem [shape: f32[1,128], index: 7, kind: input, shape index: {}]   ;;  %s6705_s8 = inlined_call_operand.hbm [shape: f32[8,128], index: 8, kind: output, shape index: {}]  }
   0x1   :  { %v3611_v0 = vld [vmem:[%s6699_s2 + $0x1c0] sm:$0xf]  ;;  %v4069_v2 = vld [vmem:[%s6699_s2 + $0x1c4] sm:$0xf]  ;;  %v3619_v5 = vld [vmem:[%s6699_s2 + $0x1c8] sm:$0xf] }
   0x2   :  { %v4073_v1 = vld [vmem:[%s6699_s2 + $0x1dc] sm:$0xf0]  ;;  %v3613_v4 = vld [vmem:[%s6699_s2 + $0x1e0] sm:$0xf0]  ;;  %v4074_v6 = vld [vmem:[%s6699_s2 + $0x1e4] sm:$0xf0] }
   0x3   :  { %v3612_v3 = vor.u32 %v4073_v1, %v3611_v0  ;;  %v3616_v7 = vor.u32 %v4069_v2, %v3613_v4  ;;  %v3620_v8 = vor.u32 %v4074_v6, %v3619_v5  ;;  %v4070_v9 = vld [vmem:[%s6699_s2 + $0x1cc] sm:$0xf]  ;;  %v3579_v11 = vld [vmem:[%s6699_s2 + $0x180] sm:$0xf]  ;;  %v4061_v14 = vld [vmem:[%s6699_s2 + $0x184] sm:$0xf] }
   0x4   :  { %v3621_v10 = vld [vmem:[%s6699_s2 + $0x1e8] sm:$0xf0]  ;;  %v4065_v13 = vld [vmem:[%s6699_s2 + $0x19c] sm:$0xf0]  ;;  %v3581_v15 = vld [vmem:[%s6699_s2 + $0x1a0] sm:$0xf0] }
   0x5   :  { %465 = vmatpush.bf16.msra.mxu0 %v3612_v3  ;;  %v3624_v12 = vor.u32 %v4070_v9, %v3621_v10  ;;  %494 = vmatpush.bf16.msra.mxu1 %v3616_v7  ;;  %v3580_v16 = vor.u32 %v4065_v13, %v3579_v11  ;;  %v3584_v17 = vor.u32 %v4061_v14, %v3581_v15  ;;  %v3587_v18 = vld [vmem:[%s6699_s2 + $0x188] sm:$0xf]  ;;  %v4062_v20 = vld [vmem:[%s6699_s2 + $0x18c] sm:$0xf]  ;;  %v3547_v23 = vld [vmem:[%s6699_s2 + $0x140] sm:$0xf] }
   0x6   :  { %523 = vmatpush.bf16.msra.mxu2 %v3620_v8  ;;  %v4066_v19 = vld [vmem:[%s6699_s2 + $0x1a4] sm:$0xf0]  ;;  %v3589_v22 = vld [vmem:[%s6699_s2 + $0x1a8] sm:$0xf0]  ;;  %v4057_v24 = vld [vmem:[%s6699_s2 + $0x15c] sm:$0xf0] }
   0x7   :  { %552 = vmatpush.bf16.msra.mxu3 %v3624_v12  ;;  %v3588_v21 = vor.u32 %v4066_v19, %v3587_v18  ;;  %v3592_v25 = vor.u32 %v4062_v20, %v3589_v22  ;;  %v4053_v26 = vld [vmem:[%s6699_s2 + $0x144] sm:$0xf]  ;;  %v3555_v28 = vld [vmem:[%s6699_s2 + $0x148] sm:$0xf]  ;;  %v3548_v29 = vor.u32 %v4057_v24, %v3547_v23  ;;  %v4054_v31 = vld [vmem:[%s6699_s2 + $0x14c] sm:$0xf] }
   0x8   :  { %v3549_v27 = vld [vmem:[%s6699_s2 + $0x160] sm:$0xf0]  ;;  %v4058_v30 = vld [vmem:[%s6699_s2 + $0x164] sm:$0xf0]  ;;  %v3557_v32 = vld [vmem:[%s6699_s2 + $0x168] sm:$0xf0] }
   0x9   :  { %466 = vmatpush.bf16.msra.mxu0 %v3580_v16  ;;  %495 = vmatpush.bf16.msra.mxu1 %v3584_v17  ;;  %v3552_v33 = vor.u32 %v4053_v26, %v3549_v27  ;;  %v3556_v34 = vor.u32 %v4058_v30, %v3555_v28  ;;  %v3515_v35 = vld [vmem:[%s6699_s2 + $0x100] sm:$0xf]  ;;  %v4045_v37 = vld [vmem:[%s6699_s2 + $0x104] sm:$0xf]  ;;  %v3560_v38 = vor.u32 %v4054_v31, %v3557_v32  ;;  %v3523_v40 = vld [vmem:[%s6699_s2 + $0x108] sm:$0xf] }
   0xa   :  { %524 = vmatpush.bf16.msra.mxu2 %v3588_v21  ;;  %v4049_v36 = vld [vmem:[%s6699_s2 + $0x11c] sm:$0xf0]  ;;  %v3517_v39 = vld [vmem:[%s6699_s2 + $0x120] sm:$0xf0]  ;;  %v4050_v41 = vld [vmem:[%s6699_s2 + $0x124] sm:$0xf0] }
   0xb   :  { %553 = vmatpush.bf16.msra.mxu3 %v3592_v25  ;;  %v4046_v42 = vld [vmem:[%s6699_s2 + $0x10c] sm:$0xf]  ;;  %v3516_v44 = vor.u32 %v4049_v36, %v3515_v35  ;;  %v3520_v45 = vor.u32 %v4045_v37, %v3517_v39  ;;  %v3524_v46 = vor.u32 %v4050_v41, %v3523_v40  ;;  %v3483_v47 = vld [vmem:[%s6699_s2 + $0xc0] sm:$0xf]  ;;  %v4037_v49 = vld [vmem:[%s6699_s2 + $0xc4] sm:$0xf] }
   0xc   :  { %v3525_v43 = vld [vmem:[%s6699_s2 + $0x128] sm:$0xf0]  ;;  %v4041_v48 = vld [vmem:[%s6699_s2 + $0xdc] sm:$0xf0]  ;;  %v3485_v51 = vld [vmem:[%s6699_s2 + $0xe0] sm:$0xf0] }
   0xd   :  { %467 = vmatpush.bf16.msra.mxu0 %v3548_v29  ;;  %496 = vmatpush.bf16.msra.mxu1 %v3552_v33  ;;  %v3528_v50 = vor.u32 %v4046_v42, %v3525_v43  ;;  %v3491_v52 = vld [vmem:[%s6699_s2 + $0xc8] sm:$0xf]  ;;  %v4038_v54 = vld [vmem:[%s6699_s2 + $0xcc] sm:$0xf]  ;;  %v3484_v56 = vor.u32 %v4041_v48, %v3483_v47  ;;  %v3488_v57 = vor.u32 %v4037_v49, %v3485_v51  ;;  %v3451_v59 = vld [vmem:[%s6699_s2 + $0x80] sm:$0xf] }
   0xe   :  { %525 = vmatpush.bf16.msra.mxu2 %v3556_v34  ;;  %v4042_v53 = vld [vmem:[%s6699_s2 + $0xe4] sm:$0xf0]  ;;  %v3493_v55 = vld [vmem:[%s6699_s2 + $0xe8] sm:$0xf0]  ;;  %v4033_v60 = vld [vmem:[%s6699_s2 + $0x9c] sm:$0xf0] }
   0xf   :  { %554 = vmatpush.bf16.msra.mxu3 %v3560_v38  ;;  %v3492_v58 = vor.u32 %v4042_v53, %v3491_v52  ;;  %v4029_v61 = vld [vmem:[%s6699_s2 + $0x84] sm:$0xf]  ;;  %v3496_v62 = vor.u32 %v4038_v54, %v3493_v55  ;;  %v3459_v0 = vld [vmem:[%s6699_s2 + $0x88] sm:$0xf]  ;;  %v4030_v2 = vld [vmem:[%s6699_s2 + $0x8c] sm:$0xf]  ;;  %v3452_v4 = vor.u32 %v4033_v60, %v3451_v59 }
  0x10   :  { %v3453_v63 = vld [vmem:[%s6699_s2 + $0xa0] sm:$0xf0]  ;;  %v4034_v1 = vld [vmem:[%s6699_s2 + $0xa4] sm:$0xf0]  ;;  %v3461_v3 = vld [vmem:[%s6699_s2 + $0xa8] sm:$0xf0] }
  0x11   :  { %468 = vmatpush.bf16.msra.mxu0 %v3516_v44  ;;  %497 = vmatpush.bf16.msra.mxu1 %v3520_v45  ;;  %v3456_v5 = vor.u32 %v4029_v61, %v3453_v63  ;;  %v3460_v6 = vor.u32 %v4034_v1, %v3459_v0  ;;  %v3419_v7 = vld [vmem:[%s6699_s2 + $0x40] sm:$0xf]  ;;  %v4021_v9 = vld [vmem:[%s6699_s2 + $0x44] sm:$0xf]  ;;  %v3464_v10 = vor.u32 %v4030_v2, %v3461_v3  ;;  %v3427_v12 = vld [vmem:[%s6699_s2 + $0x48] sm:$0xf] }
  0x12   :  { %526 = vmatpush.bf16.msra.mxu2 %v3524_v46  ;;  %v4025_v8 = vld [vmem:[%s6699_s2 + $0x5c] sm:$0xf0]  ;;  %v3421_v11 = vld [vmem:[%s6699_s2 + $0x60] sm:$0xf0]  ;;  %v4026_v13 = vld [vmem:[%s6699_s2 + $0x64] sm:$0xf0] }
  0x13   :  { %555 = vmatpush.bf16.msra.mxu3 %v3528_v50  ;;  %v4022_v14 = vld [vmem:[%s6699_s2 + $0x4c] sm:$0xf]  ;;  %v3420_v16 = vor.u32 %v4025_v8, %v3419_v7  ;;  %v3387_v17 = vld [vmem:[%s6699_s2] sm:$0xf]  ;;  %v3424_v18 = vor.u32 %v4021_v9, %v3421_v11  ;;  %v3428_v19 = vor.u32 %v4026_v13, %v3427_v12  ;;  %v4013_v21 = vld [vmem:[%s6699_s2 + $0x4] sm:$0xf] }
  0x14   :  { %v3429_v15 = vld [vmem:[%s6699_s2 + $0x68] sm:$0xf0]  ;;  %v4017_v20 = vld [vmem:[%s6699_s2 + $0x1c] sm:$0xf0]  ;;  %v3389_v22 = vld [vmem:[%s6699_s2 + $0x20] sm:$0xf0] }
  0x15   :  { %469 = vmatpush.bf16.msra.mxu0 %v3484_v56  ;;  %498 = vmatpush.bf16.msra.mxu1 %v3488_v57  ;;  %v3432_v23 = vor.u32 %v4022_v14, %v3429_v15  ;;  %v3395_v24 = vld [vmem:[%s6699_s2 + $0x8] sm:$0xf]  ;;  %v4014_v26 = vld [vmem:[%s6699_s2 + $0xc] sm:$0xf]  ;;  %v3627_v28 = vld [vmem:[%s6699_s2 + $0x1d0] sm:$0xf]  ;;  %v3388_v30 = vor.u32 %v4017_v20, %v3387_v17  ;;  %v3392_v33 = vor.u32 %v4013_v21, %v3389_v22 }
  0x16   :  { %527 = vmatpush.bf16.msra.mxu2 %v3492_v58  ;;  %v4018_v25 = vld [vmem:[%s6699_s2 + $0x24] sm:$0xf0]  ;;  %v3397_v27 = vld [vmem:[%s6699_s2 + $0x28] sm:$0xf0]  ;;  %v4075_v29 = vld [vmem:[%s6699_s2 + $0x1ec] sm:$0xf0] }
  0x17   :  { %556 = vmatpush.bf16.msra.mxu3 %v3496_v62  ;;  %v4071_v31 = vld [vmem:[%s6699_s2 + $0x1d4] sm:$0xf]  ;;  %v3396_v34 = vor.u32 %v4018_v25, %v3395_v24  ;;  %v4700_v35 = vld [vmem:[%s6697_s0] sm:$0xff]  ;;  %v3400_v36 = vor.u32 %v4014_v26, %v3397_v27  ;;  %v3628_v37 = vor.u32 %v4075_v29, %v3627_v28  ;;  %v4072_v38 = vld [vmem:[%s6699_s2 + $0x1dc] sm:$0xf] }
  0x18   :  { %v3629_v32 = vld [vmem:[%s6699_s2 + $0x1f0] sm:$0xf0]  ;;  %v3635_v39 = vld [vmem:[%s6699_s2 + $0x1d8] sm:$0xf]  ;;  %v3637_v42 = vld [vmem:[%s6699_s2 + $0x1f8] sm:$0xf0] }
  0x19   :  { %470 = vmatpush.bf16.msra.mxu0 %v3452_v4  ;;  %499 = vmatpush.bf16.msra.mxu1 %v3456_v5  ;;  %v4076_v40 = vld [vmem:[%s6699_s2 + $0x1f4] sm:$0xf0]  ;;  %v3632_v41 = vor.u32 %v4071_v31, %v3629_v32  ;;  %v3595_v43 = vld [vmem:[%s6699_s2 + $0x190] sm:$0xf]  ;;  %v4063_v45 = vld [vmem:[%s6699_s2 + $0x194] sm:$0xf] }
  0x1a   :  { %528 = vmatpush.bf16.msra.mxu2 %v3460_v6  ;;  %v4067_v44 = vld [vmem:[%s6699_s2 + $0x1ac] sm:$0xf0]  ;;  %v3597_v46 = vld [vmem:[%s6699_s2 + $0x1b0] sm:$0xf0]  ;;  %v3636_v47 = vor.u32 %v4076_v40, %v3635_v39 }
  0x1b   :  { %557 = vmatpush.bf16.msra.mxu3 %v3464_v10 }
  0x1d   :  { %471 = vmatpush.bf16.msra.mxu0 %v3420_v16  ;;  %500 = vmatpush.bf16.msra.mxu1 %v3424_v18 }
  0x1e   :  { %529 = vmatpush.bf16.msra.mxu2 %v3428_v19 }
  0x1f   :  { %558 = vmatpush.bf16.msra.mxu3 %v3432_v23 }
  0x21   :  { %472 = vmatpush.bf16.msra.mxu0 %v3388_v30  ;;  %501 = vmatpush.bf16.msra.mxu1 %v3392_v33 }
  0x22   :  { %530 = vmatpush.bf16.msra.mxu2 %v3396_v34 }
  0x23   :  { %13 = vsyncpa [#allocation4], 0  ;;  %559 = vmatpush.bf16.msra.mxu3 %v3400_v36  ;;  %v3640_v48 = vor.u32 %v4072_v38, %v3637_v42  ;;  %v3596_v49 = vor.u32 %v4067_v44, %v3595_v43  ;;  %v4064_v50 = vld [vmem:[%s6699_s2 + $0x19c] sm:$0xf]  ;;  %v3603_v51 = vld [vmem:[%s6699_s2 + $0x198] sm:$0xf]  ;;  %v3600_v53 = vor.u32 %v4063_v45, %v3597_v46 }
  0x24   :  { %v4068_v52 = vld [vmem:[%s6699_s2 + $0x1b4] sm:$0xf0]  ;;  %473 = vmatmul.bf16.vlgmr.msra.gmra.mxu0 %v4700_v35  ;;  %v3605_v54 = vld [vmem:[%s6699_s2 + $0x1b8] sm:$0xf0]  ;;  %v3563_v55 = vld [vmem:[%s6699_s2 + $0x150] sm:$0xf]  ;;  %502 = vmatmul.bf16.vlgmr.msra.gmra.mxu1 %v4700_v35 }
  0x25   :  { %581 = vmatpush.bf16.msrb.mxu0 %v3628_v37  ;;  %610 = vmatpush.bf16.msrb.mxu1 %v3632_v41  ;;  %v4059_v56 = vld [vmem:[%s6699_s2 + $0x16c] sm:$0xf0]  ;;  %v4055_v57 = vld [vmem:[%s6699_s2 + $0x154] sm:$0xf]  ;;  %v3604_v59 = vor.u32 %v4068_v52, %v3603_v51  ;;  %v3608_v60 = vor.u32 %v4064_v50, %v3605_v54  ;;  %v4056_v62 = vld [vmem:[%s6699_s2 + $0x15c] sm:$0xf] }
  0x26   :  { %531 = vmatmul.bf16.vlgmr.msra.gmra.mxu2 %v4700_v35  ;;  %v3565_v58 = vld [vmem:[%s6699_s2 + $0x170] sm:$0xf0]  ;;  %560 = vmatmul.bf16.vlgmr.msra.gmra.mxu3 %v4700_v35  ;;  %v3564_v61 = vor.u32 %v4059_v56, %v3563_v55  ;;  %v3571_v63 = vld [vmem:[%s6699_s2 + $0x158] sm:$0xf]  ;;  %v3573_v2 = vld [vmem:[%s6699_s2 + $0x178] sm:$0xf0] }
  0x27   :  { %639 = vmatpush.bf16.msrb.mxu2 %v3636_v47  ;;  %668 = vmatpush.bf16.msrb.mxu3 %v3640_v48  ;;  %v4060_v0 = vld [vmem:[%s6699_s2 + $0x174] sm:$0xf0]  ;;  %v3568_v1 = vor.u32 %v4055_v57, %v3565_v58  ;;  %v3531_v3 = vld [vmem:[%s6699_s2 + $0x110] sm:$0xf]  ;;  %v4047_v5 = vld [vmem:[%s6699_s2 + $0x114] sm:$0xf]  ;;  %v3576_v8 = vor.u32 %v4056_v62, %v3573_v2 }
  0x28   :  { %v4051_v4 = vld [vmem:[%s6699_s2 + $0x12c] sm:$0xf0]  ;;  %v3533_v6 = vld [vmem:[%s6699_s2 + $0x130] sm:$0xf0]  ;;  %v3572_v7 = vor.u32 %v4060_v0, %v3571_v63  ;;  %v4048_v10 = vld [vmem:[%s6699_s2 + $0x11c] sm:$0xf] }
  0x29   :  { %582 = vmatpush.bf16.msrb.mxu0 %v3596_v49  ;;  %611 = vmatpush.bf16.msrb.mxu1 %v3600_v53  ;;  %v3532_v9 = vor.u32 %v4051_v4, %v3531_v3  ;;  %v3539_v11 = vld [vmem:[%s6699_s2 + $0x118] sm:$0xf]  ;;  %v3536_v13 = vor.u32 %v4047_v5, %v3533_v6  ;;  %v3541_v14 = vld [vmem:[%s6699_s2 + $0x138] sm:$0xf0]  ;;  %v3499_v15 = vld [vmem:[%s6699_s2 + $0xd0] sm:$0xf] }
  0x2a   :  { %v4052_v12 = vld [vmem:[%s6699_s2 + $0x134] sm:$0xf0]  ;;  %v4043_v16 = vld [vmem:[%s6699_s2 + $0xec] sm:$0xf0]  ;;  %v4039_v17 = vld [vmem:[%s6699_s2 + $0xd4] sm:$0xf]  ;;  %v3544_v21 = vor.u32 %v4048_v10, %v3541_v14 }
  0x2b   :  { %640 = vmatpush.bf16.msrb.mxu2 %v3604_v59  ;;  %669 = vmatpush.bf16.msrb.mxu3 %v3608_v60  ;;  %v3501_v18 = vld [vmem:[%s6699_s2 + $0xf0] sm:$0xf0]  ;;  %v4805_v19 = vld [vmem:[%s6697_s0 + $0x8] sm:$0xff]  ;;  %v3540_v20 = vor.u32 %v4052_v12, %v3539_v11  ;;  %v3500_v22 = vor.u32 %v4043_v16, %v3499_v15  ;;  %v4040_v23 = vld [vmem:[%s6699_s2 + $0xdc] sm:$0xf]  ;;  %s4447_s22 = smov [#allocation3]  }
  0x2c   :  { %v3507_v24 = vld [vmem:[%s6699_s2 + $0xd8] sm:$0xf]  ;;  %v3504_v26 = vor.u32 %v4039_v17, %v3501_v18  ;;  %v3509_v27 = vld [vmem:[%s6699_s2 + $0xf8] sm:$0xf0]  ;;  %v3467_v28 = vld [vmem:[%s6699_s2 + $0x90] sm:$0xf] }
  0x2d   :  { %583 = vmatpush.bf16.msrb.mxu0 %v3564_v61  ;;  %612 = vmatpush.bf16.msrb.mxu1 %v3568_v1  ;;  %v4044_v25 = vld [vmem:[%s6699_s2 + $0xf4] sm:$0xf0]  ;;  %v4035_v29 = vld [vmem:[%s6699_s2 + $0xac] sm:$0xf0]  ;;  %v4031_v30 = vld [vmem:[%s6699_s2 + $0x94] sm:$0xf]  ;;  %v3512_v33 = vor.u32 %v4040_v23, %v3509_v27 }
  0x2e   :  { %v3469_v31 = vld [vmem:[%s6699_s2 + $0xb0] sm:$0xf0]  ;;  %v3508_v32 = vor.u32 %v4044_v25, %v3507_v24  ;;  %v3468_v34 = vor.u32 %v4035_v29, %v3467_v28  ;;  %v4032_v37 = vld [vmem:[%s6699_s2 + $0x9c] sm:$0xf]  ;;  %v3435_v39 = vld [vmem:[%s6699_s2 + $0x50] sm:$0xf] }
  0x2f   :  { %641 = vmatpush.bf16.msrb.mxu2 %v3572_v7  ;;  %670 = vmatpush.bf16.msrb.mxu3 %v3576_v8  ;;  %v3472_v36 = vor.u32 %v4031_v30, %v3469_v31  ;;  %v3477_v38 = vld [vmem:[%s6699_s2 + $0xb8] sm:$0xf0]  ;;  %v4027_v40 = vld [vmem:[%s6699_s2 + $0x6c] sm:$0xf0]  ;;  %v4023_v41 = vld [vmem:[%s6699_s2 + $0x54] sm:$0xf] }
  0x30   :  { %v3480_v42 = vor.u32 %v4032_v37, %v3477_v38  ;;  %v3436_v43 = vor.u32 %v4027_v40, %v3435_v39  ;;  %v3437_v44 = vld [vmem:[%s6699_s2 + $0x70] sm:$0xf0]  ;;  %v3475_v45 = vld [vmem:[%s6699_s2 + $0x98] sm:$0xf]  ;;  %v4024_v49 = vld [vmem:[%s6699_s2 + $0x5c] sm:$0xf] }
  0x31   :  { %584 = vmatpush.bf16.msrb.mxu0 %v3532_v9  ;;  %613 = vmatpush.bf16.msrb.mxu1 %v3536_v13  ;;  %v4036_v46 = vld [vmem:[%s6699_s2 + $0xb4] sm:$0xf0]  ;;  %v3440_v47 = vor.u32 %v4023_v41, %v3437_v44  ;;  %v3445_v50 = vld [vmem:[%s6699_s2 + $0x78] sm:$0xf0]  ;;  %v3403_v51 = vld [vmem:[%s6699_s2 + $0x10] sm:$0xf] }
  0x32   :  { %v3476_v48 = vor.u32 %v4036_v46, %v3475_v45  ;;  %v4019_v52 = vld [vmem:[%s6699_s2 + $0x2c] sm:$0xf0]  ;;  %v4015_v53 = vld [vmem:[%s6699_s2 + $0x14] sm:$0xf]  ;;  %v3443_v55 = vld [vmem:[%s6699_s2 + $0x58] sm:$0xf]  ;;  %v3448_v57 = vor.u32 %v4024_v49, %v3445_v50 }
  0x33   :  { %642 = vmatpush.bf16.msrb.mxu2 %v3540_v20  ;;  %671 = vmatpush.bf16.msrb.mxu3 %v3544_v21  ;;  %v3405_v54 = vld [vmem:[%s6699_s2 + $0x30] sm:$0xf0]  ;;  %v4028_v56 = vld [vmem:[%s6699_s2 + $0x74] sm:$0xf0]  ;;  %v3404_v58 = vor.u32 %v4019_v52, %v3403_v51  ;;  %v4016_v63 = vld [vmem:[%s6699_s2 + $0x1c] sm:$0xf] }
  0x34   :  { %478 = vmatmul.bf16.gmra.mxu0 %v4805_v19  ;;  %507 = vmatmul.bf16.gmra.mxu1 %v4805_v19  ;;  %v3444_v59 = vor.u32 %v4028_v56, %v3443_v55  ;;  %v3411_v60 = vld [vmem:[%s6699_s2 + $0x18] sm:$0xf]  ;;  %v3408_v62 = vor.u32 %v4015_v53, %v3405_v54  ;;  %v3413_v0 = vld [vmem:[%s6699_s2 + $0x38] sm:$0xf0]  ;;  %v4898_v3 = vld [vmem:[%s6697_s0 + $0x10] sm:$0xff]  ;;  %s3358_s23 = sshll.u32 %s4447_s22, 4  ;;  %s3359_s23 = int_to_ptr.vmem [resolvable:$true] %s3358_s23 }
  0x35   :  { %585 = vmatpush.bf16.msrb.mxu0 %v3500_v22  ;;  %614 = vmatpush.bf16.msrb.mxu1 %v3504_v26  ;;  %v4020_v61 = vld [vmem:[%s6699_s2 + $0x34] sm:$0xf0]  ;;  %v3416_v2 = vor.u32 %v4016_v63, %v3413_v0  ;;  %v3755_v4 = vld [vmem:[%s6701_s4 + $0xe0] sm:$0xf]  ;;  %v4107_v5 = vld [vmem:[%s6701_s4 + $0xec] sm:$0xf0] }
  0x36   :  { %536 = vmatmul.bf16.gmra.mxu2 %v4805_v19  ;;  %565 = vmatmul.bf16.gmra.mxu3 %v4805_v19  ;;  %v3412_v1 = vor.u32 %v4020_v61, %v3411_v60  ;;  %v4105_v6 = vld [vmem:[%s6701_s4 + $0xe4] sm:$0xf]  ;;  %v4913_v7 = vor.u32 %v4107_v5, %v3755_v4  ;;  %v3757_v8 = vld [vmem:[%s6701_s4 + $0xf0] sm:$0xf0]  ;;  %v4106_v9 = vld [vmem:[%s6701_s4 + $0xec] sm:$0xf] }
  0x37   :  { %643 = vmatpush.bf16.msrb.mxu2 %v3508_v32  ;;  %672 = vmatpush.bf16.msrb.mxu3 %v3512_v33  ;;  %v3765_v10 = vld [vmem:[%s6701_s4 + $0xf8] sm:$0xf0]  ;;  %v4924_v11 = vor.u32 %v4105_v6, %v3757_v8  ;;  %v3739_v13 = vld [vmem:[%s6701_s4 + $0xc0] sm:$0xf]  ;;  %v4103_v14 = vld [vmem:[%s6701_s4 + $0xcc] sm:$0xf0] }
  0x38   :  { %v4926_v12 = vor.u32 %v4106_v9, %v3765_v10  ;;  %v4101_v15 = vld [vmem:[%s6701_s4 + $0xc4] sm:$0xf]  ;;  %v4938_v16 = vor.u32 %v4103_v14, %v3739_v13  ;;  %v3741_v17 = vld [vmem:[%s6701_s4 + $0xd0] sm:$0xf0]  ;;  %v4102_v18 = vld [vmem:[%s6701_s4 + $0xcc] sm:$0xf] }
  0x39   :  { %586 = vmatpush.bf16.msrb.mxu0 %v3468_v34  ;;  %615 = vmatpush.bf16.msrb.mxu1 %v3472_v36  ;;  %v3749_v20 = vld [vmem:[%s6701_s4 + $0xd8] sm:$0xf0]  ;;  %v4951_v21 = vor.u32 %v4101_v15, %v3741_v17  ;;  %v3763_v23 = vld [vmem:[%s6701_s4 + $0xe8] sm:$0xf]  ;;  %v4108_v24 = vld [vmem:[%s6701_s4 + $0xf4] sm:$0xf0] }
  0x3a   :  { %6820 = vst [vmem:[#allocation6_spill] sm:$0xff] %v4938_v16  ;;  %v4953_v22 = vor.u32 %v4102_v18, %v3749_v20  ;;  %v4961_v25 = vor.u32 %v4108_v24, %v3763_v23  ;;  %v4970_v26 = vld [vmem:[%s6697_s0 + $0x18] sm:$0xff]  ;;  %v3723_v27 = vld [vmem:[%s6701_s4 + $0xa0] sm:$0xf]  ;;  %v4099_v28 = vld [vmem:[%s6701_s4 + $0xac] sm:$0xf0] }
  0x3b   :  { %644 = vmatpush.bf16.msrb.mxu2 %v3476_v48  ;;  %673 = vmatpush.bf16.msrb.mxu3 %v3480_v42  ;;  %6821 = vst [vmem:[#allocation7_spill] sm:$0xff] %v4951_v21  ;;  %v4097_v29 = vld [vmem:[%s6701_s4 + $0xa4] sm:$0xf]  ;;  %v4985_v30 = vor.u32 %v4099_v28, %v3723_v27  ;;  %v3725_v31 = vld [vmem:[%s6701_s4 + $0xb0] sm:$0xf0]  ;;  %s3360_s25 = sshll.u32 %s6705_s8, 4  ;;  %s3361_s25 = int_to_ptr.hbm [resolvable:$true] %s3360_s25 }
  0x3c   :  { %6822 = vst [vmem:[#allocation8_spill] sm:$0xff] %v4953_v22  ;;  %v4098_v32 = vld [vmem:[%s6701_s4 + $0xac] sm:$0xf]  ;;  %v3733_v33 = vld [vmem:[%s6701_s4 + $0xb8] sm:$0xf0]  ;;  %v4996_v34 = vor.u32 %v4097_v29, %v3725_v31 }
  0x3d   :  { %587 = vmatpush.bf16.msrb.mxu0 %v3436_v43  ;;  %616 = vmatpush.bf16.msrb.mxu1 %v3440_v47  ;;  %6823 = vst [vmem:[#allocation9_spill] sm:$0xff] %v4985_v30  ;;  %v4998_v36 = vor.u32 %v4098_v32, %v3733_v33  ;;  %v3747_v37 = vld [vmem:[%s6701_s4 + $0xc8] sm:$0xf]  ;;  %v4104_v38 = vld [vmem:[%s6701_s4 + $0xd4] sm:$0xf0] }
  0x3e   :  { %v3707_v39 = vld [vmem:[%s6701_s4 + $0x80] sm:$0xf]  ;;  %v5010_v40 = vor.u32 %v4104_v38, %v3747_v37  ;;  %v4095_v41 = vld [vmem:[%s6701_s4 + $0x8c] sm:$0xf0]  ;;  %v4093_v42 = vld [vmem:[%s6701_s4 + $0x84] sm:$0xf] }
  0x3f   :  { %645 = vmatpush.bf16.msrb.mxu2 %v3444_v59  ;;  %674 = vmatpush.bf16.msrb.mxu3 %v3448_v57  ;;  %v3709_v43 = vld [vmem:[%s6701_s4 + $0x90] sm:$0xf0]  ;;  %v5023_v44 = vor.u32 %v4095_v41, %v3707_v39  ;;  %v3731_v46 = vld [vmem:[%s6701_s4 + $0xa8] sm:$0xf]  ;;  %v4100_v47 = vld [vmem:[%s6701_s4 + $0xb4] sm:$0xf0] }
  0x40   :  { %6824 = vst [vmem:[#allocation10_spill] sm:$0xff] %v5010_v40  ;;  %v5025_v45 = vor.u32 %v4093_v42, %v3709_v43  ;;  %v4094_v48 = vld [vmem:[%s6701_s4 + $0x8c] sm:$0xf]  ;;  %v5037_v49 = vor.u32 %v4100_v47, %v3731_v46  ;;  %v3717_v50 = vld [vmem:[%s6701_s4 + $0x98] sm:$0xf0] }
  0x41   :  { %588 = vmatpush.bf16.msrb.mxu0 %v3404_v58  ;;  %617 = vmatpush.bf16.msrb.mxu1 %v3408_v62  ;;  %v5042_v51 = vor.u32 %v4094_v48, %v3717_v50  ;;  %v3715_v52 = vld [vmem:[%s6701_s4 + $0x88] sm:$0xf]  ;;  %v4096_v53 = vld [vmem:[%s6701_s4 + $0x94] sm:$0xf0]  ;;  %v3691_v55 = vld [vmem:[%s6701_s4 + $0x60] sm:$0xf] }
  0x42   :  { %6825 = vst [vmem:[#allocation11_spill] sm:$0xff] %v5037_v49  ;;  %v5055_v54 = vor.u32 %v4096_v53, %v3715_v52  ;;  %v4091_v56 = vld [vmem:[%s6701_s4 + $0x6c] sm:$0xf0]  ;;  %v4089_v57 = vld [vmem:[%s6701_s4 + $0x64] sm:$0xf] }
  0x43   :  { %646 = vmatpush.bf16.msrb.mxu2 %v3412_v1  ;;  %675 = vmatpush.bf16.msrb.mxu3 %v3416_v2  ;;  %6826 = vst [vmem:[#allocation12_spill] sm:$0xff] %v5042_v51  ;;  %v5070_v58 = vor.u32 %v4091_v56, %v3691_v55  ;;  %v3699_v59 = vld [vmem:[%s6701_s4 + $0x68] sm:$0xf]  ;;  %v4092_v60 = vld [vmem:[%s6701_s4 + $0x74] sm:$0xf0] }
  0x44   :  { %483 = vmatmul.bf16.gmra.mxu0 %v4898_v3  ;;  %512 = vmatmul.bf16.gmra.mxu1 %v4898_v3  ;;  %v5083_v62 = vor.u32 %v4092_v60, %v3699_v59  ;;  %v4090_v63 = vld [vmem:[%s6701_s4 + $0x6c] sm:$0xf]  ;;  %v3701_v0 = vld [vmem:[%s6701_s4 + $0x78] sm:$0xf0]  ;;  %v3675_v1 = vld [vmem:[%s6701_s4 + $0x40] sm:$0xf] }
  0x45   :  { %990 = vmatpush.bf16.msra.mxu0 %v4913_v7  ;;  %1003 = vmatpush.bf16.msra.mxu1 %v4924_v11  ;;  %6827 = vst [vmem:[#allocation13_spill] sm:$0xff] %v5070_v58  ;;  %v5095_v2 = vor.u32 %v4090_v63, %v3701_v0  ;;  %v4087_v4 = vld [vmem:[%s6701_s4 + $0x4c] sm:$0xf0]  ;;  %v4085_v5 = vld [vmem:[%s6701_s4 + $0x44] sm:$0xf] }
  0x46   :  { %541 = vmatmul.bf16.gmra.mxu2 %v4898_v3  ;;  %570 = vmatmul.bf16.gmra.mxu3 %v4898_v3  ;;  %6829 = vst [vmem:[#allocation15_spill] sm:$0xff] %v5083_v62  ;;  %v3677_v6 = vld [vmem:[%s6701_s4 + $0x50] sm:$0xf0]  ;;  %v5108_v8 = vor.u32 %v4087_v4, %v3675_v1  ;;  %v3683_v10 = vld [vmem:[%s6701_s4 + $0x48] sm:$0xf] }
  0x47   :  { %1029 = vmatpush.bf16.msra.mxu3 %v4926_v12  ;;  %1016 = vmatpush.bf16.msra.mxu2 %v4961_v25  ;;  %v5110_v9 = vor.u32 %v4085_v5, %v3677_v6  ;;  %v4088_v13 = vld [vmem:[%s6701_s4 + $0x54] sm:$0xf0]  ;;  %v4086_v14 = vld [vmem:[%s6701_s4 + $0x4c] sm:$0xf]  ;;  %v3685_v17 = vld [vmem:[%s6701_s4 + $0x58] sm:$0xf0] }
  0x48   :  { %v5122_v15 = vor.u32 %v4088_v13, %v3683_v10  ;;  %v3659_v18 = vld [vmem:[%s6701_s4 + $0x20] sm:$0xf]  ;;  %v4083_v20 = vld [vmem:[%s6701_s4 + $0x2c] sm:$0xf0]  ;;  %v5133_v23 = vor.u32 %v4086_v14, %v3685_v17  ;;  %v4081_v24 = vld [vmem:[%s6701_s4 + $0x24] sm:$0xf] }
  0x49   :  { %991 = vmatpush.bf16.msra.mxu0 %v4938_v16  ;;  %1004 = vmatpush.bf16.msra.mxu1 %v4951_v21  ;;  %v3661_v27 = vld [vmem:[%s6701_s4 + $0x30] sm:$0xf0]  ;;  %v3667_v28 = vld [vmem:[%s6701_s4 + $0x28] sm:$0xf]  ;;  %v5145_v29 = vor.u32 %v4083_v20, %v3659_v18  ;;  %v4084_v31 = vld [vmem:[%s6701_s4 + $0x34] sm:$0xf0] }
  0x4a   :  { %v4082_v32 = vld [vmem:[%s6701_s4 + $0x2c] sm:$0xf]  ;;  %v3669_v33 = vld [vmem:[%s6701_s4 + $0x38] sm:$0xf0]  ;;  %v5158_v37 = vor.u32 %v4081_v24, %v3661_v27  ;;  %v5160_v38 = vor.u32 %v4084_v31, %v3667_v28  ;;  %v3643_v41 = vld [vmem:[%s6701_s4] sm:$0xf] }
  0x4b   :  { %1030 = vmatpush.bf16.msra.mxu3 %v4953_v22  ;;  %1017 = vmatpush.bf16.msra.mxu2 %v5010_v40  ;;  %v5163_v39 = vor.u32 %v4082_v32, %v3669_v33  ;;  %v4079_v42 = vld [vmem:[%s6701_s4 + $0xc] sm:$0xf0]  ;;  %v4077_v43 = vld [vmem:[%s6701_s4 + $0x4] sm:$0xf]  ;;  %v3645_v47 = vld [vmem:[%s6701_s4 + $0x10] sm:$0xf0] }
  0x4c   :  { %v5179_v46 = vor.u32 %v4079_v42, %v3643_v41  ;;  %v3651_v48 = vld [vmem:[%s6701_s4 + $0x8] sm:$0xf]  ;;  %v4080_v50 = vld [vmem:[%s6701_s4 + $0x14] sm:$0xf0]  ;;  %v5192_v52 = vor.u32 %v4077_v43, %v3645_v47  ;;  %v4078_v55 = vld [vmem:[%s6701_s4 + $0xc] sm:$0xf] }
  0x4d   :  { %992 = vmatpush.bf16.msra.mxu0 %v4985_v30  ;;  %1005 = vmatpush.bf16.msra.mxu1 %v4996_v34  ;;  %v5194_v53 = vor.u32 %v4080_v50, %v3651_v48  ;;  %v3653_v56 = vld [vmem:[%s6701_s4 + $0x18] sm:$0xf0]  ;;  %v4139_v59 = vld [vmem:[%s6702_s5 + $0xec] sm:$0xf0]  ;;  %v4137_v60 = vld [vmem:[%s6702_s5 + $0xe4] sm:$0xf] }
  0x4e   :  { %6830 = vst [vmem:[#allocation16_spill] sm:$0xff] %v5192_v52  ;;  %v3885_v63 = vld [vmem:[%s6702_s5 + $0xf0] sm:$0xf0]  ;;  %v3891_v1 = vld [vmem:[%s6702_s5 + $0xe8] sm:$0xf] }
  0x4f   :  { %1031 = vmatpush.bf16.msra.mxu3 %v4998_v36  ;;  %1018 = vmatpush.bf16.msra.mxu2 %v5037_v49  ;;  %6831 = vst [vmem:[#allocation17_spill] sm:$0xff] %v5194_v53  ;;  %v5222_v0 = vor.u32 %v4137_v60, %v3885_v63  ;;  %v4140_v4 = vld [vmem:[%s6702_s5 + $0xf4] sm:$0xf0]  ;;  %v4138_v5 = vld [vmem:[%s6702_s5 + $0xec] sm:$0xf] }
  0x50   :  { %v5234_v6 = vor.u32 %v4140_v4, %v3891_v1  ;;  %v3893_v10 = vld [vmem:[%s6702_s5 + $0xf8] sm:$0xf0]  ;;  %v3867_v13 = vld [vmem:[%s6702_s5 + $0xc0] sm:$0xf]  ;;  %v4135_v14 = vld [vmem:[%s6702_s5 + $0xcc] sm:$0xf0] }
  0x51   :  { %993 = vmatpush.bf16.msra.mxu0 %v5023_v44  ;;  %1006 = vmatpush.bf16.msra.mxu1 %v5025_v45  ;;  %6834 = vst [vmem:[#allocation20_spill] sm:$0xff] %v5222_v0  ;;  %v5247_v17 = vor.u32 %v4138_v5, %v3893_v10  ;;  %v5249_v18 = vor.u32 %v4135_v14, %v3867_v13  ;;  %v4133_v20 = vld [vmem:[%s6702_s5 + $0xc4] sm:$0xf]  ;;  %v3869_v24 = vld [vmem:[%s6702_s5 + $0xd0] sm:$0xf0] }
  0x52   :  { %6835 = vst [vmem:[#allocation21_spill] sm:$0xff] %v5234_v6  ;;  %v3875_v27 = vld [vmem:[%s6702_s5 + $0xc8] sm:$0xf]  ;;  %v5261_v28 = vor.u32 %v4133_v20, %v3869_v24  ;;  %v4136_v31 = vld [vmem:[%s6702_s5 + $0xd4] sm:$0xf0] }
  0x53   :  { %1032 = vmatpush.bf16.msra.mxu3 %v5042_v51  ;;  %1019 = vmatpush.bf16.msra.mxu2 %v5055_v54  ;;  %6836 = vst [vmem:[#allocation22_spill] sm:$0xff] %v5247_v17  ;;  %v4134_v32 = vld [vmem:[%s6702_s5 + $0xcc] sm:$0xf]  ;;  %v3877_v33 = vld [vmem:[%s6702_s5 + $0xd8] sm:$0xf0]  ;;  %v5273_v41 = vor.u32 %v4136_v31, %v3875_v27 }
  0x54   :  { %488 = vmatmul.bf16.gmra.mxu0 %v4970_v26  ;;  %517 = vmatmul.bf16.gmra.mxu1 %v4970_v26  ;;  %6837 = vst [vmem:[#allocation23_spill] sm:$0xff] %v5249_v18  ;;  %v5275_v42 = vor.u32 %v4134_v32, %v3877_v33  ;;  %v3851_v43 = vld [vmem:[%s6702_s5 + $0xa0] sm:$0xf]  ;;  %v4131_v47 = vld [vmem:[%s6702_s5 + $0xac] sm:$0xf0] }
  0x55   :  { %994 = vmatpush.bf16.msra.mxu0 %v5070_v58  ;;  %6838 = vst [vmem:[#allocation24_spill] sm:$0xff] %v5261_v28  ;;  %v4129_v48 = vld [vmem:[%s6702_s5 + $0xa4] sm:$0xf]  ;;  %v3853_v50 = vld [vmem:[%s6702_s5 + $0xb0] sm:$0xf0] }
  0x56   :  { %546 = vmatmul.bf16.gmra.mxu2 %v4970_v26  ;;  %575 = vmatmul.bf16.gmra.mxu3 %v4970_v26  ;;  %6839 = vst [vmem:[#allocation25_spill] sm:$0xff] %v5273_v41  ;;  %v4130_v60 = vld [vmem:[%s6702_s5 + $0xac] sm:$0xf]  ;;  %v3861_v63 = vld [vmem:[%s6702_s5 + $0xb8] sm:$0xf0] }
  0x57   :  { %1020 = vmatpush.bf16.msra.mxu2 %v5083_v62  ;;  %1033 = vmatpush.bf16.msra.mxu3 %v5095_v2  ;;  %6840 = vst [vmem:[#allocation26_spill] sm:$0xff] %v5275_v42  ;;  %v5311_v4 = vor.u32 %v4130_v60, %v3861_v63  ;;  %v3835_v5 = vld [vmem:[%s6702_s5 + $0x80] sm:$0xf]  ;;  %v4127_v10 = vld [vmem:[%s6702_s5 + $0x8c] sm:$0xf0] }
  0x58   :  { %v4125_v13 = vld [vmem:[%s6702_s5 + $0x84] sm:$0xf]  ;;  %v3837_v14 = vld [vmem:[%s6702_s5 + $0x90] sm:$0xf0]  ;;  %v3843_v20 = vld [vmem:[%s6702_s5 + $0x88] sm:$0xf]  ;;  %v5334_v27 = vor.u32 %v4127_v10, %v3835_v5 }
  0x59   :  { %995 = vmatpush.bf16.msra.mxu0 %v5108_v8  ;;  %6844 = vst [vmem:[#allocation30_spill] sm:$0xff] %v5311_v4  ;;  %v4128_v24 = vld [vmem:[%s6702_s5 + $0x94] sm:$0xf0]  ;;  %v4126_v31 = vld [vmem:[%s6702_s5 + $0x8c] sm:$0xf]  ;;  %v5343_v33 = vor.u32 %v4125_v13, %v3837_v14 }
  0x5a   :  { %6845 = vst [vmem:[#allocation31_spill] sm:$0xff] %v5334_v27  ;;  %v3845_v32 = vld [vmem:[%s6702_s5 + $0x98] sm:$0xf0]  ;;  %v3821_v60 = vld [vmem:[%s6702_s5 + $0x70] sm:$0xf0] }
  0x5b   :  { %1021 = vmatpush.bf16.msra.mxu2 %v5122_v15  ;;  %1034 = vmatpush.bf16.msra.mxu3 %v5133_v23  ;;  %6846 = vst [vmem:[#allocation32_spill] sm:$0xff] %v5343_v33  ;;  %v3827_v63 = vld [vmem:[%s6702_s5 + $0x68] sm:$0xf]  ;;  %v4124_v5 = vld [vmem:[%s6702_s5 + $0x74] sm:$0xf0] }
  0x5c   :  { %v4122_v13 = vld [vmem:[%s6702_s5 + $0x6c] sm:$0xf]  ;;  %v3829_v14 = vld [vmem:[%s6702_s5 + $0x78] sm:$0xf0] }
  0x5d   :  { %996 = vmatpush.bf16.msra.mxu0 %v5145_v29 }
  0x5f   :  { %1022 = vmatpush.bf16.msra.mxu2 %v5160_v38  ;;  %1035 = vmatpush.bf16.msra.mxu3 %v5163_v39 }
  0x61   :  { %997 = vmatpush.bf16.msra.mxu0 %v5179_v46 }
  0x63   :  { %1023 = vmatpush.bf16.msra.mxu2 %v5194_v53 }
  0x64   :  { %589 = vmatmul.bf16.vlgmr.msrb.gmra.mxu0 %v4700_v35  ;;  %618 = vmatmul.bf16.vlgmr.msrb.gmra.mxu1 %v4700_v35 }
  0x66   :  { %647 = vmatmul.bf16.vlgmr.msrb.gmra.mxu2 %v4700_v35  ;;  %676 = vmatmul.bf16.vlgmr.msrb.gmra.mxu3 %v4700_v35  ;;  %v3693_v35 = vld [vmem:[%s6701_s4 + $0x70] sm:$0xf0] }
  0x67   :  { %v5081_v61 = vor.u32 %v4089_v57, %v3693_v35  ;;  %v3883_v57 = vld [vmem:[%s6702_s5 + $0xe0] sm:$0xf]  ;;  %v5207_v35 = vor.u32 %v4078_v55, %v3653_v56  ;;  %1236 = vmatpush.bf16.msrb.mxu2 %v5234_v6  ;;  %v3859_v55 = vld [vmem:[%s6702_s5 + $0xa8] sm:$0xf]  ;;  %v4132_v56 = vld [vmem:[%s6702_s5 + $0xb4] sm:$0xf0] }
  0x68   :  { %v5308_v1 = vor.u32 %v4132_v56, %v3859_v55  ;;  %v4121_v55 = vld [vmem:[%s6702_s5 + $0x64] sm:$0xf]  ;;  %v6706_v56 = vmov 0  }
  0x69   :  { %6828 = vst [vmem:[#allocation14_spill] sm:$0xff] %v5081_v61  ;;  %1007 = vmatpush.bf16.msra.mxu1 %v5081_v61  ;;  %1036 = vmatpush.bf16.msra.mxu3 %v5207_v35 }
  0x6a   :  { %6832 = vst [vmem:[#allocation18_spill] sm:$0xff] %v5207_v35  ;;  %4159 = vset.pattern.permute.xlu0 %v6706_v56  ;;  %4160 = vset.pattern.permute.xlu1 %v6706_v56 }
  0x6b   :  { %1237 = vmatpush.bf16.msrb.mxu2 %v5273_v41  ;;  %6843 = vst [vmem:[#allocation29_spill] sm:$0xff] %v5308_v1  ;;  %4161 = vset.pattern.permute.xlu2 %v6706_v56  ;;  %v4115_v56 = vld [vmem:[%s6702_s5 + $0x2c] sm:$0xf0] }
  0x6d   :  { %1008 = vmatpush.bf16.msra.mxu1 %v5110_v9  ;;  %1249 = vmatpush.bf16.msrb.mxu3 %v5247_v17 }
  0x6f   :  { %1238 = vmatpush.bf16.msrb.mxu2 %v5308_v1 }
  0x71   :  { %1009 = vmatpush.bf16.msra.mxu1 %v5158_v37  ;;  %1250 = vmatpush.bf16.msrb.mxu3 %v5275_v42 }
  0x74   :  { %594 = vmatmul.bf16.gmra.mxu0 %v4805_v19  ;;  %623 = vmatmul.bf16.gmra.mxu1 %v4805_v19 }
  0x75   :  { %1010 = vmatpush.bf16.msra.mxu1 %v5192_v52  ;;  %1251 = vmatpush.bf16.msrb.mxu3 %v5311_v4 }
  0x76   :  { %652 = vmatmul.bf16.gmra.mxu2 %v4805_v19  ;;  %681 = vmatmul.bf16.gmra.mxu3 %v4805_v19  ;;  %v5220_v19 = vor.u32 %v4139_v59, %v3883_v57  ;;  %v5297_v57 = vor.u32 %v4131_v47, %v3851_v43  ;;  %v5299_v59 = vor.u32 %v4129_v48, %v3853_v50  ;;  %v3819_v48 = vld [vmem:[%s6702_s5 + $0x60] sm:$0xf]  ;;  %v4123_v50 = vld [vmem:[%s6702_s5 + $0x6c] sm:$0xf0] }
  0x77   :  { %v5345_v43 = vor.u32 %v4128_v24, %v3843_v20  ;;  %v5348_v47 = vor.u32 %v4126_v31, %v3845_v32  ;;  %v5373_v10 = vor.u32 %v4123_v50, %v3819_v48  ;;  %v5383_v20 = vor.u32 %v4121_v55, %v3821_v60  ;;  %v3803_v31 = vld [vmem:[%s6702_s5 + $0x40] sm:$0xf]  ;;  %v4119_v32 = vld [vmem:[%s6702_s5 + $0x4c] sm:$0xf0]  ;;  %v4117_v48 = vld [vmem:[%s6702_s5 + $0x44] sm:$0xf] }
  0x78   :  { %6833 = vst [vmem:[#allocation19_spill] sm:$0xff] %v5220_v19  ;;  %1210 = vmatpush.bf16.msrb.mxu0 %v5220_v19  ;;  %v5385_v24 = vor.u32 %v4124_v5, %v3827_v63  ;;  %v3805_v50 = vld [vmem:[%s6702_s5 + $0x50] sm:$0xf0]  ;;  %v3811_v55 = vld [vmem:[%s6702_s5 + $0x48] sm:$0xf]  ;;  %v5408_v60 = vor.u32 %v4119_v32, %v3803_v31 }
  0x79   :  { %1223 = vmatpush.bf16.msrb.mxu1 %v5222_v0  ;;  %6841 = vst [vmem:[#allocation27_spill] sm:$0xff] %v5297_v57  ;;  %1239 = vmatpush.bf16.msrb.mxu2 %v5345_v43  ;;  %v4120_v63 = vld [vmem:[%s6702_s5 + $0x54] sm:$0xf0]  ;;  %v4118_v5 = vld [vmem:[%s6702_s5 + $0x4c] sm:$0xf] }
  0x7a   :  { %6842 = vst [vmem:[#allocation28_spill] sm:$0xff] %v5299_v59  ;;  %1252 = vmatpush.bf16.msrb.mxu3 %v5348_v47  ;;  %v5423_v31 = vor.u32 %v4120_v63, %v3811_v55  ;;  %v3787_v32 = vld [vmem:[%s6702_s5 + $0x20] sm:$0xf]  ;;  %v4116_v55 = vld [vmem:[%s6702_s5 + $0x34] sm:$0xf0] }
  0x7b   :  { %6847 = vst [vmem:[#allocation33_spill] sm:$0xff] %v5345_v43  ;;  %v4114_v63 = vld [vmem:[%s6702_s5 + $0x2c] sm:$0xf]  ;;  %v3771_v43 = vld [vmem:[%s6702_s5] sm:$0xf] }
  0x7c   :  { %1211 = vmatpush.bf16.msrb.mxu0 %v5249_v18  ;;  %6848 = vst [vmem:[#allocation34_spill] sm:$0xff] %v5348_v47 }
  0x7d   :  { %1224 = vmatpush.bf16.msrb.mxu1 %v5261_v28  ;;  %6849 = vst [vmem:[#allocation35_spill] sm:$0xff] %v5373_v10  ;;  %1240 = vmatpush.bf16.msrb.mxu2 %v5385_v24 }
  0x7e   :  { %6850 = vst [vmem:[#allocation36_spill] sm:$0xff] %v5383_v20 }
  0x7f   :  { %6851 = vst [vmem:[#allocation37_spill] sm:$0xff] %v5385_v24 }
  0x80   :  { %1212 = vmatpush.bf16.msrb.mxu0 %v5297_v57  ;;  %6853 = vst [vmem:[#allocation39_spill] sm:$0xff] %v5408_v60 }
  0x81   :  { %1225 = vmatpush.bf16.msrb.mxu1 %v5299_v59  ;;  %6855 = vst [vmem:[#allocation41_spill] sm:$0xff] %v5423_v31  ;;  %1241 = vmatpush.bf16.msrb.mxu2 %v5423_v31 }
  0x84   :  { %599 = vmatmul.bf16.gmra.mxu0 %v4898_v3  ;;  %628 = vmatmul.bf16.gmra.mxu1 %v4898_v3 }
  0x85   :  { %1213 = vmatpush.bf16.msrb.mxu0 %v5334_v27  ;;  %1226 = vmatpush.bf16.msrb.mxu1 %v5343_v33 }
  0x86   :  { %657 = vmatmul.bf16.gmra.mxu2 %v4898_v3  ;;  %686 = vmatmul.bf16.gmra.mxu3 %v4898_v3  ;;  %v5388_v3 = vor.u32 %v4122_v13, %v3829_v14  ;;  %v3813_v13 = vld [vmem:[%s6702_s5 + $0x58] sm:$0xf0]  ;;  %v5421_v14 = vor.u32 %v4117_v48, %v3805_v50  ;;  %v3789_v48 = vld [vmem:[%s6702_s5 + $0x30] sm:$0xf0]  ;;  %v3795_v50 = vld [vmem:[%s6702_s5 + $0x28] sm:$0xf] }
  0x87   :  { %v5459_v24 = vor.u32 %v4116_v55, %v3795_v50  ;;  %v4112_v50 = vld [vmem:[%s6702_s5 + $0x14] sm:$0xf0] }
  0x88   :  { %6852 = vst [vmem:[#allocation38_spill] sm:$0xff] %v5388_v3  ;;  %1253 = vmatpush.bf16.msrb.mxu3 %v5388_v3 }
  0x89   :  { %1214 = vmatpush.bf16.msrb.mxu0 %v5373_v10  ;;  %1227 = vmatpush.bf16.msrb.mxu1 %v5383_v20  ;;  %6854 = vst [vmem:[#allocation40_spill] sm:$0xff] %v5421_v14  ;;  %v4113_v10 = vld [vmem:[%s6702_s5 + $0x24] sm:$0xf]  ;;  %v5435_v20 = vor.u32 %v4118_v5, %v3813_v13  ;;  %v3797_v5 = vld [vmem:[%s6702_s5 + $0x38] sm:$0xf0]  ;;  %v5453_v13 = vor.u32 %v4115_v56, %v3787_v32 }
  0x8a   :  { %v5457_v3 = vor.u32 %v4113_v10, %v3789_v48  ;;  %6859 = vst [vmem:[#allocation45_spill] sm:$0xff] %v5459_v24  ;;  %v5462_v47 = vor.u32 %v4114_v63, %v3797_v5  ;;  %v4111_v56 = vld [vmem:[%s6702_s5 + $0xc] sm:$0xf0]  ;;  %v4109_v32 = vld [vmem:[%s6702_s5 + $0x4] sm:$0xf]  ;;  %1242 = vmatpush.bf16.msrb.mxu2 %v5459_v24 }
  0x8b   :  { %6856 = vst [vmem:[#allocation42_spill] sm:$0xff] %v5435_v20  ;;  %v3773_v10 = vld [vmem:[%s6702_s5 + $0x10] sm:$0xf0]  ;;  %v3779_v48 = vld [vmem:[%s6702_s5 + $0x8] sm:$0xf]  ;;  %v5483_v55 = vor.u32 %v4111_v56, %v3771_v43 }
  0x8c   :  { %6857 = vst [vmem:[#allocation43_spill] sm:$0xff] %v5453_v13  ;;  %1254 = vmatpush.bf16.msrb.mxu3 %v5435_v20  ;;  %v4110_v63 = vld [vmem:[%s6702_s5 + $0xc] sm:$0xf]  ;;  %v3781_v5 = vld [vmem:[%s6702_s5 + $0x18] sm:$0xf0]  ;;  %v5493_v20 = vor.u32 %v4109_v32, %v3773_v10  ;;  %v5495_v31 = vor.u32 %v4112_v50, %v3779_v48  ;;  %v6865_v10 = vmov 0  }
  0x8d   :  { %1215 = vmatpush.bf16.msrb.mxu0 %v5408_v60  ;;  %1228 = vmatpush.bf16.msrb.mxu1 %v5421_v14  ;;  %6858 = vst [vmem:[#allocation44_spill] sm:$0xff] %v5457_v3  ;;  %v5499_v43 = vor.u32 %v4110_v63, %v3781_v5  ;;  %v5535_v5 = vld [vmem:[%s6700_s3] sm:$0xff] }
  0x8e   :  { %6860 = vst [vmem:[#allocation46_spill] sm:$0xff] %v5462_v47  ;;  %1243 = vmatpush.bf16.msrb.mxu2 %v5495_v31 }
  0x8f   :  { %6861 = vst [vmem:[#allocation47_spill] sm:$0xff] %v5483_v55 }
  0x90   :  { %6862 = vst [vmem:[#allocation48_spill] sm:$0xff] %v5493_v20  ;;  %1255 = vmatpush.bf16.msrb.mxu3 %v5462_v47 }
  0x91   :  { %1216 = vmatpush.bf16.msrb.mxu0 %v5453_v13  ;;  %1229 = vmatpush.bf16.msrb.mxu1 %v5457_v3  ;;  %6863 = vst [vmem:[#allocation49_spill] sm:$0xff] %v5495_v31 }
  0x92   :  { %6864 = vst [vmem:[#allocation50_spill] sm:$0xff] %v5499_v43 }
  0x94   :  { %604 = vmatmul.bf16.gmra.mxu0 %v4970_v26  ;;  %633 = vmatmul.bf16.gmra.mxu1 %v4970_v26 }
  0x95   :  { %1217 = vmatpush.bf16.msrb.mxu0 %v5483_v55  ;;  %1230 = vmatpush.bf16.msrb.mxu1 %v5493_v20 }
  0x96   :  { %662 = vmatmul.bf16.gmra.mxu2 %v4970_v26  ;;  %691 = vmatmul.bf16.gmra.mxu3 %v4970_v26 }
  0x97   :  { %1256 = vmatpush.bf16.msrb.mxu3 %v5499_v43 }
  0xa1   :  { %v5508_v56 = vpop.f32.mrf.mxu0  ;;  %v5510_v32 = vpop.f32.mrf.mxu1 }
  0xa4   :  { %998 = vmatmul.bf16.vlgmr.msra.gmra.mxu0 %v6865_v10  ;;  %1011 = vmatmul.bf16.vlgmr.msra.gmra.mxu1 %v6865_v10 }
  0xa5   :  { %1411 = vmatpush.bf16.msra.mxu0 %v4913_v7  ;;  %1424 = vmatpush.bf16.msra.mxu1 %v4924_v11 }
  0xa6   :  { %1024 = vmatmul.bf16.vlgmr.msra.gmra.mxu2 %v6865_v10  ;;  %1037 = vmatmul.bf16.vlgmr.msra.gmra.mxu3 %v6865_v10 }
  0xa7   :  { %1437 = vmatpush.bf16.msra.mxu2 %v4961_v25  ;;  %1450 = vmatpush.bf16.msra.mxu3 %v4926_v12 }
  0xa9   :  { %v5519_v26 = vpop.f32.mrf.mxu2  ;;  %v5522_v48 = vpop.f32.mrf.mxu3  ;;  %1412 = vmatpush.bf16.msra.mxu0 %v4938_v16  ;;  %1425 = vmatpush.bf16.msra.mxu1 %v4951_v21 }
  0xaa   :  { %v5524_v50 = vpop.f32.mrf.mxu0  ;;  %v5526_v63 = vpop.f32.mrf.mxu1 }
  0xab   :  { %6866 = vst [vmem:[#allocation51_spill] sm:$0xff] %v5524_v50  ;;  %1438 = vmatpush.bf16.msra.mxu2 %v5010_v40  ;;  %1451 = vmatpush.bf16.msra.mxu3 %v4953_v22  ;;  %v5547_v22 = vperm.slane %v5535_v5, 1 }
  0xac   :  { %6867 = vst [vmem:[#allocation52_spill] sm:$0xff] %v5526_v63  ;;  %v5541_v63 = vperm.slane %v5535_v5, 0 }
  0xad   :  { %1413 = vmatpush.bf16.msra.mxu0 %v4985_v30  ;;  %1426 = vmatpush.bf16.msra.mxu1 %v4996_v34  ;;  %6870 = vst [vmem:[#allocation55_spill] sm:$0xff] %v5547_v22 }
  0xae   :  { %6868 = vst [vmem:[#allocation53_spill] sm:$0xff] %v5541_v63 }
  0xaf   :  { %1439 = vmatpush.bf16.msra.mxu2 %v5037_v49  ;;  %1452 = vmatpush.bf16.msra.mxu3 %v4998_v36 }
  0xb1   :  { %v5543_v50 = vpop.f32.mrf.mxu2  ;;  %v5549_v40 = vpop.f32.mrf.mxu3  ;;  %1414 = vmatpush.bf16.msra.mxu0 %v5023_v44  ;;  %1427 = vmatpush.bf16.msra.mxu1 %v5025_v45 }
  0xb2   :  { %6869 = vst [vmem:[#allocation54_spill] sm:$0xff] %v5543_v50  ;;  %v479_v21 = vpop.f32.mrf.mxu0  ;;  %v508_v30 = vpop.f32.mrf.mxu1 }
  0xb3   :  { %6871 = vst [vmem:[#allocation56_spill] sm:$0xff] %v5549_v40  ;;  %v5552_v16 = vadd.f32 %v479_v21, %v5541_v63  ;;  %v5556_v49 = vadd.f32 %v508_v30, %v5547_v22  ;;  %1440 = vmatpush.bf16.msra.mxu2 %v5055_v54  ;;  %1453 = vmatpush.bf16.msra.mxu3 %v5042_v51  ;;  %v5567_v21 = vperm.slane %v5535_v5, 2  ;;  %v5572_v30 = vperm.slane %v5535_v5, 3 }
  0xb4   :  { %1218 = vmatmul.bf16.vlgmr.msrb.gmra.mxu0 %v6865_v10  ;;  %1231 = vmatmul.bf16.vlgmr.msrb.gmra.mxu1 %v6865_v10 }
  0xb5   :  { %6872 = vst [vmem:[#allocation57_spill] sm:$0xff] %v5552_v16  ;;  %1415 = vmatpush.bf16.msra.mxu0 %v5070_v58  ;;  %1428 = vmatpush.bf16.msra.mxu1 %v5081_v61  ;;  %v5577_v16 = vld [vmem:[%s6698_s1] sm:$0xff] }
  0xb6   :  { %6873 = vst [vmem:[#allocation58_spill] sm:$0xff] %v5556_v49  ;;  %1244 = vmatmul.bf16.vlgmr.msrb.gmra.mxu2 %v6865_v10  ;;  %1257 = vmatmul.bf16.vlgmr.msrb.gmra.mxu3 %v6865_v10  ;;  %vm1392_vm0 = vcmp.eq.s32.totalorder %v5577_v16, 0  ;;  %vm1399_vm1 = vcmp.eq.s32.totalorder %v5577_v16, 7  ;;  %vm1654_vm10 = vcmp.eq.s32.totalorder %v5577_v16, 1  ;;  %vm1661_vm14 = vcmp.eq.s32.totalorder %v5577_v16, 6 }
  0xb7   :  { %6874 = vst [vmem:[#allocation59_spill] sm:$0xff] %v5567_v21  ;;  %1441 = vmatpush.bf16.msra.mxu2 %v5083_v62  ;;  %1454 = vmatpush.bf16.msra.mxu3 %v5095_v2  ;;  %v1393_v51 = vsel %vm1392_vm0, 1, %v6865_v10 }
  0xb8   :  { %6875 = vst [vmem:[#allocation60_spill] sm:$0xff] %v5572_v30  ;;  %1395 = vperm.xlu0 %4159, %v1393_v51  }
  0xb9   :  { %v537_v49 = vpop.f32.mrf.mxu2  ;;  %v566_v40 = vpop.f32.mrf.mxu3  ;;  %1416 = vmatpush.bf16.msra.mxu0 %v5108_v8  ;;  %1429 = vmatpush.bf16.msra.mxu1 %v5110_v9 }
  0xba   :  { %v5581_v50 = vadd.f32 %v537_v49, %v5567_v21  ;;  %v5583_v58 = vpop.f32.mrf.mxu0  ;;  %v5587_v62 = vadd.f32 %v566_v40, %v5572_v30  ;;  %v5589_v61 = vpop.f32.mrf.mxu1 }
  0xbb   :  { %6877 = vst [vmem:[#allocation62_spill] sm:$0xff] %v5583_v58  ;;  %1442 = vmatpush.bf16.msra.mxu2 %v5122_v15  ;;  %1455 = vmatpush.bf16.msra.mxu3 %v5133_v23 }
  0xbc   :  { %6876 = vst [vmem:[#allocation61_spill] sm:$0xff] %v5581_v50 }
  0xbd   :  { %6878 = vst [vmem:[#allocation63_spill] sm:$0xff] %v5587_v62  ;;  %1417 = vmatpush.bf16.msra.mxu0 %v5145_v29  ;;  %1430 = vmatpush.bf16.msra.mxu1 %v5158_v37  ;;  %v1400_v62 = vsel %vm1399_vm1, 1, %v6865_v10 }
  0xbe   :  { %6879 = vst [vmem:[#allocation64_spill] sm:$0xff] %v5589_v61 }
  0xbf   :  { %1443 = vmatpush.bf16.msra.mxu2 %v5160_v38  ;;  %1456 = vmatpush.bf16.msra.mxu3 %v5163_v39 }
  0xc0   :  { %1402 = vperm.xlu0 %4159, %v1400_v62  }
  0xc1   :  { %v5598_v49 = vpop.f32.mrf.mxu2  ;;  %v5602_v40 = vpop.f32.mrf.mxu3  ;;  %1418 = vmatpush.bf16.msra.mxu0 %v5179_v46  ;;  %1431 = vmatpush.bf16.msra.mxu1 %v5192_v52 }
  0xc2   :  { %6880 = vst [vmem:[#allocation65_spill] sm:$0xff] %v5598_v49  ;;  %v484_v61 = vpop.f32.mrf.mxu0  ;;  %v513_v58 = vpop.f32.mrf.mxu1 }
  0xc3   :  { %6881 = vst [vmem:[#allocation66_spill] sm:$0xff] %v5602_v40  ;;  %v5605_v51 = vadd.f32 %v484_v61, %v5541_v63  ;;  %v5609_v50 = vadd.f32 %v513_v58, %v5547_v22  ;;  %1444 = vmatpush.bf16.msra.mxu2 %v5194_v53  ;;  %1457 = vmatpush.bf16.msra.mxu3 %v5207_v35 }
  0xc5   :  { %6882 = vst [vmem:[#allocation67_spill] sm:$0xff] %v5605_v51  ;;  %1472 = vmatpush.bf16.msrb.mxu0 %v5220_v19  ;;  %1485 = vmatpush.bf16.msrb.mxu1 %v5222_v0 }
  0xc6   :  { %6883 = vst [vmem:[#allocation68_spill] sm:$0xff] %v5609_v50 }
  0xc7   :  { %1498 = vmatpush.bf16.msrb.mxu2 %v5234_v6  ;;  %1511 = vmatpush.bf16.msrb.mxu3 %v5247_v17 }
  0xc9   :  { %1473 = vmatpush.bf16.msrb.mxu0 %v5249_v18  ;;  %v542_v61 = vpop.f32.mrf.mxu2  ;;  %v571_v50 = vpop.f32.mrf.mxu3  ;;  %1486 = vmatpush.bf16.msrb.mxu1 %v5261_v28 }
  0xca   :  { %v5620_v58 = vadd.f32 %v542_v61, %v5567_v21  ;;  %v5622_v51 = vpop.f32.mrf.mxu0  ;;  %v5628_v49 = vadd.f32 %v571_v50, %v5572_v30  ;;  %v5630_v40 = vpop.f32.mrf.mxu1 }
  0xcb   :  { %6885 = vst [vmem:[#allocation70_spill] sm:$0xff] %v5622_v51  ;;  %1499 = vmatpush.bf16.msrb.mxu2 %v5273_v41  ;;  %1512 = vmatpush.bf16.msrb.mxu3 %v5275_v42  ;;  %v6890_v51 = vld [vmem:[#allocation33_spill] sm:$0xff] }
  0xcc   :  { %6884 = vst [vmem:[#allocation69_spill] sm:$0xff] %v5620_v58 }
  0xcd   :  { %6886 = vst [vmem:[#allocation71_spill] sm:$0xff] %v5628_v49  ;;  %1474 = vmatpush.bf16.msrb.mxu0 %v5297_v57  ;;  %1487 = vmatpush.bf16.msrb.mxu1 %v5299_v59  ;;  %v6892_v49 = vld [vmem:[#allocation34_spill] sm:$0xff] }
  0xce   :  { %6887 = vst [vmem:[#allocation72_spill] sm:$0xff] %v5630_v40 }
  0xcf   :  { %1500 = vmatpush.bf16.msrb.mxu2 %v5308_v1  ;;  %1513 = vmatpush.bf16.msrb.mxu3 %v5311_v4  ;;  %v6894_v4 = vld [vmem:[#allocation35_spill] sm:$0xff] }
  0xd1   :  { %1475 = vmatpush.bf16.msrb.mxu0 %v5334_v27  ;;  %v5639_v61 = vpop.f32.mrf.mxu2  ;;  %v5641_v50 = vpop.f32.mrf.mxu3  ;;  %1488 = vmatpush.bf16.msrb.mxu1 %v5343_v33  ;;  %v6895_v27 = vld [vmem:[#allocation36_spill] sm:$0xff] }
  0xd2   :  { %6888 = vst [vmem:[#allocation73_spill] sm:$0xff] %v5639_v61  ;;  %v489_v40 = vpop.f32.mrf.mxu0  ;;  %v518_v58 = vpop.f32.mrf.mxu1  ;;  %v6896_v61 = vld [vmem:[#allocation37_spill] sm:$0xff] }
  0xd3   :  { %6889 = vst [vmem:[#allocation74_spill] sm:$0xff] %v5641_v50  ;;  %1501 = vmatpush.bf16.msrb.mxu2 %v6890_v51  ;;  %v5646_v62 = vadd.f32 %v489_v40, %v5541_v63  ;;  %1514 = vmatpush.bf16.msrb.mxu3 %v6892_v49  ;;  %v5650_v1 = vadd.f32 %v518_v58, %v5547_v22  ;;  %v6897_v50 = vld [vmem:[#allocation38_spill] sm:$0xff]  ;;  %v6900_v58 = vld [vmem:[#allocation41_spill] sm:$0xff] }
  0xd5   :  { %6891 = vst [vmem:[#allocation75_spill] sm:$0xff] %v5646_v62  ;;  %1476 = vmatpush.bf16.msrb.mxu0 %v6894_v4  ;;  %1489 = vmatpush.bf16.msrb.mxu1 %v6895_v27 }
  0xd6   :  { %6893 = vst [vmem:[#allocation76_spill] sm:$0xff] %v5650_v1 }
  0xd7   :  { %1502 = vmatpush.bf16.msrb.mxu2 %v6896_v61  ;;  %1515 = vmatpush.bf16.msrb.mxu3 %v6897_v50  ;;  %v6903_v61 = vld [vmem:[#allocation42_spill] sm:$0xff] }
  0xd9   :  { %1477 = vmatpush.bf16.msrb.mxu0 %v5408_v60  ;;  %v547_v51 = vpop.f32.mrf.mxu2  ;;  %v576_v62 = vpop.f32.mrf.mxu3  ;;  %1490 = vmatpush.bf16.msrb.mxu1 %v5421_v14 }
  0xda   :  { %v5658_v40 = vadd.f32 %v547_v51, %v5567_v21  ;;  %v5660_v33 = vpop.f32.mrf.mxu0  ;;  %v5665_v1 = vadd.f32 %v576_v62, %v5572_v30  ;;  %v5667_v27 = vpop.f32.mrf.mxu1  ;;  %v5674_v51 = vperm.slane %v5535_v5, 4 }
  0xdb   :  { %6899 = vst [vmem:[#allocation78_spill] sm:$0xff] %v5660_v33  ;;  %1503 = vmatpush.bf16.msrb.mxu2 %v6900_v58  ;;  %1516 = vmatpush.bf16.msrb.mxu3 %v6903_v61  ;;  %v5678_v33 = vperm.slane %v5535_v5, 5 }
  0xdc   :  { %6898 = vst [vmem:[#allocation77_spill] sm:$0xff] %v5658_v40 }
  0xdd   :  { %6901 = vst [vmem:[#allocation79_spill] sm:$0xff] %v5665_v1  ;;  %1478 = vmatpush.bf16.msrb.mxu0 %v5453_v13  ;;  %1491 = vmatpush.bf16.msrb.mxu1 %v5457_v3 }
  0xde   :  { %6902 = vst [vmem:[#allocation80_spill] sm:$0xff] %v5667_v27 }
  0xdf   :  { %1504 = vmatpush.bf16.msrb.mxu2 %v5459_v24  ;;  %6904 = vst [vmem:[#allocation81_spill] sm:$0xff] %v5674_v51  ;;  %1517 = vmatpush.bf16.msrb.mxu3 %v5462_v47 }
  0xe0   :  { %6905 = vst [vmem:[#allocation82_spill] sm:$0xff] %v5678_v33 }
  0xe1   :  { %1479 = vmatpush.bf16.msrb.mxu0 %v5483_v55  ;;  %v5681_v62 = vpop.f32.mrf.mxu2  ;;  %v5683_v27 = vpop.f32.mrf.mxu3  ;;  %1492 = vmatpush.bf16.msrb.mxu1 %v5493_v20  ;;  %v5695_v55 = vperm.slane %v5535_v5, 6 }
  0xe2   :  { %6906 = vst [vmem:[#allocation83_spill] sm:$0xff] %v5681_v62  ;;  %v590_v40 = vpop.f32.mrf.mxu0  ;;  %v619_v24 = vpop.f32.mrf.mxu1  ;;  %v5698_v62 = vperm.slane %v5535_v5, 7 }
  0xe3   :  { %6907 = vst [vmem:[#allocation84_spill] sm:$0xff] %v5683_v27  ;;  %1505 = vmatpush.bf16.msrb.mxu2 %v5495_v31  ;;  %v5688_v1 = vadd.f32 %v590_v40, %v5674_v51  ;;  %1518 = vmatpush.bf16.msrb.mxu3 %v5499_v43  ;;  %v5692_v47 = vadd.f32 %v619_v24, %v5678_v33 }
  0xe4   :  { %6910 = vst [vmem:[#allocation87_spill] sm:$0xff] %v5695_v55 }
  0xe5   :  { %6908 = vst [vmem:[#allocation85_spill] sm:$0xff] %v5688_v1 }
  0xe6   :  { %6909 = vst [vmem:[#allocation86_spill] sm:$0xff] %v5692_v47 }
  0xe7   :  { %6911 = vst [vmem:[#allocation88_spill] sm:$0xff] %v5698_v62 }
  0xe9   :  { %v648_v27 = vpop.f32.mrf.mxu2  ;;  %v677_v31 = vpop.f32.mrf.mxu3 }
  0xea   :  { %v5701_v20 = vadd.f32 %v648_v27, %v5695_v55  ;;  %v5703_v3 = vpop.f32.mrf.mxu0  ;;  %v5706_v40 = vadd.f32 %v677_v31, %v5698_v62  ;;  %v5708_v1 = vpop.f32.mrf.mxu1 }
  0xeb   :  { %6913 = vst [vmem:[#allocation90_spill] sm:$0xff] %v5703_v3 }
  0xec   :  { %6912 = vst [vmem:[#allocation89_spill] sm:$0xff] %v5701_v20 }
  0xed   :  { %6914 = vst [vmem:[#allocation91_spill] sm:$0xff] %v5706_v40 }
  0xee   :  { %6915 = vst [vmem:[#allocation92_spill] sm:$0xff] %v5708_v1 }
  0xf1   :  { %v5710_v24 = vpop.f32.mrf.mxu2  ;;  %v5712_v47 = vpop.f32.mrf.mxu3 }
  0xf2   :  { %6916 = vst [vmem:[#allocation93_spill] sm:$0xff] %v5710_v24  ;;  %v595_v43 = vpop.f32.mrf.mxu0  ;;  %v624_v13 = vpop.f32.mrf.mxu1 }
  0xf3   :  { %6917 = vst [vmem:[#allocation94_spill] sm:$0xff] %v5712_v47  ;;  %v5715_v5 = vadd.f32 %v595_v43, %v5674_v51  ;;  %v5718_v27 = vadd.f32 %v624_v13, %v5678_v33 }
  0xf5   :  { %6918 = vst [vmem:[#allocation95_spill] sm:$0xff] %v5715_v5 }
  0xf6   :  { %6919 = vst [vmem:[#allocation96_spill] sm:$0xff] %v5718_v27 }
  0xf9   :  { %v653_v20 = vpop.f32.mrf.mxu2  ;;  %v682_v31 = vpop.f32.mrf.mxu3 }
  0xfa   :  { %v5721_v3 = vadd.f32 %v653_v20, %v5695_v55  ;;  %v5723_v40 = vpop.f32.mrf.mxu0  ;;  %v5726_v1 = vadd.f32 %v682_v31, %v5698_v62  ;;  %v5728_v24 = vpop.f32.mrf.mxu1 }
  0xfb   :  { %6921 = vst [vmem:[#allocation98_spill] sm:$0xff] %v5723_v40 }
  0xfc   :  { %6920 = vst [vmem:[#allocation97_spill] sm:$0xff] %v5721_v3 }
  0xfd   :  { %6922 = vst [vmem:[#allocation99_spill] sm:$0xff] %v5726_v1 }
  0xfe   :  { %6923 = vst [vmem:[#allocation100_spill] sm:$0xff] %v5728_v24 }
 0x101   :  { %v5730_v47 = vpop.f32.mrf.mxu2  ;;  %v5732_v43 = vpop.f32.mrf.mxu3 }
 0x102   :  { %6924 = vst [vmem:[#allocation101_spill] sm:$0xff] %v5730_v47  ;;  %v600_v5 = vpop.f32.mrf.mxu0  ;;  %v629_v27 = vpop.f32.mrf.mxu1 }
 0x103   :  { %6925 = vst [vmem:[#allocation102_spill] sm:$0xff] %v5732_v43  ;;  %v5735_v13 = vadd.f32 %v600_v5, %v5674_v51  ;;  %v5738_v20 = vadd.f32 %v629_v27, %v5678_v33 }
 0x105   :  { %6926 = vst [vmem:[#allocation103_spill] sm:$0xff] %v5735_v13 }
 0x106   :  { %6927 = vst [vmem:[#allocation104_spill] sm:$0xff] %v5738_v20 }
 0x109   :  { %v658_v3 = vpop.f32.mrf.mxu2  ;;  %v687_v31 = vpop.f32.mrf.mxu3 }
 0x10a   :  { %v5741_v40 = vadd.f32 %v658_v3, %v5695_v55  ;;  %v5743_v1 = vpop.f32.mrf.mxu0  ;;  %v5746_v24 = vadd.f32 %v687_v31, %v5698_v62  ;;  %v5748_v47 = vpop.f32.mrf.mxu1 }
 0x10b   :  { %6929 = vst [vmem:[#allocation106_spill] sm:$0xff] %v5743_v1 }
 0x10c   :  { %6928 = vst [vmem:[#allocation105_spill] sm:$0xff] %v5741_v40 }
 0x10d   :  { %6930 = vst [vmem:[#allocation107_spill] sm:$0xff] %v5746_v24 }
 0x10e   :  { %6931 = vst [vmem:[#allocation108_spill] sm:$0xff] %v5748_v47 }
 0x111   :  { %v5750_v43 = vpop.f32.mrf.mxu2  ;;  %v5752_v5 = vpop.f32.mrf.mxu3 }
 0x112   :  { %6932 = vst [vmem:[#allocation109_spill] sm:$0xff] %v5750_v43  ;;  %v605_v13 = vpop.f32.mrf.mxu0  ;;  %v634_v20 = vpop.f32.mrf.mxu1 }
 0x113   :  { %6933 = vst [vmem:[#allocation110_spill] sm:$0xff] %v5752_v5  ;;  %v5755_v27 = vadd.f32 %v605_v13, %v5674_v51  ;;  %v5758_v3 = vadd.f32 %v634_v20, %v5678_v33  ;;  %v475_v5 = vadd.f32 %v5508_v56, %v5541_v63  ;;  %v504_v13 = vadd.f32 %v5510_v32, %v5547_v22 }
 0x115   :  { %6934 = vst [vmem:[#allocation111_spill] sm:$0xff] %v5755_v27 }
 0x116   :  { %6935 = vst [vmem:[#allocation112_spill] sm:$0xff] %v5758_v3 }
 0x119   :  { %v663_v40 = vpop.f32.mrf.mxu2  ;;  %v692_v31 = vpop.f32.mrf.mxu3 }
 0x11a   :  { %v5761_v1 = vadd.f32 %v663_v40, %v5695_v55  ;;  %v607_v24 = vpop.f32.mrf.mxu0  ;;  %v5764_v47 = vadd.f32 %v692_v31, %v5698_v62  ;;  %v636_v43 = vpop.f32.mrf.mxu1  ;;  %v562_v31 = vadd.f32 %v5522_v48, %v5572_v30 }
 0x11c   :  { %6936 = vst [vmem:[#allocation113_spill] sm:$0xff] %v5761_v1 }
 0x11d   :  { %6937 = vst [vmem:[#allocation114_spill] sm:$0xff] %v5764_v47 }
 0x121   :  { %v5768_v61 = vpop.f32.mrf.mxu2  ;;  %v694_v20 = vpop.f32.mrf.mxu3 }
 0x122   :  { %v999_v3 = vpop.f32.mrf.mxu0  ;;  %v1012_v58 = vpop.f32.mrf.mxu1 }
 0x123   :  { %v1042_v27 = vadd.f32 %v999_v3, %v475_v5  ;;  %v1043_v40 = vadd.f32 %v1012_v58, %v504_v13  ;;  %v608_v58 = vadd.f32 %v607_v24, %v5674_v51 }
 0x125   :  { %v3897_v1 = vmul.f32 -1.442695, %v1042_v27  ;;  %v3898_v14 = vmul.f32 -1.442695, %v1043_v40 }
 0x127   :  { %4163 = vpow2.f32 %v3897_v1 }
 0x128   :  { %4165 = vpow2.f32 %v3898_v14  ;;  %v637_v14 = vadd.f32 %v636_v43, %v5678_v33  ;;  %v695_v43 = vadd.f32 %v694_v20, %v5698_v62 }
 0x129   :  { %v1025_v47 = vpop.f32.mrf.mxu2  ;;  %v1038_v60 = vpop.f32.mrf.mxu3 }
 0x12a   :  { %v1001_v56 = vpop.f32.mrf.mxu0  ;;  %v1045_v63 = vadd.f32 %v1038_v60, %v562_v31  ;;  %v1014_v50 = vpop.f32.mrf.mxu1  ;;  %v533_v60 = vadd.f32 %v5519_v26, %v5567_v21 }
 0x12c   :  { %v3899_v49 = vmul.f32 -1.442695, %v1045_v63  ;;  %v1044_v40 = vadd.f32 %v1025_v47, %v533_v60 }
 0x12d   :  { %v4164_v4 = vpop.eup %4163 }
 0x12e   :  { %v4166_v32 = vpop.eup %4165  ;;  %v1269_v22 = vadd.f32 1.0, %v4164_v4  ;;  %4167 = vpow2.f32 %v3899_v49 }
 0x12f   :  { %v1288_v59 = vadd.f32 1.0, %v4166_v32 }
 0x130   :  { %4169 = vrcp.f32 %v1269_v22  ;;  %vm1275_vm3 = vweird.f32 %v1269_v22 }
 0x131   :  { %4171 = vrcp.f32 %v1288_v59  ;;  %v1027_v1 = vpop.f32.mrf.mxu2  ;;  %v1040_v5 = vpop.f32.mrf.mxu3  ;;  %v1298_v60 = vand.u32 2147483647, %v1288_v59  ;;  %vm1294_vm5 = vweird.f32 %v1288_v59 }
 0x132   :  { %v1219_v48 = vpop.f32.mrf.mxu0  ;;  %v1232_v3 = vpop.f32.mrf.mxu1  ;;  %v1279_v1 = vand.u32 2147483647, %v1269_v22  ;;  %v1300_v5 = vand.u32 2147483648, %v1288_v59 }
 0x133   :  { %v1262_v27 = vadd.f32 %v1219_v48, %v608_v58  ;;  %v1263_v50 = vadd.f32 %v1232_v3, %v637_v14  ;;  %v1281_v48 = vand.u32 2147483648, %v1269_v22  ;;  %vm1299_vm9 = vcmp.eq.f32.partialorder %v1298_v60, 8.507059e+37 }
 0x134   :  { %v4168_v63 = vpop.eup %4167  ;;  %vm1280_vm6 = vcmp.eq.f32.partialorder %v1279_v1, 8.507059e+37  ;;  %v666_v60 = vadd.f32 %v5768_v61, %v5695_v55  ;;  %v6964_v55 = vld [vmem:[#allocation42_spill] sm:$0xff] }
 0x135   :  { %v3900_v13 = vmul.f32 -1.442695, %v1262_v27  ;;  %v5778_v49 = vadd.f32 1.0, %v4168_v63  ;;  %v3901_v31 = vmul.f32 -1.442695, %v1263_v50 }
 0x136   :  { %v4170_v4 = vpop.eup %4169 }
 0x137   :  { %v4172_v24 = vpop.eup %4171  ;;  %v1271_v56 = vmul.f32 %v4170_v4, %v1269_v22  ;;  %4173 = vpow2.f32 %v3900_v13  ;;  %vm1276_vm2 = vweird.f32 %v4170_v4  ;;  %vm1314_vm12 = vweird.f32 %v5778_v49 }
 0x138   :  { %v1290_v32 = vmul.f32 %v4172_v24, %v1288_v59  ;;  %4175 = vrcp.f32 %v5778_v49  ;;  %vm1295_vm4 = vweird.f32 %v4172_v24  ;;  %vm1277_vm7 = vmor %vm1275_vm3, %vm1276_vm2 }
 0x139   :  { %v1272_v58 = vsub.f32 1.0, %v1271_v56  ;;  %4177 = vpow2.f32 %v3901_v31  ;;  %v1245_v26 = vpop.f32.mrf.mxu2  ;;  %v1258_v47 = vpop.f32.mrf.mxu3  ;;  %vm1296_vm8 = vmor %vm1294_vm5, %vm1295_vm4 }
 0x13a   :  { %v1291_v14 = vsub.f32 1.0, %v1290_v32  ;;  %4179 = vtanh.f32 %v1044_v40  ;;  %v1221_v27 = vpop.f32.mrf.mxu0  ;;  %v1265_v50 = vadd.f32 %v1258_v47, %v695_v43  ;;  %v1234_v63 = vpop.f32.mrf.mxu1  ;;  %v1301_v32 = vor.u32 1.1754944e-38, %v1300_v5 }
 0x13b   :  { %v1273_v3 = vmul.f32 %v4170_v4, %v1272_v58  ;;  %v1282_v40 = vor.u32 1.1754944e-38, %v1281_v48  ;;  %v1655_v63 = vsel %vm1654_vm10, 1, %v6865_v10 }
 0x13c   :  { %v1292_v13 = vmul.f32 %v4172_v24, %v1291_v14  ;;  %v3902_v31 = vmul.f32 -1.442695, %v1265_v50  ;;  %1657 = vperm.xlu1 %4160, %v1655_v63  }
 0x13d   :  { %v4174_v33 = vpop.eup %4173  ;;  %v1274_v20 = vadd.f32 %v4170_v4, %v1273_v3 }
 0x13e   :  { %v5782_v56 = vpop.eup %4175  ;;  %v1293_v62 = vadd.f32 %v4172_v24, %v1292_v13  ;;  %v5784_v27 = vadd.f32 1.0, %v4174_v33  ;;  %4181 = vpow2.f32 %v3902_v31 }
 0x13f   :  { %v4178_v58 = vpop.eup %4177  ;;  %v1278_v51 = vsel %vm1277_vm7, %v4170_v4, %v1274_v20  ;;  %v1310_v22 = vmul.f32 %v5782_v56, %v5778_v49  ;;  %vm1315_vm11 = vweird.f32 %v5782_v56  ;;  %v1264_v20 = vadd.f32 %v1245_v26, %v666_v60 }
 0x140   :  { %v4180_v59 = vpop.eup %4179  ;;  %v1283_v43 = vsel %vm1280_vm6, %v1282_v40, %v1278_v51  ;;  %v1297_v1 = vsel %vm1296_vm8, %v4172_v24, %v1293_v62  ;;  %4183 = vrcp.f32 %v5784_v27  ;;  %v5789_v14 = vadd.f32 1.0, %v4178_v58  ;;  %vm5809_vm13 = vmor %vm1314_vm12, %vm1315_vm11 }
 0x141   :  { %v1302_v5 = vsel %vm1299_vm9, %v1301_v32, %v1297_v1  ;;  %v1325_v48 = vmul.f32 %v4180_v59, %v1283_v43  ;;  %v1247_v47 = vpop.f32.mrf.mxu2  ;;  %v1260_v4 = vpop.f32.mrf.mxu3  ;;  %v1311_v3 = vsub.f32 1.0, %v1310_v22  ;;  %v1318_v24 = vand.u32 2147483647, %v5778_v49 }
 0x142   :  { %v1324_v33 = vmul.f32 0.0, %v1302_v5  ;;  %4185 = vrcp.f32 %v5789_v14  ;;  %v1320_v32 = vand.u32 2147483648, %v5778_v49  ;;  %v1342_v1 = vand.u32 2147483647, %v5784_v27 }
 0x143   :  { %v1312_v62 = vmul.f32 %v5782_v56, %v1311_v3  ;;  %vm1319_vm15 = vcmp.eq.f32.partialorder %v1318_v24, 8.507059e+37  ;;  %v1344_v49 = vand.u32 2147483648, %v5784_v27  ;;  %v1363_v3 = vand.u32 2147483648, %v5789_v14 }
 0x144   :  { %v5794_v50 = vadd.f32 %v1325_v48, %v1324_v33  ;;  %v4182_v51 = vpop.eup %4181  ;;  %v1321_v5 = vor.u32 1.1754944e-38, %v1320_v32  ;;  %v1662_v33 = vsel %vm1661_vm14, 1, %v6865_v10  ;;  %vm1338_vm1 = vweird.f32 %v5784_v27 }
 0x145   :  { %v5801_v31 = vadd.f32 1.0, %v4182_v51  ;;  %v1313_v40 = vadd.f32 %v5782_v56, %v1312_v62  ;;  %v1361_v60 = vand.u32 2147483647, %v5789_v14  ;;  %vm1357_vm3 = vweird.f32 %v5789_v14  ;;  %1664 = vperm.xlu1 %4160, %v1662_v33   ;;  %v6940_v33 = vld [vmem:[#allocation6_spill] sm:$0xff] }
 0x146   :  { %v4184_v13 = vpop.eup %4183  ;;  %4187 = vtanh.f32 %v5794_v50  ;;  %vm1343_vm5 = vcmp.eq.f32.partialorder %v1342_v1, 8.507059e+37  ;;  %v1364_v22 = vor.u32 1.1754944e-38, %v1363_v3 }
 0x147   :  { %v1334_v61 = vmul.f32 %v4184_v13, %v5784_v27  ;;  %4189 = vrcp.f32 %v5801_v31  ;;  %v1317_v43 = vsel %vm5809_vm13, %v5782_v56, %v1313_v40  ;;  %vm1339_vm0 = vweird.f32 %v4184_v13 }
 0x148   :  { %v4186_v58 = vpop.eup %4185  ;;  %4191 = vtanh.f32 %v1264_v20  ;;  %v1322_v56 = vsel %vm1319_vm15, %v1321_v5, %v1317_v43  ;;  %vm1340_vm4 = vmor %vm1338_vm1, %vm1339_vm0  ;;  %v1345_v20 = vor.u32 1.1754944e-38, %v1344_v49  ;;  %vm1362_vm7 = vcmp.eq.f32.partialorder %v1361_v60, 8.507059e+37  ;;  %v6942_v60 = vld [vmem:[#allocation10_spill] sm:$0xff] }
 0x149   :  { %v1335_v26 = vsub.f32 1.0, %v1334_v61  ;;  %v1353_v59 = vmul.f32 %v4186_v58, %v5789_v14  ;;  %vm1358_vm2 = vweird.f32 %v4186_v58  ;;  %vm1377_vm9 = vweird.f32 %v5801_v31 }
 0x14a   :  { %vm1359_vm6 = vmor %vm1357_vm3, %vm1358_vm2  ;;  %v1381_v3 = vand.u32 2147483647, %v5801_v31 }
 0x14b   :  { %v1354_v48 = vsub.f32 1.0, %v1353_v59  ;;  %v1336_v47 = vmul.f32 %v4184_v13, %v1335_v26 }
 0x14c   :  { %v4188_v4 = vpop.eup %4187  ;;  %vm1382_vm11 = vcmp.eq.f32.partialorder %v1381_v3, 8.507059e+37  ;;  %v6958_v3 = vld [vmem:[#allocation36_spill] sm:$0xff] }
 0x14d   :  { %v1355_v51 = vmul.f32 %v4186_v58, %v1354_v48  ;;  %v1337_v62 = vadd.f32 %v4184_v13, %v1336_v47  ;;  %v5824_v24 = vmul.f32 %v4188_v4, %v1322_v56  ;;  %v4190_v63 = vpop.eup %4189  ;;  %v1383_v47 = vand.u32 2147483648, %v5801_v31  ;;  %v6941_v4 = vld [vmem:[#allocation7_spill] sm:$0xff]  ;;  %v6943_v56 = vld [vmem:[#allocation8_spill] sm:$0xff] }
 0x14e   :  { %v4192_v40 = vpop.eup %4191  ;;  %v1373_v59 = vmul.f32 %v4190_v63, %v5801_v31  ;;  %vm1378_vm8 = vweird.f32 %v4190_v63 }
 0x14f   :  { %v1341_v32 = vsel %vm1340_vm4, %v4184_v13, %v1337_v62  ;;  %v1356_v61 = vadd.f32 %v4186_v58, %v1355_v51  ;;  %v1410_v27 = vpack.c.bf16 %v5824_v24, %v5824_v24  ;;  %vm1379_vm10 = vmor %vm1377_vm9, %vm1378_vm8  ;;  %v1384_v62 = vor.u32 1.1754944e-38, %v1383_v47  ;;  %v6957_v47 = vld [vmem:[#allocation35_spill] sm:$0xff] }
 0x150   :  { %v1346_v26 = vsel %vm1343_vm5, %v1345_v20, %v1341_v32  ;;  %v1374_v13 = vsub.f32 1.0, %v1373_v59  ;;  %v6944_v20 = vld [vmem:[#allocation9_spill] sm:$0xff]  ;;  %v6945_v32 = vld [vmem:[#allocation11_spill] sm:$0xff]  ;;  %vm1916_vm4 = vcmp.eq.s32.totalorder %v5577_v16, 2 }
 0x151   :  { %v1360_v43 = vsel %vm1359_vm6, %v4186_v58, %v1356_v61  ;;  %v1388_v5 = vmul.f32 %v4192_v40, %v1346_v26  ;;  %1419 = vmatmul.bf16.vlgmr.msra.gmra.mxu0 %v1410_v27  ;;  %1432 = vmatmul.bf16.vlgmr.msra.gmra.mxu1 %v1410_v27  ;;  %v6948_v26 = vld [vmem:[#allocation14_spill] sm:$0xff]  ;;  %v6949_v59 = vld [vmem:[#allocation15_spill] sm:$0xff] }
 0x152   :  { %v1365_v14 = vsel %vm1362_vm7, %v1364_v22, %v1360_v43  ;;  %1445 = vmatmul.bf16.vlgmr.msra.gmra.mxu2 %v1410_v27  ;;  %1458 = vmatmul.bf16.vlgmr.msra.gmra.mxu3 %v1410_v27  ;;  %v1375_v49 = vmul.f32 %v4190_v63, %v1374_v13  ;;  %v6947_v22 = vld [vmem:[#allocation13_spill] sm:$0xff]  ;;  %v6950_v43 = vld [vmem:[#allocation28_spill] sm:$0xff]  ;;  %v6953_v13 = vld [vmem:[#allocation31_spill] sm:$0xff] }
 0x153   :  { %v1387_v1 = vmul.f32 0.0, %v1365_v14  ;;  %1673 = vmatpush.bf16.msra.mxu0 %v4913_v7  ;;  %1686 = vmatpush.bf16.msra.mxu1 %v4924_v11  ;;  %v6952_v14 = vld [vmem:[#allocation30_spill] sm:$0xff] }
 0x154   :  { %1699 = vmatpush.bf16.msra.mxu2 %v4961_v25  ;;  %1712 = vmatpush.bf16.msra.mxu3 %v4926_v12  ;;  %v1376_v58 = vadd.f32 %v4190_v63, %v1375_v49  ;;  %v6955_v49 = vld [vmem:[#allocation33_spill] sm:$0xff] }
 0x155   :  { %v5834_v48 = vadd.f32 %v1388_v5, %v1387_v1  ;;  %v6951_v5 = vld [vmem:[#allocation29_spill] sm:$0xff]  ;;  %v6954_v1 = vld [vmem:[#allocation32_spill] sm:$0xff] }
 0x156   :  { %v1380_v51 = vsel %vm1379_vm10, %v4190_v63, %v1376_v58  ;;  %v6946_v63 = vld [vmem:[#allocation12_spill] sm:$0xff]  ;;  %v6956_v58 = vld [vmem:[#allocation34_spill] sm:$0xff]  ;;  %vm1923_vm10 = vcmp.eq.s32.totalorder %v5577_v16, 5 }
 0x157   :  { %4193 = vtanh.f32 %v5834_v48  ;;  %1674 = vmatpush.bf16.msra.mxu0 %v6940_v33  ;;  %1687 = vmatpush.bf16.msra.mxu1 %v6941_v4  ;;  %v1385_v27 = vsel %vm1382_vm11, %v1384_v62, %v1380_v51  ;;  %v6959_v51 = vld [vmem:[#allocation37_spill] sm:$0xff]  ;;  %v6960_v62 = vld [vmem:[#allocation38_spill] sm:$0xff] }
 0x158   :  { %1700 = vmatpush.bf16.msra.mxu2 %v6942_v60  ;;  %1713 = vmatpush.bf16.msra.mxu3 %v6943_v56 }
 0x15b   :  { %1675 = vmatpush.bf16.msra.mxu0 %v6944_v20  ;;  %1688 = vmatpush.bf16.msra.mxu1 %v4996_v34 }
 0x15c   :  { %1701 = vmatpush.bf16.msra.mxu2 %v6945_v32  ;;  %1714 = vmatpush.bf16.msra.mxu3 %v4998_v36 }
 0x15d   :  { %v4194_v61 = vpop.eup %4193 }
 0x15e   :  { %v5848_v40 = vmul.f32 %v4194_v61, %v1385_v27  ;;  %v6961_v61 = vld [vmem:[#allocation39_spill] sm:$0xff]  ;;  %v6962_v27 = vld [vmem:[#allocation40_spill] sm:$0xff] }
 0x15f   :  { %1676 = vmatpush.bf16.msra.mxu0 %v5023_v44  ;;  %1689 = vmatpush.bf16.msra.mxu1 %v5025_v45 }
 0x160   :  { %v1471_v31 = vpack.c.bf16 %v5848_v40, %v5848_v40  ;;  %1702 = vmatpush.bf16.msra.mxu2 %v5055_v54  ;;  %1715 = vmatpush.bf16.msra.mxu3 %v6946_v63 }
 0x162   :  { %1480 = vmatmul.bf16.vlgmr.msrb.gmra.mxu0 %v1471_v31  ;;  %1493 = vmatmul.bf16.vlgmr.msrb.gmra.mxu1 %v1471_v31 }
 0x163   :  { %1506 = vmatmul.bf16.vlgmr.msrb.gmra.mxu2 %v1471_v31  ;;  %1519 = vmatmul.bf16.vlgmr.msrb.gmra.mxu3 %v1471_v31  ;;  %v6963_v31 = vld [vmem:[#allocation41_spill] sm:$0xff] }
 0x164   :  { %1677 = vmatpush.bf16.msra.mxu0 %v6947_v22  ;;  %1690 = vmatpush.bf16.msra.mxu1 %v6948_v26 }
 0x165   :  { %1703 = vmatpush.bf16.msra.mxu2 %v6949_v59  ;;  %1716 = vmatpush.bf16.msra.mxu3 %v5095_v2 }
 0x168   :  { %1678 = vmatpush.bf16.msra.mxu0 %v5108_v8  ;;  %1691 = vmatpush.bf16.msra.mxu1 %v5110_v9 }
 0x169   :  { %1704 = vmatpush.bf16.msra.mxu2 %v5122_v15  ;;  %1717 = vmatpush.bf16.msra.mxu3 %v5133_v23 }
 0x16c   :  { %1679 = vmatpush.bf16.msra.mxu0 %v5145_v29  ;;  %1692 = vmatpush.bf16.msra.mxu1 %v5158_v37 }
 0x16d   :  { %1705 = vmatpush.bf16.msra.mxu2 %v5160_v38  ;;  %1718 = vmatpush.bf16.msra.mxu3 %v5163_v39 }
 0x170   :  { %1680 = vmatpush.bf16.msra.mxu0 %v5179_v46  ;;  %1693 = vmatpush.bf16.msra.mxu1 %v5192_v52 }
 0x171   :  { %1706 = vmatpush.bf16.msra.mxu2 %v5194_v53  ;;  %1719 = vmatpush.bf16.msra.mxu3 %v5207_v35 }
 0x174   :  { %1734 = vmatpush.bf16.msrb.mxu0 %v5220_v19  ;;  %1747 = vmatpush.bf16.msrb.mxu1 %v5222_v0 }
 0x175   :  { %1760 = vmatpush.bf16.msrb.mxu2 %v5234_v6  ;;  %1773 = vmatpush.bf16.msrb.mxu3 %v5247_v17 }
 0x178   :  { %1735 = vmatpush.bf16.msrb.mxu0 %v5249_v18  ;;  %1748 = vmatpush.bf16.msrb.mxu1 %v5261_v28 }
 0x179   :  { %1761 = vmatpush.bf16.msrb.mxu2 %v5273_v41  ;;  %1774 = vmatpush.bf16.msrb.mxu3 %v5275_v42 }
 0x17c   :  { %1736 = vmatpush.bf16.msrb.mxu0 %v5297_v57  ;;  %1749 = vmatpush.bf16.msrb.mxu1 %v6950_v43 }
 0x17d   :  { %1762 = vmatpush.bf16.msrb.mxu2 %v6951_v5  ;;  %1775 = vmatpush.bf16.msrb.mxu3 %v6952_v14  ;;  %v6976_v14 = vld [vmem:[#allocation52_spill] sm:$0xff] }
 0x180   :  { %1737 = vmatpush.bf16.msrb.mxu0 %v6953_v13  ;;  %1750 = vmatpush.bf16.msrb.mxu1 %v6954_v1  ;;  %v6965_v1 = vld [vmem:[#allocation43_spill] sm:$0xff] }
 0x181   :  { %1763 = vmatpush.bf16.msrb.mxu2 %v6955_v49  ;;  %1776 = vmatpush.bf16.msrb.mxu3 %v6956_v58  ;;  %v6966_v49 = vld [vmem:[#allocation44_spill] sm:$0xff]  ;;  %v6967_v58 = vld [vmem:[#allocation45_spill] sm:$0xff] }
 0x184   :  { %1738 = vmatpush.bf16.msrb.mxu0 %v6957_v47  ;;  %1751 = vmatpush.bf16.msrb.mxu1 %v6958_v3  ;;  %v6968_v47 = vld [vmem:[#allocation46_spill] sm:$0xff]  ;;  %v6969_v3 = vld [vmem:[#allocation47_spill] sm:$0xff] }
 0x185   :  { %1764 = vmatpush.bf16.msrb.mxu2 %v6959_v51  ;;  %1777 = vmatpush.bf16.msrb.mxu3 %v6960_v62  ;;  %v6970_v51 = vld [vmem:[#allocation48_spill] sm:$0xff]  ;;  %v6971_v62 = vld [vmem:[#allocation49_spill] sm:$0xff] }
 0x188   :  { %1739 = vmatpush.bf16.msrb.mxu0 %v6961_v61  ;;  %1752 = vmatpush.bf16.msrb.mxu1 %v6962_v27  ;;  %v6972_v61 = vld [vmem:[#allocation50_spill] sm:$0xff]  ;;  %v6973_v27 = vld [vmem:[#allocation53_spill] sm:$0xff] }
 0x189   :  { %1765 = vmatpush.bf16.msrb.mxu2 %v6963_v31  ;;  %1778 = vmatpush.bf16.msrb.mxu3 %v6964_v55  ;;  %v6974_v31 = vld [vmem:[#allocation51_spill] sm:$0xff] }
 0x18a   :  { %v477_v13 = vadd.f32 %v6974_v31, %v6973_v27  ;;  %v6975_v55 = vld [vmem:[#allocation55_spill] sm:$0xff] }
 0x18c   :  { %1740 = vmatpush.bf16.msrb.mxu0 %v6965_v1  ;;  %1753 = vmatpush.bf16.msrb.mxu1 %v6966_v49  ;;  %v506_v1 = vadd.f32 %v6976_v14, %v6975_v55 }
 0x18d   :  { %1766 = vmatpush.bf16.msrb.mxu2 %v6967_v58  ;;  %1779 = vmatpush.bf16.msrb.mxu3 %v6968_v47 }
 0x190   :  { %1741 = vmatpush.bf16.msrb.mxu0 %v6969_v3  ;;  %1754 = vmatpush.bf16.msrb.mxu1 %v6970_v51  ;;  %v6977_v3 = vld [vmem:[#allocation56_spill] sm:$0xff] }
 0x191   :  { %1767 = vmatpush.bf16.msrb.mxu2 %v6971_v62  ;;  %1780 = vmatpush.bf16.msrb.mxu3 %v6972_v61  ;;  %v564_v51 = vadd.f32 %v6977_v3, %v5572_v30 }
 0x1ce   :  { %v1420_v5 = vpop.f32.mrf.mxu0  ;;  %v1433_v49 = vpop.f32.mrf.mxu1 }
 0x1cf   :  { %v1463_v43 = vadd.f32 %v1420_v5, %v477_v13  ;;  %v1464_v58 = vadd.f32 %v1433_v49, %v506_v1  ;;  %v6978_v49 = vld [vmem:[#allocation54_spill] sm:$0xff] }
 0x1d1   :  { %v3903_v57 = vmul.f32 -1.442695, %v1463_v43  ;;  %v3904_v47 = vmul.f32 -1.442695, %v1464_v58  ;;  %v535_v58 = vadd.f32 %v6978_v49, %v5567_v21 }
 0x1d3   :  { %4195 = vpow2.f32 %v3903_v57 }
 0x1d4   :  { %4197 = vpow2.f32 %v3904_v47  ;;  %v6979_v47 = vld [vmem:[#allocation111_spill] sm:$0xff] }
 0x1d5   :  { %v1446_v62 = vpop.f32.mrf.mxu2  ;;  %v1459_v42 = vpop.f32.mrf.mxu3 }
 0x1d6   :  { %v1466_v61 = vadd.f32 %v1459_v42, %v564_v51  ;;  %v1422_v41 = vpop.f32.mrf.mxu0  ;;  %v1435_v28 = vpop.f32.mrf.mxu1 }
 0x1d7   :  { %v6980_v41 = vld [vmem:[#allocation112_spill] sm:$0xff] }
 0x1d8   :  { %v3905_v31 = vmul.f32 -1.442695, %v1466_v61  ;;  %v1465_v61 = vadd.f32 %v1446_v62, %v535_v58  ;;  %v6981_v58 = vld [vmem:[#allocation114_spill] sm:$0xff] }
 0x1d9   :  { %v4196_v27 = vpop.eup %4195 }
 0x1da   :  { %v4198_v18 = vpop.eup %4197  ;;  %v1531_v14 = vadd.f32 1.0, %v4196_v27  ;;  %4199 = vpow2.f32 %v3905_v31 }
 0x1db   :  { %v1550_v55 = vadd.f32 1.0, %v4198_v18 }
 0x1dc   :  { %4201 = vrcp.f32 %v1531_v14  ;;  %v1541_v17 = vand.u32 2147483647, %v1531_v14  ;;  %vm1537_vm14 = vweird.f32 %v1531_v14 }
 0x1dd   :  { %4203 = vrcp.f32 %v1550_v55  ;;  %v1448_v43 = vpop.f32.mrf.mxu2  ;;  %v1461_v5 = vpop.f32.mrf.mxu3  ;;  %v1562_v21 = vand.u32 2147483648, %v1550_v55  ;;  %v1560_v62 = vand.u32 2147483647, %v1550_v55  ;;  %vm1556_vm15 = vweird.f32 %v1550_v55 }
 0x1de   :  { %vm1542_vm0 = vcmp.eq.f32.partialorder %v1541_v17, 8.507059e+37 }
 0x1df   :  { %v1481_v57 = vpop.f32.mrf.mxu0  ;;  %v1494_v13 = vpop.f32.mrf.mxu1  ;;  %vm1561_vm3 = vcmp.eq.f32.partialorder %v1560_v62, 8.507059e+37 }
 0x1e0   :  { %v4200_v1 = vpop.eup %4199  ;;  %v1524_v42 = vadd.f32 %v1481_v57, %v6979_v47  ;;  %v1525_v28 = vadd.f32 %v1494_v13, %v6980_v41  ;;  %v1543_v57 = vand.u32 2147483648, %v1531_v14 }
 0x1e1   :  { %v5914_v3 = vadd.f32 1.0, %v4200_v1 }
 0x1e2   :  { %v4202_v51 = vpop.eup %4201  ;;  %v3906_v27 = vmul.f32 -1.442695, %v1524_v42  ;;  %v3907_v18 = vmul.f32 -1.442695, %v1525_v28 }
 0x1e3   :  { %v4204_v31 = vpop.eup %4203  ;;  %v1533_v30 = vmul.f32 %v4202_v51, %v1531_v14  ;;  %4205 = vrcp.f32 %v5914_v3  ;;  %vm1538_vm12 = vweird.f32 %v4202_v51  ;;  %vm1576_vm7 = vweird.f32 %v5914_v3 }
 0x1e4   :  { %v1552_v43 = vmul.f32 %v4204_v31, %v1550_v55  ;;  %4207 = vpow2.f32 %v3906_v27  ;;  %vm1557_vm13 = vweird.f32 %v4204_v31  ;;  %vm1539_vm1 = vmor %vm1537_vm14, %vm1538_vm12 }
 0x1e5   :  { %v1534_v5 = vsub.f32 1.0, %v1533_v30  ;;  %4209 = vpow2.f32 %v3907_v18  ;;  %vm1558_vm2 = vmor %vm1556_vm15, %vm1557_vm13 }
 0x1e6   :  { %v1553_v49 = vsub.f32 1.0, %v1552_v43  ;;  %4211 = vtanh.f32 %v1465_v61  ;;  %v1507_v13 = vpop.f32.mrf.mxu2  ;;  %v1520_v1 = vpop.f32.mrf.mxu3  ;;  %v1563_v61 = vor.u32 1.1754944e-38, %v1562_v21 }
 0x1e7   :  { %v1535_v47 = vmul.f32 %v4202_v51, %v1534_v5  ;;  %v1527_v42 = vadd.f32 %v1520_v1, %v6981_v58  ;;  %v1483_v41 = vpop.f32.mrf.mxu0  ;;  %v1496_v28 = vpop.f32.mrf.mxu1  ;;  %v1544_v5 = vor.u32 1.1754944e-38, %v1543_v57 }
 0x1e8   :  { %v1554_v6 = vmul.f32 %v4204_v31, %v1553_v49  ;;  %v5927_v21 = vpop.permute.xlu0 %1395 }
 0x1e9   :  { %v5918_v27 = vpop.eup %4205  ;;  %v1536_v30 = vadd.f32 %v4202_v51, %v1535_v47  ;;  %v3908_v18 = vmul.f32 -1.442695, %v1527_v42  ;;  %6982 = vst [vmem:[#allocation6_spill] sm:$0xff] %v5927_v21  ;;  %vm1397_vm5 = vcmp.eq.s32.totalorder %v5927_v21, 1  ;;  %v7011_v21 = vld [vmem:[#allocation42_spill] sm:$0xff] }
 0x1ea   :  { %v4208_v43 = vpop.eup %4207  ;;  %v1555_v0 = vadd.f32 %v4204_v31, %v1554_v6  ;;  %v1572_v1 = vmul.f32 %v5918_v27, %v5914_v3  ;;  %vm1577_vm6 = vweird.f32 %v5918_v27 }
 0x1eb   :  { %v4210_v58 = vpop.eup %4209  ;;  %v1540_v49 = vsel %vm1539_vm1, %v4202_v51, %v1536_v30  ;;  %v5923_v14 = vadd.f32 1.0, %v4208_v43  ;;  %4213 = vpow2.f32 %v3908_v18  ;;  %v1580_v43 = vand.u32 2147483647, %v5914_v3  ;;  %vm5956_vm8 = vmor %vm1576_vm7, %vm1577_vm6 }
 0x1ec   :  { %v4212_v55 = vpop.eup %4211  ;;  %v1545_v47 = vsel %vm1542_vm0, %v1544_v5, %v1540_v49  ;;  %v1559_v17 = vsel %vm1558_vm2, %v4204_v31, %v1555_v0  ;;  %v1573_v42 = vsub.f32 1.0, %v1572_v1  ;;  %v5925_v41 = vadd.f32 1.0, %v4210_v58  ;;  %v6984_v49 = vld [vmem:[#allocation113_spill] sm:$0xff] }
 0x1ed   :  { %v1564_v57 = vsel %vm1561_vm3, %v1563_v61, %v1559_v17  ;;  %v1587_v6 = vmul.f32 %v4212_v55, %v1545_v47  ;;  %4215 = vrcp.f32 %v5923_v14  ;;  %v5943_v61 = vpop.permute.xlu1 %1657  ;;  %v1582_v5 = vand.u32 2147483648, %v5914_v3 }
 0x1ee   :  { %v1586_v28 = vmul.f32 %v1564_v57, %v5794_v50  ;;  %4217 = vrcp.f32 %v5925_v41  ;;  %v1509_v51 = vpop.f32.mrf.mxu2  ;;  %v1522_v62 = vpop.f32.mrf.mxu3  ;;  %v1574_v30 = vmul.f32 %v5918_v27, %v1573_v42  ;;  %6983 = vst [vmem:[#allocation7_spill] sm:$0xff] %v5943_v61  ;;  %v1917_v1 = vsel %vm1916_vm4, 1, %v6865_v10 }
 0x1ef   :  { %v1526_v55 = vadd.f32 %v1507_v13, %v6984_v49  ;;  %1919 = vperm.xlu2 %4161, %v1917_v1   ;;  %v1398_v17 = vsel %vm1397_vm5, %v5824_v24, 0.0  ;;  %vm1659_vm9 = vcmp.eq.s32.totalorder %v5943_v61, 1  ;;  %vm1581_vm11 = vcmp.eq.f32.partialorder %v1580_v43, 8.507059e+37  ;;  %v7013_v61 = vld [vmem:[#allocation44_spill] sm:$0xff] }
 0x1f0   :  { %v5933_v18 = vadd.f32 %v1587_v6, %v1586_v28  ;;  %v1575_v31 = vadd.f32 %v5918_v27, %v1574_v30  ;;  %v1606_v6 = vand.u32 2147483648, %v5923_v14  ;;  %v1583_v28 = vor.u32 1.1754944e-38, %v1582_v5 }
 0x1f1   :  { %v4214_v0 = vpop.eup %4213  ;;  %v1625_v62 = vand.u32 2147483648, %v5925_v41  ;;  %v1604_v30 = vand.u32 2147483647, %v5923_v14  ;;  %v1623_v16 = vand.u32 2147483647, %v5925_v41  ;;  %vm1619_vm14 = vweird.f32 %v5925_v41 }
 0x1f2   :  { %4219 = vtanh.f32 %v5933_v18  ;;  %v5941_v50 = vadd.f32 1.0, %v4214_v0  ;;  %v1579_v3 = vsel %vm5956_vm8, %v5918_v27, %v1575_v31  ;;  %v1924_v27 = vsel %vm1923_vm10, 1, %v6865_v10 }
 0x1f3   :  { %v4216_v58 = vpop.eup %4215  ;;  %v1584_v49 = vsel %vm1581_vm11, %v1583_v28, %v1579_v3  ;;  %vm1600_vm15 = vweird.f32 %v5923_v14  ;;  %v1607_v5 = vor.u32 1.1754944e-38, %v1606_v6  ;;  %v1626_v28 = vor.u32 1.1754944e-38, %v1625_v62 }
 0x1f4   :  { %v4218_v47 = vpop.eup %4217  ;;  %v1596_v42 = vmul.f32 %v4216_v58, %v5923_v14  ;;  %4221 = vrcp.f32 %v5941_v50  ;;  %vm1601_vm12 = vweird.f32 %v4216_v58  ;;  %vm1605_vm2 = vcmp.eq.f32.partialorder %v1604_v30, 8.507059e+37  ;;  %v5993_v30 = vpop.permute.xlu0 %1402 }
 0x1f5   :  { %v1615_v13 = vmul.f32 %v4218_v47, %v5925_v41  ;;  %4223 = vtanh.f32 %v1526_v55  ;;  %vm1620_vm13 = vweird.f32 %v4218_v47  ;;  %vm1602_vm0 = vmor %vm1600_vm15, %vm1601_vm12  ;;  %vm1624_vm3 = vcmp.eq.f32.partialorder %v1623_v16, 8.507059e+37  ;;  %6987 = vst [vmem:[#allocation10_spill] sm:$0xff] %v5993_v30 }
 0x1f6   :  { %v1597_v24 = vsub.f32 1.0, %v1596_v42  ;;  %vm1621_vm1 = vmor %vm1619_vm14, %vm1620_vm13  ;;  %v1645_v62 = vand.u32 2147483648, %v5941_v50  ;;  %vm1639_vm6 = vweird.f32 %v5941_v50  ;;  %vm1404_vm8 = vcmp.eq.s32.totalorder %v5993_v30, 1  ;;  %v7012_v30 = vld [vmem:[#allocation43_spill] sm:$0xff] }
 0x1f7   :  { %v1616_v51 = vsub.f32 1.0, %v1615_v13  ;;  %1926 = vperm.xlu2 %4161, %v1924_v27   ;;  %v5995_v27 = vpop.permute.xlu1 %1664 }
 0x1f8   :  { %v4220_v0 = vpop.eup %4219  ;;  %v1598_v1 = vmul.f32 %v4216_v58, %v1597_v24  ;;  %6988 = vst [vmem:[#allocation8_spill] sm:$0xff] %v5995_v27  ;;  %vm1666_vm11 = vcmp.eq.s32.totalorder %v5995_v27, 1  ;;  %v7014_v27 = vld [vmem:[#allocation45_spill] sm:$0xff] }
 0x1f9   :  { %v1617_v31 = vmul.f32 %v4218_v47, %v1616_v51  ;;  %v1590_v42 = vmul.f32 %v4220_v0, %v1584_v49 }
 0x1fa   :  { %v4222_v57 = vpop.eup %4221  ;;  %v1599_v43 = vadd.f32 %v4216_v58, %v1598_v1 }
 0x1fb   :  { %v1618_v55 = vadd.f32 %v4218_v47, %v1617_v31  ;;  %v1635_v13 = vmul.f32 %v4222_v57, %v5941_v50  ;;  %v5976_v3 = vsel %vm1659_vm9, %v1590_v42, %v1398_v17  ;;  %v1672_v24 = vpack.c.bf16 %v1590_v42, %v1590_v42  ;;  %v4224_v0 = vpop.eup %4223 }
 0x1fc   :  { %v1603_v51 = vsel %vm1602_vm0, %v4216_v58, %v1599_v43  ;;  %vm1640_vm4 = vweird.f32 %v4222_v57  ;;  %v1646_v42 = vor.u32 1.1754944e-38, %v1645_v62  ;;  %v7002_v62 = vld [vmem:[#allocation33_spill] sm:$0xff] }
 0x1fd   :  { %v1608_v41 = vsel %vm1605_vm2, %v1607_v5, %v1603_v51  ;;  %v1622_v1 = vsel %vm1621_vm1, %v4218_v47, %v1618_v55  ;;  %v1636_v14 = vsub.f32 1.0, %v1635_v13  ;;  %1681 = vmatmul.bf16.vlgmr.msra.gmra.mxu0 %v1672_v24  ;;  %1694 = vmatmul.bf16.vlgmr.msra.gmra.mxu1 %v1672_v24  ;;  %vm1641_vm7 = vmor %vm1639_vm6, %vm1640_vm4  ;;  %v6992_v51 = vld [vmem:[#allocation23_spill] sm:$0xff] }
 0x1fe   :  { %v1627_v6 = vsel %vm1624_vm3, %v1626_v28, %v1622_v1  ;;  %v1650_v49 = vmul.f32 %v4224_v0, %v1608_v41  ;;  %1707 = vmatmul.bf16.vlgmr.msra.gmra.mxu2 %v1672_v24  ;;  %1720 = vmatmul.bf16.vlgmr.msra.gmra.mxu3 %v1672_v24  ;;  %v6990_v24 = vld [vmem:[#allocation21_spill] sm:$0xff]  ;;  %v6991_v28 = vld [vmem:[#allocation22_spill] sm:$0xff]  ;;  %v6993_v0 = vld [vmem:[#allocation24_spill] sm:$0xff] }
 0x1ff   :  { %v1649_v17 = vmul.f32 %v1627_v6, %v5834_v48  ;;  %v1637_v31 = vmul.f32 %v4222_v57, %v1636_v14  ;;  %1935 = vmatpush.bf16.msra.mxu0 %v4913_v7  ;;  %1948 = vmatpush.bf16.msra.mxu1 %v4924_v11  ;;  %v1643_v48 = vand.u32 2147483647, %v5941_v50  ;;  %v6994_v41 = vld [vmem:[#allocation25_spill] sm:$0xff]  ;;  %v6995_v1 = vld [vmem:[#allocation26_spill] sm:$0xff]  ;;  %v6996_v14 = vld [vmem:[#allocation27_spill] sm:$0xff] }
 0x200   :  { %1961 = vmatpush.bf16.msra.mxu2 %v4961_v25  ;;  %1974 = vmatpush.bf16.msra.mxu3 %v4926_v12  ;;  %v6997_v6 = vld [vmem:[#allocation28_spill] sm:$0xff] }
 0x201   :  { %v5983_v58 = vadd.f32 %v1650_v49, %v1649_v17  ;;  %v1638_v47 = vadd.f32 %v4222_v57, %v1637_v31  ;;  %vm1644_vm10 = vcmp.eq.f32.partialorder %v1643_v48, 8.507059e+37  ;;  %v6998_v49 = vld [vmem:[#allocation29_spill] sm:$0xff]  ;;  %v6999_v17 = vld [vmem:[#allocation30_spill] sm:$0xff]  ;;  %v7000_v31 = vld [vmem:[#allocation31_spill] sm:$0xff] }
 0x202   :  { %v7003_v48 = vld [vmem:[#allocation34_spill] sm:$0xff] }
 0x203   :  { %4225 = vtanh.f32 %v5983_v58  ;;  %1936 = vmatpush.bf16.msra.mxu0 %v6940_v33  ;;  %1949 = vmatpush.bf16.msra.mxu1 %v6941_v4  ;;  %v1642_v16 = vsel %vm1641_vm7, %v4222_v57, %v1638_v47  ;;  %v1405_v57 = vsel %vm1404_vm8, %v5848_v40, 0.0  ;;  %v6989_v40 = vld [vmem:[#allocation20_spill] sm:$0xff] }
 0x204   :  { %1962 = vmatpush.bf16.msra.mxu2 %v6942_v60  ;;  %1975 = vmatpush.bf16.msra.mxu3 %v6943_v56  ;;  %v1647_v43 = vsel %vm1644_vm10, %v1646_v42, %v1642_v16  ;;  %v7001_v47 = vld [vmem:[#allocation32_spill] sm:$0xff]  ;;  %v7004_v16 = vld [vmem:[#allocation35_spill] sm:$0xff] }
 0x205   :  { %v7005_v42 = vld [vmem:[#allocation36_spill] sm:$0xff] }
 0x207   :  { %1937 = vmatpush.bf16.msra.mxu0 %v6944_v20  ;;  %1950 = vmatpush.bf16.msra.mxu1 %v4996_v34 }
 0x208   :  { %1963 = vmatpush.bf16.msra.mxu2 %v6945_v32  ;;  %1976 = vmatpush.bf16.msra.mxu3 %v4998_v36 }
 0x209   :  { %v4226_v50 = vpop.eup %4225 }
 0x20a   :  { %v1653_v5 = vmul.f32 %v4226_v50, %v1647_v43  ;;  %v7006_v50 = vld [vmem:[#allocation37_spill] sm:$0xff]  ;;  %v7007_v43 = vld [vmem:[#allocation38_spill] sm:$0xff] }
 0x20b   :  { %1938 = vmatpush.bf16.msra.mxu0 %v5023_v44  ;;  %1951 = vmatpush.bf16.msra.mxu1 %v5025_v45 }
 0x20c   :  { %v6010_v55 = vsel %vm1666_vm11, %v1653_v5, %v1405_v57  ;;  %v1733_v13 = vpack.c.bf16 %v1653_v5, %v1653_v5  ;;  %1964 = vmatpush.bf16.msra.mxu2 %v5055_v54  ;;  %1977 = vmatpush.bf16.msra.mxu3 %v6946_v63  ;;  %v7008_v5 = vld [vmem:[#allocation39_spill] sm:$0xff]  ;;  %v7009_v57 = vld [vmem:[#allocation40_spill] sm:$0xff] }
 0x20e   :  { %1742 = vmatmul.bf16.vlgmr.msrb.gmra.mxu0 %v1733_v13  ;;  %1755 = vmatmul.bf16.vlgmr.msrb.gmra.mxu1 %v1733_v13 }
 0x20f   :  { %1768 = vmatmul.bf16.vlgmr.msrb.gmra.mxu2 %v1733_v13  ;;  %1781 = vmatmul.bf16.vlgmr.msrb.gmra.mxu3 %v1733_v13  ;;  %v7010_v13 = vld [vmem:[#allocation41_spill] sm:$0xff] }
 0x210   :  { %1939 = vmatpush.bf16.msra.mxu0 %v6947_v22  ;;  %1952 = vmatpush.bf16.msra.mxu1 %v6948_v26 }
 0x211   :  { %1965 = vmatpush.bf16.msra.mxu2 %v6949_v59  ;;  %1978 = vmatpush.bf16.msra.mxu3 %v5095_v2 }
 0x214   :  { %1940 = vmatpush.bf16.msra.mxu0 %v5108_v8  ;;  %1953 = vmatpush.bf16.msra.mxu1 %v5110_v9 }
 0x215   :  { %1966 = vmatpush.bf16.msra.mxu2 %v5122_v15  ;;  %1979 = vmatpush.bf16.msra.mxu3 %v5133_v23 }
 0x218   :  { %1941 = vmatpush.bf16.msra.mxu0 %v5145_v29  ;;  %1954 = vmatpush.bf16.msra.mxu1 %v5158_v37 }
 0x219   :  { %1967 = vmatpush.bf16.msra.mxu2 %v5160_v38  ;;  %1980 = vmatpush.bf16.msra.mxu3 %v5163_v39 }
 0x21c   :  { %1942 = vmatpush.bf16.msra.mxu0 %v5179_v46  ;;  %1955 = vmatpush.bf16.msra.mxu1 %v5192_v52 }
 0x21d   :  { %1968 = vmatpush.bf16.msra.mxu2 %v5194_v53  ;;  %1981 = vmatpush.bf16.msra.mxu3 %v5207_v35 }
 0x220   :  { %1996 = vmatpush.bf16.msrb.mxu0 %v5220_v19  ;;  %2009 = vmatpush.bf16.msrb.mxu1 %v6989_v40 }
 0x221   :  { %2022 = vmatpush.bf16.msrb.mxu2 %v6990_v24  ;;  %2035 = vmatpush.bf16.msrb.mxu3 %v6991_v28 }
 0x224   :  { %1997 = vmatpush.bf16.msrb.mxu0 %v6992_v51  ;;  %2010 = vmatpush.bf16.msrb.mxu1 %v6993_v0 }
 0x225   :  { %2023 = vmatpush.bf16.msrb.mxu2 %v6994_v41  ;;  %2036 = vmatpush.bf16.msrb.mxu3 %v6995_v1 }
 0x228   :  { %1998 = vmatpush.bf16.msrb.mxu0 %v6996_v14  ;;  %2011 = vmatpush.bf16.msrb.mxu1 %v6997_v6 }
 0x229   :  { %2024 = vmatpush.bf16.msrb.mxu2 %v6998_v49  ;;  %2037 = vmatpush.bf16.msrb.mxu3 %v6999_v17 }
 0x22c   :  { %1999 = vmatpush.bf16.msrb.mxu0 %v7000_v31  ;;  %2012 = vmatpush.bf16.msrb.mxu1 %v7001_v47  ;;  %v7022_v31 = vld [vmem:[#allocation63_spill] sm:$0xff] }
 0x22d   :  { %2025 = vmatpush.bf16.msrb.mxu2 %v7002_v62  ;;  %2038 = vmatpush.bf16.msrb.mxu3 %v7003_v48  ;;  %v7020_v48 = vld [vmem:[#allocation57_spill] sm:$0xff]  ;;  %v7021_v62 = vld [vmem:[#allocation58_spill] sm:$0xff] }
 0x230   :  { %2000 = vmatpush.bf16.msrb.mxu0 %v7004_v16  ;;  %2013 = vmatpush.bf16.msrb.mxu1 %v7005_v42  ;;  %v7015_v16 = vld [vmem:[#allocation46_spill] sm:$0xff]  ;;  %v7016_v42 = vld [vmem:[#allocation47_spill] sm:$0xff] }
 0x231   :  { %2026 = vmatpush.bf16.msrb.mxu2 %v7006_v50  ;;  %2039 = vmatpush.bf16.msrb.mxu3 %v7007_v43  ;;  %v7017_v50 = vld [vmem:[#allocation48_spill] sm:$0xff]  ;;  %v7018_v43 = vld [vmem:[#allocation49_spill] sm:$0xff] }
 0x234   :  { %2001 = vmatpush.bf16.msrb.mxu0 %v7008_v5  ;;  %2014 = vmatpush.bf16.msrb.mxu1 %v7009_v57  ;;  %v7019_v5 = vld [vmem:[#allocation50_spill] sm:$0xff] }
 0x235   :  { %2027 = vmatpush.bf16.msrb.mxu2 %v7010_v13  ;;  %2040 = vmatpush.bf16.msrb.mxu3 %v7011_v21 }
 0x238   :  { %2002 = vmatpush.bf16.msrb.mxu0 %v7012_v30  ;;  %2015 = vmatpush.bf16.msrb.mxu1 %v7013_v61 }
 0x239   :  { %2028 = vmatpush.bf16.msrb.mxu2 %v7014_v27  ;;  %2041 = vmatpush.bf16.msrb.mxu3 %v7015_v16 }
 0x23c   :  { %2003 = vmatpush.bf16.msrb.mxu0 %v7016_v42  ;;  %2016 = vmatpush.bf16.msrb.mxu1 %v7017_v50 }
 0x23d   :  { %2029 = vmatpush.bf16.msrb.mxu2 %v7018_v43  ;;  %2042 = vmatpush.bf16.msrb.mxu3 %v7019_v5 }
 0x27a   :  { %v1682_v57 = vpop.f32.mrf.mxu0  ;;  %v1695_v13 = vpop.f32.mrf.mxu1 }
 0x27b   :  { %v1725_v21 = vadd.f32 %v1682_v57, %v7020_v48  ;;  %v1726_v30 = vadd.f32 %v1695_v13, %v7021_v62  ;;  %v7026_v57 = vld [vmem:[#allocation108_spill] sm:$0xff] }
 0x27d   :  { %v3909_v47 = vmul.f32 -1.442695, %v1725_v21  ;;  %v3910_v61 = vmul.f32 -1.442695, %v1726_v30  ;;  %v7023_v21 = vld [vmem:[#allocation81_spill] sm:$0xff]  ;;  %v7024_v30 = vld [vmem:[#allocation106_spill] sm:$0xff] }
 0x27f   :  { %4227 = vpow2.f32 %v3909_v47  ;;  %v603_v47 = vadd.f32 %v7024_v30, %v7023_v21  ;;  %v7028_v21 = vld [vmem:[#allocation88_spill] sm:$0xff] }
 0x280   :  { %4229 = vpow2.f32 %v3910_v61  ;;  %v7025_v61 = vld [vmem:[#allocation82_spill] sm:$0xff] }
 0x281   :  { %v1708_v27 = vpop.f32.mrf.mxu2  ;;  %v1721_v16 = vpop.f32.mrf.mxu3  ;;  %v632_v13 = vadd.f32 %v7026_v57, %v7025_v61  ;;  %v7029_v57 = vld [vmem:[#allocation110_spill] sm:$0xff] }
 0x282   :  { %v1728_v42 = vadd.f32 %v1721_v16, %v7022_v31  ;;  %v1684_v17 = vpop.f32.mrf.mxu0  ;;  %v1697_v50 = vpop.f32.mrf.mxu1  ;;  %v690_v61 = vadd.f32 %v7029_v57, %v7028_v21  ;;  %v7062_v21 = vld [vmem:[#allocation46_spill] sm:$0xff] }
 0x284   :  { %v3911_v49 = vmul.f32 -1.442695, %v1728_v42 }
 0x285   :  { %v4228_v43 = vpop.eup %4227 }
 0x286   :  { %v4230_v6 = vpop.eup %4229  ;;  %v1793_v5 = vadd.f32 1.0, %v4228_v43  ;;  %4231 = vpow2.f32 %v3911_v49  ;;  %v7027_v49 = vld [vmem:[#allocation61_spill] sm:$0xff] }
 0x287   :  { %v1812_v14 = vadd.f32 1.0, %v4230_v6  ;;  %v1727_v6 = vadd.f32 %v1708_v27, %v7027_v49 }
 0x288   :  { %4233 = vrcp.f32 %v1793_v5  ;;  %v1803_v28 = vand.u32 2147483647, %v1793_v5  ;;  %vm1799_vm14 = vweird.f32 %v1793_v5 }
 0x289   :  { %4235 = vrcp.f32 %v1812_v14  ;;  %v1710_v48 = vpop.f32.mrf.mxu2  ;;  %v1723_v62 = vpop.f32.mrf.mxu3  ;;  %vm1818_vm15 = vweird.f32 %v1812_v14 }
 0x28a   :  { %vm1804_vm0 = vcmp.eq.f32.partialorder %v1803_v28, 8.507059e+37 }
 0x28b   :  { %v1743_v1 = vpop.f32.mrf.mxu0  ;;  %v1756_v31 = vpop.f32.mrf.mxu1 }
 0x28c   :  { %v4232_v17 = vpop.eup %4231  ;;  %v1786_v16 = vadd.f32 %v1743_v1, %v603_v47  ;;  %v1787_v42 = vadd.f32 %v1756_v31, %v632_v13  ;;  %v1824_v47 = vand.u32 2147483648, %v1812_v14  ;;  %v1805_v13 = vand.u32 2147483648, %v1793_v5 }
 0x28d   :  { %v6069_v50 = vadd.f32 1.0, %v4232_v17 }
 0x28e   :  { %v4234_v43 = vpop.eup %4233  ;;  %v3912_v41 = vmul.f32 -1.442695, %v1786_v16  ;;  %v3913_v0 = vmul.f32 -1.442695, %v1787_v42  ;;  %v1822_v16 = vand.u32 2147483647, %v1812_v14 }
 0x28f   :  { %v4236_v48 = vpop.eup %4235  ;;  %v1795_v62 = vmul.f32 %v4234_v43, %v1793_v5  ;;  %4237 = vrcp.f32 %v6069_v50  ;;  %vm1800_vm12 = vweird.f32 %v4234_v43  ;;  %v1825_v57 = vor.u32 1.1754944e-38, %v1824_v47 }
 0x290   :  { %v1814_v30 = vmul.f32 %v4236_v48, %v1812_v14  ;;  %4239 = vpow2.f32 %v3912_v41  ;;  %vm1819_vm13 = vweird.f32 %v4236_v48  ;;  %vm1801_vm1 = vmor %vm1799_vm14, %vm1800_vm12  ;;  %vm1823_vm3 = vcmp.eq.f32.partialorder %v1822_v16, 8.507059e+37 }
 0x291   :  { %v1796_v51 = vsub.f32 1.0, %v1795_v62  ;;  %4241 = vpow2.f32 %v3913_v0  ;;  %vm1820_vm2 = vmor %vm1818_vm15, %vm1819_vm13  ;;  %vm1838_vm10 = vweird.f32 %v6069_v50 }
 0x292   :  { %v1815_v1 = vsub.f32 1.0, %v1814_v30  ;;  %4243 = vtanh.f32 %v1727_v6  ;;  %v1769_v31 = vpop.f32.mrf.mxu2  ;;  %v1782_v27 = vpop.f32.mrf.mxu3  ;;  %v1806_v6 = vor.u32 1.1754944e-38, %v1805_v13 }
 0x293   :  { %v1797_v17 = vmul.f32 %v4234_v43, %v1796_v51  ;;  %v1789_v42 = vadd.f32 %v1782_v27, %v690_v61  ;;  %v1745_v49 = vpop.f32.mrf.mxu0  ;;  %v1758_v24 = vpop.f32.mrf.mxu1 }
 0x294   :  { %v1816_v40 = vmul.f32 %v4236_v48, %v1815_v1 }
 0x295   :  { %v6075_v41 = vpop.eup %4237  ;;  %v1798_v62 = vadd.f32 %v4234_v43, %v1797_v17  ;;  %v3914_v0 = vmul.f32 -1.442695, %v1789_v42 }
 0x296   :  { %v4240_v30 = vpop.eup %4239  ;;  %v1817_v51 = vadd.f32 %v4236_v48, %v1816_v40  ;;  %v1834_v61 = vmul.f32 %v6075_v41, %v6069_v50  ;;  %vm1839_vm7 = vweird.f32 %v6075_v41 }
 0x297   :  { %v4242_v27 = vpop.eup %4241  ;;  %v1802_v24 = vsel %vm1801_vm1, %v4234_v43, %v1798_v62  ;;  %v6080_v5 = vadd.f32 1.0, %v4240_v30  ;;  %4245 = vpow2.f32 %v3914_v0  ;;  %v7030_v30 = vld [vmem:[#allocation87_spill] sm:$0xff]  ;;  %vm6111_vm12 = vmor %vm1838_vm10, %vm1839_vm7 }
 0x298   :  { %v4244_v14 = vpop.eup %4243  ;;  %v1807_v1 = vsel %vm1804_vm0, %v1806_v6, %v1802_v24  ;;  %v1821_v28 = vsel %vm1820_vm2, %v4236_v48, %v1817_v51  ;;  %v1835_v17 = vsub.f32 1.0, %v1834_v61  ;;  %v6082_v42 = vadd.f32 1.0, %v4242_v27  ;;  %v4419_v48 = vld [vmem:[%s6698_s1] sm:$0xff] }
 0x299   :  { %v1826_v47 = vsel %vm1823_vm3, %v1825_v57, %v1821_v28  ;;  %v1849_v49 = vmul.f32 %v4244_v14, %v1807_v1  ;;  %4247 = vrcp.f32 %v6080_v5  ;;  %vm2178_vm4 = vcmp.eq.s32.totalorder %v4419_v48, 3  ;;  %v7031_v57 = vld [vmem:[#allocation109_spill] sm:$0xff]  ;;  %v6103_v28 = vpop.permute.xlu2 %1919 }
 0x29a   :  { %v1848_v40 = vmul.f32 %v1826_v47, %v5933_v18  ;;  %4249 = vrcp.f32 %v6082_v42  ;;  %v1771_v13 = vpop.f32.mrf.mxu2  ;;  %v1784_v43 = vpop.f32.mrf.mxu3  ;;  %v1836_v16 = vmul.f32 %v6075_v41, %v1835_v17  ;;  %vm2185_vm6 = vcmp.eq.s32.totalorder %v4419_v48, 4  ;;  %7032 = vst [vmem:[#allocation9_spill] sm:$0xff] %v6103_v28 }
 0x29b   :  { %v661_v6 = vadd.f32 %v7031_v57, %v7030_v30  ;;  %v1844_v51 = vand.u32 2147483648, %v6069_v50  ;;  %v2179_v27 = vsel %vm2178_vm4, 1, %v6865_v10  ;;  %v2186_v24 = vsel %vm2185_vm6, 1, %v6865_v10  ;;  %v7061_v30 = vld [vmem:[#allocation45_spill] sm:$0xff] }
 0x29c   :  { %v6088_v62 = vadd.f32 %v1849_v49, %v1848_v40  ;;  %v1837_v18 = vadd.f32 %v6075_v41, %v1836_v16  ;;  %v1842_v17 = vand.u32 2147483647, %v6069_v50  ;;  %2181 = vperm.xlu0 %4159, %v2179_v27   ;;  %2188 = vperm.xlu1 %4160, %v2186_v24   ;;  %v1868_v13 = vand.u32 2147483648, %v6080_v5 }
 0x29d   :  { %v4246_v0 = vpop.eup %4245  ;;  %v1788_v1 = vadd.f32 %v1769_v31, %v661_v6  ;;  %v1845_v43 = vor.u32 1.1754944e-38, %v1844_v51  ;;  %vm1921_vm13 = vcmp.eq.s32.totalorder %v6103_v28, 1  ;;  %v1887_v48 = vand.u32 2147483648, %v6082_v42  ;;  %v7059_v28 = vld [vmem:[#allocation43_spill] sm:$0xff] }
 0x29e   :  { %4251 = vtanh.f32 %v6088_v62  ;;  %v6099_v61 = vadd.f32 1.0, %v4246_v0  ;;  %v1841_v31 = vsel %vm6111_vm12, %v6075_v41, %v1837_v18  ;;  %vm1843_vm14 = vcmp.eq.f32.partialorder %v1842_v17, 8.507059e+37 }
 0x29f   :  { %v4248_v14 = vpop.eup %4247  ;;  %v1866_v6 = vand.u32 2147483647, %v6080_v5  ;;  %v1846_v27 = vsel %vm1843_vm14, %v1845_v43, %v1841_v31  ;;  %v1885_v41 = vand.u32 2147483647, %v6082_v42  ;;  %vm1881_vm1 = vweird.f32 %v6082_v42 }
 0x2a0   :  { %v4250_v47 = vpop.eup %4249  ;;  %v1858_v49 = vmul.f32 %v4248_v14, %v6080_v5  ;;  %4253 = vrcp.f32 %v6099_v61  ;;  %vm1863_vm15 = vweird.f32 %v4248_v14  ;;  %vm1862_vm2 = vweird.f32 %v6080_v5 }
 0x2a1   :  { %v1877_v10 = vmul.f32 %v4250_v47, %v6082_v42  ;;  %4255 = vtanh.f32 %v1788_v1  ;;  %vm1882_vm0 = vweird.f32 %v4250_v47  ;;  %v1869_v40 = vor.u32 1.1754944e-38, %v1868_v13  ;;  %vm1864_vm3 = vmor %vm1862_vm2, %vm1863_vm15 }
 0x2a2   :  { %v1859_v50 = vsub.f32 1.0, %v1858_v49  ;;  %vm1883_vm4 = vmor %vm1881_vm1, %vm1882_vm0  ;;  %vm1867_vm6 = vcmp.eq.f32.partialorder %v1866_v6, 8.507059e+37  ;;  %vm1886_vm7 = vcmp.eq.f32.partialorder %v1885_v41, 8.507059e+37  ;;  %vm1901_vm12 = vweird.f32 %v6099_v61  ;;  %v6147_v6 = vpop.permute.xlu2 %1926 }
 0x2a3   :  { %v1878_v16 = vsub.f32 1.0, %v1877_v10  ;;  %7035 = vst [vmem:[#allocation11_spill] sm:$0xff] %v6147_v6  ;;  %vm1928_vm0 = vcmp.eq.s32.totalorder %v6147_v6, 1  ;;  %v7060_v6 = vld [vmem:[#allocation44_spill] sm:$0xff] }
 0x2a4   :  { %v4252_v0 = vpop.eup %4251  ;;  %v1860_v57 = vmul.f32 %v4248_v14, %v1859_v50  ;;  %v1888_v50 = vor.u32 1.1754944e-38, %v1887_v48  ;;  %v1907_v48 = vand.u32 2147483648, %v6099_v61 }
 0x2a5   :  { %v1879_v24 = vmul.f32 %v4250_v47, %v1878_v16  ;;  %v1852_v18 = vmul.f32 %v4252_v0, %v1846_v27 }
 0x2a6   :  { %v4254_v49 = vpop.eup %4253  ;;  %v1861_v51 = vadd.f32 %v4248_v14, %v1860_v57  ;;  %v1908_v41 = vor.u32 1.1754944e-38, %v1907_v48  ;;  %v7051_v48 = vld [vmem:[#allocation35_spill] sm:$0xff] }
 0x2a7   :  { %v1880_v1 = vadd.f32 %v4250_v47, %v1879_v24  ;;  %v1897_v17 = vmul.f32 %v4254_v49, %v6099_v61  ;;  %v6130_v10 = vsel %vm1921_vm13, %v1852_v18, %v5976_v3  ;;  %v1934_v31 = vpack.c.bf16 %v1852_v18, %v1852_v18  ;;  %v4256_v16 = vpop.eup %4255 }
 0x2a8   :  { %v1865_v43 = vsel %vm1864_vm3, %v4248_v14, %v1861_v51  ;;  %vm1902_vm10 = vweird.f32 %v4254_v49 }
 0x2a9   :  { %v1870_v42 = vsel %vm1867_vm6, %v1869_v40, %v1865_v43  ;;  %v1884_v0 = vsel %vm1883_vm4, %v4250_v47, %v1880_v1  ;;  %v1898_v5 = vsub.f32 1.0, %v1897_v17  ;;  %1943 = vmatmul.bf16.vlgmr.msra.gmra.mxu0 %v1934_v31  ;;  %1956 = vmatmul.bf16.vlgmr.msra.gmra.mxu1 %v1934_v31  ;;  %vm1903_vm14 = vmor %vm1901_vm12, %vm1902_vm10  ;;  %v7037_v1 = vld [vmem:[#allocation21_spill] sm:$0xff]  ;;  %v7038_v17 = vld [vmem:[#allocation22_spill] sm:$0xff] }
 0x2aa   :  { %v1889_v13 = vsel %vm1886_vm7, %v1888_v50, %v1884_v0  ;;  %v1912_v57 = vmul.f32 %v4256_v16, %v1870_v42  ;;  %1969 = vmatmul.bf16.vlgmr.msra.gmra.mxu2 %v1934_v31  ;;  %1982 = vmatmul.bf16.vlgmr.msra.gmra.mxu3 %v1934_v31  ;;  %v7039_v31 = vld [vmem:[#allocation23_spill] sm:$0xff]  ;;  %v7040_v50 = vld [vmem:[#allocation24_spill] sm:$0xff]  ;;  %v7041_v43 = vld [vmem:[#allocation25_spill] sm:$0xff] }
 0x2ab   :  { %v1911_v27 = vmul.f32 %v1889_v13, %v5983_v58  ;;  %v1899_v3 = vmul.f32 %v4254_v49, %v1898_v5  ;;  %2197 = vmatpush.bf16.msra.mxu0 %v4913_v7  ;;  %2210 = vmatpush.bf16.msra.mxu1 %v4924_v11  ;;  %v1905_v58 = vand.u32 2147483647, %v6099_v61  ;;  %v7042_v16 = vld [vmem:[#allocation26_spill] sm:$0xff]  ;;  %v7043_v42 = vld [vmem:[#allocation27_spill] sm:$0xff]  ;;  %v7044_v0 = vld [vmem:[#allocation28_spill] sm:$0xff] }
 0x2ac   :  { %2223 = vmatpush.bf16.msra.mxu2 %v4961_v25  ;;  %2236 = vmatpush.bf16.msra.mxu3 %v4926_v12  ;;  %v7045_v5 = vld [vmem:[#allocation29_spill] sm:$0xff]  ;;  %v7046_v13 = vld [vmem:[#allocation30_spill] sm:$0xff] }
 0x2ad   :  { %v6137_v14 = vadd.f32 %v1912_v57, %v1911_v27  ;;  %v1900_v47 = vadd.f32 %v4254_v49, %v1899_v3  ;;  %vm1906_vm15 = vcmp.eq.f32.partialorder %v1905_v58, 8.507059e+37  ;;  %v7047_v57 = vld [vmem:[#allocation31_spill] sm:$0xff]  ;;  %v7048_v27 = vld [vmem:[#allocation32_spill] sm:$0xff]  ;;  %v7049_v3 = vld [vmem:[#allocation33_spill] sm:$0xff] }
 0x2ae   :  { %v7052_v58 = vld [vmem:[#allocation36_spill] sm:$0xff] }
 0x2af   :  { %4257 = vtanh.f32 %v6137_v14  ;;  %2198 = vmatpush.bf16.msra.mxu0 %v6940_v33  ;;  %2211 = vmatpush.bf16.msra.mxu1 %v6941_v4  ;;  %v1904_v24 = vsel %vm1903_vm14, %v4254_v49, %v1900_v47  ;;  %v7050_v47 = vld [vmem:[#allocation34_spill] sm:$0xff] }
 0x2b0   :  { %2224 = vmatpush.bf16.msra.mxu2 %v6942_v60  ;;  %2237 = vmatpush.bf16.msra.mxu3 %v6943_v56  ;;  %v1909_v61 = vsel %vm1906_vm15, %v1908_v41, %v1904_v24  ;;  %v7053_v24 = vld [vmem:[#allocation37_spill] sm:$0xff]  ;;  %v7054_v41 = vld [vmem:[#allocation38_spill] sm:$0xff] }
 0x2b3   :  { %2199 = vmatpush.bf16.msra.mxu0 %v6944_v20  ;;  %2212 = vmatpush.bf16.msra.mxu1 %v4996_v34 }
 0x2b4   :  { %2225 = vmatpush.bf16.msra.mxu2 %v6945_v32  ;;  %2238 = vmatpush.bf16.msra.mxu3 %v4998_v36 }
 0x2b5   :  { %v4258_v18 = vpop.eup %4257 }
 0x2b6   :  { %v1915_v51 = vmul.f32 %v4258_v18, %v1909_v61  ;;  %v7055_v18 = vld [vmem:[#allocation39_spill] sm:$0xff]  ;;  %v7056_v61 = vld [vmem:[#allocation40_spill] sm:$0xff] }
 0x2b7   :  { %2200 = vmatpush.bf16.msra.mxu0 %v5023_v44  ;;  %2213 = vmatpush.bf16.msra.mxu1 %v5025_v45 }
 0x2b8   :  { %v6159_v49 = vsel %vm1928_vm0, %v1915_v51, %v6010_v55  ;;  %v1995_v40 = vpack.c.bf16 %v1915_v51, %v1915_v51  ;;  %2226 = vmatpush.bf16.msra.mxu2 %v5055_v54  ;;  %2239 = vmatpush.bf16.msra.mxu3 %v6946_v63  ;;  %v7036_v55 = vld [vmem:[#allocation20_spill] sm:$0xff]  ;;  %v7057_v51 = vld [vmem:[#allocation41_spill] sm:$0xff] }
 0x2ba   :  { %2004 = vmatmul.bf16.vlgmr.msrb.gmra.mxu0 %v1995_v40  ;;  %2017 = vmatmul.bf16.vlgmr.msrb.gmra.mxu1 %v1995_v40 }
 0x2bb   :  { %2030 = vmatmul.bf16.vlgmr.msrb.gmra.mxu2 %v1995_v40  ;;  %2043 = vmatmul.bf16.vlgmr.msrb.gmra.mxu3 %v1995_v40  ;;  %v7058_v40 = vld [vmem:[#allocation42_spill] sm:$0xff] }
 0x2bc   :  { %2201 = vmatpush.bf16.msra.mxu0 %v6947_v22  ;;  %2214 = vmatpush.bf16.msra.mxu1 %v6948_v26 }
 0x2bd   :  { %2227 = vmatpush.bf16.msra.mxu2 %v6949_v59  ;;  %2240 = vmatpush.bf16.msra.mxu3 %v5095_v2 }
 0x2c0   :  { %2202 = vmatpush.bf16.msra.mxu0 %v5108_v8  ;;  %2215 = vmatpush.bf16.msra.mxu1 %v5110_v9 }
 0x2c1   :  { %2228 = vmatpush.bf16.msra.mxu2 %v5122_v15  ;;  %2241 = vmatpush.bf16.msra.mxu3 %v5133_v23 }
 0x2c4   :  { %2203 = vmatpush.bf16.msra.mxu0 %v5145_v29  ;;  %2216 = vmatpush.bf16.msra.mxu1 %v5158_v37 }
 0x2c5   :  { %2229 = vmatpush.bf16.msra.mxu2 %v5160_v38  ;;  %2242 = vmatpush.bf16.msra.mxu3 %v5163_v39 }
 0x2c8   :  { %2204 = vmatpush.bf16.msra.mxu0 %v5179_v46  ;;  %2217 = vmatpush.bf16.msra.mxu1 %v5192_v52 }
 0x2c9   :  { %2230 = vmatpush.bf16.msra.mxu2 %v5194_v53  ;;  %2243 = vmatpush.bf16.msra.mxu3 %v5207_v35 }
 0x2cc   :  { %2258 = vmatpush.bf16.msrb.mxu0 %v5220_v19  ;;  %2271 = vmatpush.bf16.msrb.mxu1 %v7036_v55 }
 0x2cd   :  { %2284 = vmatpush.bf16.msrb.mxu2 %v7037_v1  ;;  %2297 = vmatpush.bf16.msrb.mxu3 %v7038_v17 }
 0x2d0   :  { %2259 = vmatpush.bf16.msrb.mxu0 %v7039_v31  ;;  %2272 = vmatpush.bf16.msrb.mxu1 %v7040_v50 }
 0x2d1   :  { %2285 = vmatpush.bf16.msrb.mxu2 %v7041_v43  ;;  %2298 = vmatpush.bf16.msrb.mxu3 %v7042_v16 }
 0x2d4   :  { %2260 = vmatpush.bf16.msrb.mxu0 %v7043_v42  ;;  %2273 = vmatpush.bf16.msrb.mxu1 %v7044_v0 }
 0x2d5   :  { %2286 = vmatpush.bf16.msrb.mxu2 %v7045_v5  ;;  %2299 = vmatpush.bf16.msrb.mxu3 %v7046_v13  ;;  %v7072_v13 = vld [vmem:[#allocation66_spill] sm:$0xff] }
 0x2d8   :  { %2261 = vmatpush.bf16.msrb.mxu0 %v7047_v57  ;;  %2274 = vmatpush.bf16.msrb.mxu1 %v7048_v27 }
 0x2d9   :  { %2287 = vmatpush.bf16.msrb.mxu2 %v7049_v3  ;;  %2300 = vmatpush.bf16.msrb.mxu3 %v7050_v47  ;;  %v7070_v47 = vld [vmem:[#allocation64_spill] sm:$0xff] }
 0x2dc   :  { %2262 = vmatpush.bf16.msrb.mxu0 %v7051_v48  ;;  %2275 = vmatpush.bf16.msrb.mxu1 %v7052_v58  ;;  %v7063_v58 = vld [vmem:[#allocation47_spill] sm:$0xff] }
 0x2dd   :  { %2288 = vmatpush.bf16.msrb.mxu2 %v7053_v24  ;;  %2301 = vmatpush.bf16.msrb.mxu3 %v7054_v41  ;;  %v7064_v24 = vld [vmem:[#allocation48_spill] sm:$0xff]  ;;  %v7065_v41 = vld [vmem:[#allocation49_spill] sm:$0xff] }
 0x2e0   :  { %2263 = vmatpush.bf16.msrb.mxu0 %v7055_v18  ;;  %2276 = vmatpush.bf16.msrb.mxu1 %v7056_v61  ;;  %v7066_v18 = vld [vmem:[#allocation50_spill] sm:$0xff]  ;;  %v7067_v61 = vld [vmem:[#allocation53_spill] sm:$0xff] }
 0x2e1   :  { %2289 = vmatpush.bf16.msrb.mxu2 %v7057_v51  ;;  %2302 = vmatpush.bf16.msrb.mxu3 %v7058_v40  ;;  %v7068_v51 = vld [vmem:[#allocation62_spill] sm:$0xff]  ;;  %v7069_v40 = vld [vmem:[#allocation55_spill] sm:$0xff] }
 0x2e2   :  { %v482_v48 = vadd.f32 %v7068_v51, %v7067_v61 }
 0x2e4   :  { %2264 = vmatpush.bf16.msrb.mxu0 %v7059_v28  ;;  %2277 = vmatpush.bf16.msrb.mxu1 %v7060_v6  ;;  %v511_v28 = vadd.f32 %v7070_v47, %v7069_v40 }
 0x2e5   :  { %2290 = vmatpush.bf16.msrb.mxu2 %v7061_v30  ;;  %2303 = vmatpush.bf16.msrb.mxu3 %v7062_v21 }
 0x2e8   :  { %2265 = vmatpush.bf16.msrb.mxu0 %v7063_v58  ;;  %2278 = vmatpush.bf16.msrb.mxu1 %v7064_v24  ;;  %v7071_v58 = vld [vmem:[#allocation60_spill] sm:$0xff] }
 0x2e9   :  { %2291 = vmatpush.bf16.msrb.mxu2 %v7065_v41  ;;  %2304 = vmatpush.bf16.msrb.mxu3 %v7066_v18  ;;  %v569_v24 = vadd.f32 %v7072_v13, %v7071_v58  ;;  %v7073_v13 = vld [vmem:[#allocation59_spill] sm:$0xff] }
 0x326   :  { %v1944_v3 = vpop.f32.mrf.mxu0  ;;  %v1957_v6 = vpop.f32.mrf.mxu1 }
 0x327   :  { %v1987_v27 = vadd.f32 %v1944_v3, %v482_v48  ;;  %v1988_v30 = vadd.f32 %v1957_v6, %v511_v28  ;;  %v7075_v48 = vld [vmem:[#allocation103_spill] sm:$0xff] }
 0x329   :  { %v3915_v57 = vmul.f32 -1.442695, %v1987_v27  ;;  %v3916_v21 = vmul.f32 -1.442695, %v1988_v30 }
 0x32b   :  { %4259 = vpow2.f32 %v3915_v57 }
 0x32c   :  { %4261 = vpow2.f32 %v3916_v21  ;;  %v7074_v21 = vld [vmem:[#allocation65_spill] sm:$0xff] }
 0x32d   :  { %v1970_v41 = vpop.f32.mrf.mxu2  ;;  %v1983_v5 = vpop.f32.mrf.mxu3  ;;  %v540_v3 = vadd.f32 %v7074_v21, %v7073_v13 }
 0x32e   :  { %v1990_v18 = vadd.f32 %v1983_v5, %v569_v24  ;;  %v1946_v0 = vpop.f32.mrf.mxu0  ;;  %v1959_v42 = vpop.f32.mrf.mxu1 }
 0x32f   :  { %v7076_v0 = vld [vmem:[#allocation104_spill] sm:$0xff] }
 0x330   :  { %v3917_v51 = vmul.f32 -1.442695, %v1990_v18 }
 0x331   :  { %v4260_v61 = vpop.eup %4259 }
 0x332   :  { %v4262_v16 = vpop.eup %4261  ;;  %v2055_v47 = vadd.f32 1.0, %v4260_v61  ;;  %4263 = vpow2.f32 %v3917_v51  ;;  %v1989_v61 = vadd.f32 %v1970_v41, %v540_v3  ;;  %v7077_v3 = vld [vmem:[#allocation107_spill] sm:$0xff] }
 0x333   :  { %v2074_v40 = vadd.f32 1.0, %v4262_v16 }
 0x334   :  { %4265 = vrcp.f32 %v2055_v47  ;;  %v2065_v50 = vand.u32 2147483647, %v2055_v47  ;;  %vm2061_vm3 = vweird.f32 %v2055_v47 }
 0x335   :  { %4267 = vrcp.f32 %v2074_v40  ;;  %v1972_v28 = vpop.f32.mrf.mxu2  ;;  %v1985_v30 = vpop.f32.mrf.mxu3  ;;  %v2086_v13 = vand.u32 2147483648, %v2074_v40  ;;  %v2084_v41 = vand.u32 2147483647, %v2074_v40  ;;  %vm2080_vm4 = vweird.f32 %v2074_v40 }
 0x336   :  { %vm2066_vm6 = vcmp.eq.f32.partialorder %v2065_v50, 8.507059e+37 }
 0x337   :  { %v2005_v6 = vpop.f32.mrf.mxu0  ;;  %v2018_v57 = vpop.f32.mrf.mxu1  ;;  %v2087_v17 = vor.u32 1.1754944e-38, %v2086_v13  ;;  %vm2085_vm12 = vcmp.eq.f32.partialorder %v2084_v41, 8.507059e+37 }
 0x338   :  { %v4264_v27 = vpop.eup %4263  ;;  %v2048_v5 = vadd.f32 %v2005_v6, %v7075_v48  ;;  %v2049_v42 = vadd.f32 %v2018_v57, %v7076_v0  ;;  %v2067_v6 = vand.u32 2147483648, %v2055_v47 }
 0x339   :  { %v6221_v24 = vadd.f32 1.0, %v4264_v27 }
 0x33a   :  { %v4266_v18 = vpop.eup %4265  ;;  %v3918_v51 = vmul.f32 -1.442695, %v2048_v5  ;;  %v3919_v16 = vmul.f32 -1.442695, %v2049_v42 }
 0x33b   :  { %v4268_v58 = vpop.eup %4267  ;;  %v2057_v43 = vmul.f32 %v4266_v18, %v2055_v47  ;;  %4269 = vrcp.f32 %v6221_v24  ;;  %vm2062_vm1 = vweird.f32 %v4266_v18  ;;  %vm2100_vm15 = vweird.f32 %v6221_v24 }
 0x33c   :  { %v2076_v28 = vmul.f32 %v4268_v58, %v2074_v40  ;;  %4271 = vpow2.f32 %v3918_v51  ;;  %vm2081_vm2 = vweird.f32 %v4268_v58  ;;  %vm2063_vm7 = vmor %vm2061_vm3, %vm2062_vm1 }
 0x33d   :  { %v2058_v30 = vsub.f32 1.0, %v2057_v43  ;;  %4273 = vpow2.f32 %v3919_v16  ;;  %vm2082_vm10 = vmor %vm2080_vm4, %vm2081_vm2 }
 0x33e   :  { %v2077_v21 = vsub.f32 1.0, %v2076_v28  ;;  %4275 = vtanh.f32 %v1989_v61  ;;  %v2031_v57 = vpop.f32.mrf.mxu2  ;;  %v2044_v27 = vpop.f32.mrf.mxu3  ;;  %v2068_v61 = vor.u32 1.1754944e-38, %v2067_v6 }
 0x33f   :  { %v2059_v48 = vmul.f32 %v4266_v18, %v2058_v30  ;;  %v2051_v5 = vadd.f32 %v2044_v27, %v7077_v3  ;;  %v2007_v0 = vpop.f32.mrf.mxu0  ;;  %v2020_v42 = vpop.f32.mrf.mxu1 }
 0x340   :  { %v2078_v31 = vmul.f32 %v4268_v58, %v2077_v21 }
 0x341   :  { %v4270_v51 = vpop.eup %4269  ;;  %v2060_v43 = vadd.f32 %v4266_v18, %v2059_v48  ;;  %v3920_v16 = vmul.f32 -1.442695, %v2051_v5 }
 0x342   :  { %v4272_v28 = vpop.eup %4271  ;;  %v2079_v30 = vadd.f32 %v4268_v58, %v2078_v31  ;;  %v2096_v1 = vmul.f32 %v4270_v51, %v6221_v24  ;;  %vm2101_vm14 = vweird.f32 %v4270_v51 }
 0x343   :  { %v4274_v55 = vpop.eup %4273  ;;  %v2064_v27 = vsel %vm2063_vm7, %v4266_v18, %v2060_v43  ;;  %v6227_v21 = vadd.f32 1.0, %v4272_v28  ;;  %4277 = vpow2.f32 %v3920_v16  ;;  %v6238_v28 = vpop.permute.xlu0 %2181  ;;  %vm6244_vm1 = vmor %vm2100_vm15, %vm2101_vm14 }
 0x344   :  { %v4276_v47 = vpop.eup %4275  ;;  %v2069_v40 = vsel %vm2066_vm6, %v2068_v61, %v2064_v27  ;;  %v2083_v48 = vsel %vm2082_vm10, %v4268_v58, %v2079_v30  ;;  %v2097_v50 = vsub.f32 1.0, %v2096_v1  ;;  %v2137_v3 = vadd.f32 1.0, %v4274_v55 }
 0x345   :  { %v2088_v5 = vsel %vm2085_vm12, %v2087_v17, %v2083_v48  ;;  %v2111_v13 = vmul.f32 %v4276_v47, %v2069_v40  ;;  %4279 = vrcp.f32 %v6227_v21  ;;  %v2106_v55 = vand.u32 2147483648, %v6221_v24  ;;  %v7078_v17 = vld [vmem:[#allocation105_spill] sm:$0xff] }
 0x346   :  { %v2110_v31 = vmul.f32 %v2088_v5, %v6088_v62  ;;  %4281 = vrcp.f32 %v2137_v3  ;;  %v2033_v6 = vpop.f32.mrf.mxu2  ;;  %v2046_v0 = vpop.f32.mrf.mxu3  ;;  %v2098_v42 = vmul.f32 %v4270_v51, %v2097_v50  ;;  %v2050_v16 = vadd.f32 %v2031_v57, %v7078_v17 }
 0x347   :  { %v2104_v62 = vand.u32 2147483647, %v6221_v24  ;;  %v2130_v48 = vand.u32 2147483648, %v6227_v21  ;;  %v2107_v50 = vor.u32 1.1754944e-38, %v2106_v55  ;;  %vm2183_vm2 = vcmp.eq.s32.totalorder %v6238_v28, 1  ;;  %v7124_v28 = vld [vmem:[#allocation16_spill] sm:$0xff] }
 0x348   :  { %v6231_v18 = vadd.f32 %v2111_v13, %v2110_v31  ;;  %v2099_v43 = vadd.f32 %v4270_v51, %v2098_v42  ;;  %v2149_v5 = vand.u32 2147483648, %v2137_v3  ;;  %v2128_v6 = vand.u32 2147483647, %v6227_v21 }
 0x349   :  { %v4278_v41 = vpop.eup %4277  ;;  %vm2105_vm3 = vcmp.eq.f32.partialorder %v2104_v62, 8.507059e+37  ;;  %vm2143_vm7 = vweird.f32 %v2137_v3  ;;  %vm2124_vm10 = vweird.f32 %v6227_v21  ;;  %v2131_v55 = vor.u32 1.1754944e-38, %v2130_v48 }
 0x34a   :  { %4283 = vtanh.f32 %v6231_v18  ;;  %v6234_v58 = vadd.f32 1.0, %v4278_v41  ;;  %v2103_v40 = vsel %vm6244_vm1, %v4270_v51, %v2099_v43  ;;  %v2147_v41 = vand.u32 2147483647, %v2137_v3 }
 0x34b   :  { %v4280_v1 = vpop.eup %4279  ;;  %v2108_v0 = vsel %vm2105_vm3, %v2107_v50, %v2103_v40  ;;  %vm2129_vm15 = vcmp.eq.f32.partialorder %v2128_v6, 8.507059e+37 }
 0x34c   :  { %v4282_v61 = vpop.eup %4281  ;;  %v2120_v30 = vmul.f32 %v4280_v1, %v6227_v21  ;;  %4285 = vrcp.f32 %v6234_v58  ;;  %vm2125_vm4 = vweird.f32 %v4280_v1  ;;  %vm2148_vm1 = vcmp.eq.f32.partialorder %v2147_v41, 8.507059e+37 }
 0x34d   :  { %v2139_v47 = vmul.f32 %v4282_v61, %v2137_v3  ;;  %4287 = vtanh.f32 %v2050_v16  ;;  %vm2144_vm6 = vweird.f32 %v4282_v61  ;;  %vm2126_vm12 = vmor %vm2124_vm10, %vm2125_vm4  ;;  %vm2163_vm4 = vweird.f32 %v6234_v58 }
 0x34e   :  { %v2121_v57 = vsub.f32 1.0, %v2120_v30  ;;  %vm2145_vm14 = vmor %vm2143_vm7, %vm2144_vm6 }
 0x34f   :  { %v2140_v24 = vsub.f32 1.0, %v2139_v47  ;;  %v2150_v47 = vor.u32 1.1754944e-38, %v2149_v5  ;;  %v2169_v5 = vand.u32 2147483648, %v6234_v58 }
 0x350   :  { %v4284_v13 = vpop.eup %4283  ;;  %v2122_v31 = vmul.f32 %v4280_v1, %v2121_v57 }
 0x351   :  { %v2141_v42 = vmul.f32 %v4282_v61, %v2140_v24  ;;  %v2114_v51 = vmul.f32 %v4284_v13, %v2108_v0  ;;  %v2170_v0 = vor.u32 1.1754944e-38, %v2169_v5  ;;  %v7098_v5 = vld [vmem:[#allocation37_spill] sm:$0xff] }
 0x352   :  { %v4286_v43 = vpop.eup %4285  ;;  %v2123_v17 = vadd.f32 %v4280_v1, %v2122_v31  ;;  %v6275_v31 = vpop.permute.xlu1 %2188 }
 0x353   :  { %v2142_v30 = vadd.f32 %v4282_v61, %v2141_v42  ;;  %v2159_v16 = vmul.f32 %v4286_v43, %v6234_v58  ;;  %v6258_v62 = vsel %vm2183_vm2, %v2114_v51, %v6130_v10  ;;  %v2196_v27 = vpack.c.bf16 %v2114_v51, %v2114_v51  ;;  %v4288_v57 = vpop.eup %4287 }
 0x354   :  { %v2127_v40 = vsel %vm2126_vm12, %v4280_v1, %v2123_v17  ;;  %vm2164_vm3 = vweird.f32 %v4286_v43  ;;  %vm2190_vm10 = vcmp.eq.s32.totalorder %v6275_v31, 1  ;;  %v7082_v17 = vld [vmem:[#allocation21_spill] sm:$0xff] }
 0x355   :  { %v2132_v3 = vsel %vm2129_vm15, %v2131_v55, %v2127_v40  ;;  %v2146_v50 = vsel %vm2145_vm14, %v4282_v61, %v2142_v30  ;;  %v2160_v21 = vsub.f32 1.0, %v2159_v16  ;;  %2205 = vmatmul.bf16.vlgmr.msra.gmra.mxu0 %v2196_v27  ;;  %2218 = vmatmul.bf16.vlgmr.msra.gmra.mxu1 %v2196_v27  ;;  %vm2165_vm6 = vmor %vm2163_vm4, %vm2164_vm3  ;;  %v7083_v55 = vld [vmem:[#allocation22_spill] sm:$0xff]  ;;  %v7084_v30 = vld [vmem:[#allocation23_spill] sm:$0xff] }
 0x356   :  { %v2151_v48 = vsel %vm2148_vm1, %v2150_v47, %v2146_v50  ;;  %v2174_v24 = vmul.f32 %v4288_v57, %v2132_v3  ;;  %2231 = vmatmul.bf16.vlgmr.msra.gmra.mxu2 %v2196_v27  ;;  %2244 = vmatmul.bf16.vlgmr.msra.gmra.mxu3 %v2196_v27  ;;  %v7085_v16 = vld [vmem:[#allocation24_spill] sm:$0xff]  ;;  %v7086_v27 = vld [vmem:[#allocation25_spill] sm:$0xff]  ;;  %v7087_v47 = vld [vmem:[#allocation26_spill] sm:$0xff] }
 0x357   :  { %v2173_v13 = vmul.f32 %v2151_v48, %v6137_v14  ;;  %v2161_v10 = vmul.f32 %v4286_v43, %v2160_v21  ;;  %2447 = vmatpush.bf16.msra.mxu0 %v4913_v7  ;;  %2460 = vmatpush.bf16.msra.mxu1 %v4924_v11  ;;  %v2167_v14 = vand.u32 2147483647, %v6234_v58  ;;  %v7088_v40 = vld [vmem:[#allocation27_spill] sm:$0xff]  ;;  %v7089_v57 = vld [vmem:[#allocation28_spill] sm:$0xff]  ;;  %v7090_v3 = vld [vmem:[#allocation29_spill] sm:$0xff] }
 0x358   :  { %2473 = vmatpush.bf16.msra.mxu2 %v4961_v25  ;;  %2486 = vmatpush.bf16.msra.mxu3 %v4926_v12  ;;  %v7091_v50 = vld [vmem:[#allocation30_spill] sm:$0xff]  ;;  %v7092_v21 = vld [vmem:[#allocation31_spill] sm:$0xff]  ;;  %v7093_v48 = vld [vmem:[#allocation32_spill] sm:$0xff] }
 0x359   :  { %v6265_v1 = vadd.f32 %v2174_v24, %v2173_v13  ;;  %v2162_v61 = vadd.f32 %v4286_v43, %v2161_v10  ;;  %vm2168_vm7 = vcmp.eq.f32.partialorder %v2167_v14, 8.507059e+37  ;;  %v7094_v24 = vld [vmem:[#allocation33_spill] sm:$0xff]  ;;  %v7095_v13 = vld [vmem:[#allocation34_spill] sm:$0xff]  ;;  %v7096_v10 = vld [vmem:[#allocation35_spill] sm:$0xff] }
 0x35a   :  { %v7099_v14 = vld [vmem:[#allocation38_spill] sm:$0xff] }
 0x35b   :  { %4289 = vtanh.f32 %v6265_v1  ;;  %2448 = vmatpush.bf16.msra.mxu0 %v6940_v33  ;;  %2461 = vmatpush.bf16.msra.mxu1 %v6941_v4  ;;  %v2166_v6 = vsel %vm2165_vm6, %v4286_v43, %v2162_v61  ;;  %v7097_v61 = vld [vmem:[#allocation36_spill] sm:$0xff] }
 0x35c   :  { %2474 = vmatpush.bf16.msra.mxu2 %v6942_v60  ;;  %2487 = vmatpush.bf16.msra.mxu3 %v6943_v56  ;;  %v2171_v58 = vsel %vm2168_vm7, %v2170_v0, %v2166_v6  ;;  %v7100_v6 = vld [vmem:[#allocation39_spill] sm:$0xff]  ;;  %v7101_v0 = vld [vmem:[#allocation40_spill] sm:$0xff] }
 0x35f   :  { %2449 = vmatpush.bf16.msra.mxu0 %v6944_v20  ;;  %2462 = vmatpush.bf16.msra.mxu1 %v4996_v34 }
 0x360   :  { %2475 = vmatpush.bf16.msra.mxu2 %v6945_v32  ;;  %2488 = vmatpush.bf16.msra.mxu3 %v4998_v36 }
 0x361   :  { %v4290_v42 = vpop.eup %4289 }
 0x362   :  { %v2177_v41 = vmul.f32 %v4290_v42, %v2171_v58  ;;  %v7102_v42 = vld [vmem:[#allocation41_spill] sm:$0xff]  ;;  %v7103_v58 = vld [vmem:[#allocation42_spill] sm:$0xff] }
 0x363   :  { %2450 = vmatpush.bf16.msra.mxu0 %v5023_v44  ;;  %2463 = vmatpush.bf16.msra.mxu1 %v5025_v45 }
 0x364   :  { %v6287_v51 = vsel %vm2190_vm10, %v2177_v41, %v6159_v49  ;;  %v2257_v43 = vpack.c.bf16 %v2177_v41, %v2177_v41  ;;  %2476 = vmatpush.bf16.msra.mxu2 %v5055_v54  ;;  %2489 = vmatpush.bf16.msra.mxu3 %v6946_v63  ;;  %v7081_v49 = vld [vmem:[#allocation20_spill] sm:$0xff]  ;;  %v7104_v41 = vld [vmem:[#allocation43_spill] sm:$0xff] }
 0x366   :  { %2266 = vmatmul.bf16.vlgmr.msrb.gmra.mxu0 %v2257_v43  ;;  %2279 = vmatmul.bf16.vlgmr.msrb.gmra.mxu1 %v2257_v43 }
 0x367   :  { %2292 = vmatmul.bf16.vlgmr.msrb.gmra.mxu2 %v2257_v43  ;;  %2305 = vmatmul.bf16.vlgmr.msrb.gmra.mxu3 %v2257_v43  ;;  %v7105_v43 = vld [vmem:[#allocation44_spill] sm:$0xff] }
 0x368   :  { %2451 = vmatpush.bf16.msra.mxu0 %v6947_v22  ;;  %2464 = vmatpush.bf16.msra.mxu1 %v6948_v26 }
 0x369   :  { %2477 = vmatpush.bf16.msra.mxu2 %v6949_v59  ;;  %2490 = vmatpush.bf16.msra.mxu3 %v5095_v2 }
 0x36c   :  { %2452 = vmatpush.bf16.msra.mxu0 %v5108_v8  ;;  %2465 = vmatpush.bf16.msra.mxu1 %v5110_v9 }
 0x36d   :  { %2478 = vmatpush.bf16.msra.mxu2 %v5122_v15  ;;  %2491 = vmatpush.bf16.msra.mxu3 %v5133_v23 }
 0x370   :  { %2453 = vmatpush.bf16.msra.mxu0 %v5145_v29  ;;  %2466 = vmatpush.bf16.msra.mxu1 %v5158_v37 }
 0x371   :  { %2479 = vmatpush.bf16.msra.mxu2 %v5160_v38  ;;  %2492 = vmatpush.bf16.msra.mxu3 %v5163_v39 }
 0x374   :  { %2454 = vmatpush.bf16.msra.mxu0 %v5179_v46  ;;  %2467 = vmatpush.bf16.msra.mxu1 %v5192_v52 }
 0x375   :  { %2480 = vmatpush.bf16.msra.mxu2 %v5194_v53  ;;  %2493 = vmatpush.bf16.msra.mxu3 %v5207_v35 }
 0x378   :  { %2508 = vmatpush.bf16.msrb.mxu0 %v5220_v19  ;;  %2521 = vmatpush.bf16.msrb.mxu1 %v7081_v49 }
 0x379   :  { %2534 = vmatpush.bf16.msrb.mxu2 %v7082_v17  ;;  %2547 = vmatpush.bf16.msrb.mxu3 %v7083_v55 }
 0x37c   :  { %2509 = vmatpush.bf16.msrb.mxu0 %v7084_v30  ;;  %2522 = vmatpush.bf16.msrb.mxu1 %v7085_v16 }
 0x37d   :  { %2535 = vmatpush.bf16.msrb.mxu2 %v7086_v27  ;;  %2548 = vmatpush.bf16.msrb.mxu3 %v7087_v47 }
 0x380   :  { %2510 = vmatpush.bf16.msrb.mxu0 %v7088_v40  ;;  %2523 = vmatpush.bf16.msrb.mxu1 %v7089_v57 }
 0x381   :  { %2536 = vmatpush.bf16.msrb.mxu2 %v7090_v3  ;;  %2549 = vmatpush.bf16.msrb.mxu3 %v7091_v50  ;;  %v7114_v50 = vld [vmem:[#allocation71_spill] sm:$0xff] }
 0x384   :  { %2511 = vmatpush.bf16.msrb.mxu0 %v7092_v21  ;;  %2524 = vmatpush.bf16.msrb.mxu1 %v7093_v48  ;;  %v7113_v48 = vld [vmem:[#allocation68_spill] sm:$0xff] }
 0x385   :  { %2537 = vmatpush.bf16.msrb.mxu2 %v7094_v24  ;;  %2550 = vmatpush.bf16.msrb.mxu3 %v7095_v13  ;;  %v7106_v13 = vld [vmem:[#allocation45_spill] sm:$0xff]  ;;  %v7112_v24 = vld [vmem:[#allocation67_spill] sm:$0xff] }
 0x388   :  { %2512 = vmatpush.bf16.msrb.mxu0 %v7096_v10  ;;  %2525 = vmatpush.bf16.msrb.mxu1 %v7097_v61  ;;  %v7107_v10 = vld [vmem:[#allocation46_spill] sm:$0xff]  ;;  %v7108_v61 = vld [vmem:[#allocation47_spill] sm:$0xff] }
 0x389   :  { %2538 = vmatpush.bf16.msrb.mxu2 %v7098_v5  ;;  %2551 = vmatpush.bf16.msrb.mxu3 %v7099_v14  ;;  %v7109_v5 = vld [vmem:[#allocation48_spill] sm:$0xff]  ;;  %v7110_v14 = vld [vmem:[#allocation49_spill] sm:$0xff] }
 0x38c   :  { %2513 = vmatpush.bf16.msrb.mxu0 %v7100_v6  ;;  %2526 = vmatpush.bf16.msrb.mxu1 %v7101_v0  ;;  %v7111_v6 = vld [vmem:[#allocation50_spill] sm:$0xff] }
 0x38d   :  { %2539 = vmatpush.bf16.msrb.mxu2 %v7102_v42  ;;  %2552 = vmatpush.bf16.msrb.mxu3 %v7103_v58 }
 0x390   :  { %2514 = vmatpush.bf16.msrb.mxu0 %v7104_v41  ;;  %2527 = vmatpush.bf16.msrb.mxu1 %v7105_v43 }
 0x391   :  { %2540 = vmatpush.bf16.msrb.mxu2 %v7106_v13  ;;  %2553 = vmatpush.bf16.msrb.mxu3 %v7107_v10 }
 0x394   :  { %2515 = vmatpush.bf16.msrb.mxu0 %v7108_v61  ;;  %2528 = vmatpush.bf16.msrb.mxu1 %v7109_v5 }
 0x395   :  { %2541 = vmatpush.bf16.msrb.mxu2 %v7110_v14  ;;  %2554 = vmatpush.bf16.msrb.mxu3 %v7111_v6 }
 0x3d2   :  { %v2206_v0 = vpop.f32.mrf.mxu0  ;;  %v2219_v42 = vpop.f32.mrf.mxu1 }
 0x3d3   :  { %v2249_v58 = vadd.f32 %v2206_v0, %v7112_v24  ;;  %v2250_v41 = vadd.f32 %v2219_v42, %v7113_v48  ;;  %v7115_v0 = vld [vmem:[#allocation81_spill] sm:$0xff]  ;;  %v7116_v42 = vld [vmem:[#allocation98_spill] sm:$0xff] }
 0x3d5   :  { %v3921_v21 = vmul.f32 -1.442695, %v2249_v58  ;;  %v3922_v43 = vmul.f32 -1.442695, %v2250_v41  ;;  %v7117_v58 = vld [vmem:[#allocation82_spill] sm:$0xff]  ;;  %v7118_v41 = vld [vmem:[#allocation100_spill] sm:$0xff] }
 0x3d7   :  { %4291 = vpow2.f32 %v3921_v21  ;;  %v598_v21 = vadd.f32 %v7116_v42, %v7115_v0  ;;  %v7120_v0 = vld [vmem:[#allocation88_spill] sm:$0xff] }
 0x3d8   :  { %4293 = vpow2.f32 %v3922_v43  ;;  %v627_v43 = vadd.f32 %v7118_v41, %v7117_v58  ;;  %v7121_v41 = vld [vmem:[#allocation102_spill] sm:$0xff] }
 0x3d9   :  { %v2232_v13 = vpop.f32.mrf.mxu2  ;;  %v2245_v10 = vpop.f32.mrf.mxu3  ;;  %v685_v58 = vadd.f32 %v7121_v41, %v7120_v0 }
 0x3da   :  { %v2252_v61 = vadd.f32 %v2245_v10, %v7114_v50  ;;  %v2208_v3 = vpop.f32.mrf.mxu0  ;;  %v2221_v5 = vpop.f32.mrf.mxu1  ;;  %v7119_v10 = vld [vmem:[#allocation69_spill] sm:$0xff] }
 0x3dc   :  { %v3923_v57 = vmul.f32 -1.442695, %v2252_v61  ;;  %v2251_v61 = vadd.f32 %v2232_v13, %v7119_v10 }
 0x3dd   :  { %v4292_v14 = vpop.eup %4291 }
 0x3de   :  { %v4294_v40 = vpop.eup %4293  ;;  %v2317_v6 = vadd.f32 1.0, %v4292_v14  ;;  %4295 = vpow2.f32 %v3923_v57 }
 0x3df   :  { %v2336_v47 = vadd.f32 1.0, %v4294_v40 }
 0x3e0   :  { %4297 = vrcp.f32 %v2317_v6  ;;  %v2327_v17 = vand.u32 2147483647, %v2317_v6  ;;  %vm2323_vm1 = vweird.f32 %v2317_v6 }
 0x3e1   :  { %4299 = vrcp.f32 %v2336_v47  ;;  %v2234_v24 = vpop.f32.mrf.mxu2  ;;  %v2247_v48 = vpop.f32.mrf.mxu3  ;;  %vm2342_vm15 = vweird.f32 %v2336_v47 }
 0x3e2   :  { %vm2328_vm4 = vcmp.eq.f32.partialorder %v2327_v17, 8.507059e+37 }
 0x3e3   :  { %v2267_v27 = vpop.f32.mrf.mxu0  ;;  %v2280_v50 = vpop.f32.mrf.mxu1 }
 0x3e4   :  { %v4296_v3 = vpop.eup %4295  ;;  %v2310_v5 = vadd.f32 %v2267_v27, %v598_v21  ;;  %v2311_v16 = vadd.f32 %v2280_v50, %v627_v43  ;;  %v2348_v27 = vand.u32 2147483648, %v2336_v47  ;;  %v2329_v21 = vand.u32 2147483648, %v2317_v6 }
 0x3e5   :  { %v6347_v14 = vadd.f32 1.0, %v4296_v3 }
 0x3e6   :  { %v4298_v40 = vpop.eup %4297  ;;  %v3924_v57 = vmul.f32 -1.442695, %v2310_v5  ;;  %v3925_v30 = vmul.f32 -1.442695, %v2311_v16  ;;  %v2346_v16 = vand.u32 2147483647, %v2336_v47 }
 0x3e7   :  { %v4300_v24 = vpop.eup %4299  ;;  %v2319_v48 = vmul.f32 %v4298_v40, %v2317_v6  ;;  %4301 = vrcp.f32 %v6347_v14  ;;  %vm2324_vm12 = vweird.f32 %v4298_v40  ;;  %v2349_v35 = vor.u32 1.1754944e-38, %v2348_v27  ;;  %v7122_v27 = vld [vmem:[#allocation87_spill] sm:$0xff] }
 0x3e8   :  { %v2338_v42 = vmul.f32 %v4300_v24, %v2336_v47  ;;  %4303 = vtanh.f32 %v2251_v61  ;;  %vm2343_vm14 = vweird.f32 %v4300_v24  ;;  %vm2325_vm3 = vmor %vm2323_vm1, %vm2324_vm12  ;;  %vm2347_vm7 = vcmp.eq.f32.partialorder %v2346_v16, 8.507059e+37  ;;  %v7123_v16 = vld [vmem:[#allocation101_spill] sm:$0xff] }
 0x3e9   :  { %v2320_v55 = vsub.f32 1.0, %v2319_v48  ;;  %4305 = vpow2.f32 %v3924_v57  ;;  %vm2344_vm6 = vmor %vm2342_vm15, %vm2343_vm14  ;;  %vm2362_vm14 = vweird.f32 %v6347_v14 }
 0x3ea   :  { %v2339_v13 = vsub.f32 1.0, %v2338_v42  ;;  %4307 = vpow2.f32 %v3925_v30  ;;  %v2293_v43 = vpop.f32.mrf.mxu2  ;;  %v2306_v50 = vpop.f32.mrf.mxu3  ;;  %v2330_v42 = vor.u32 1.1754944e-38, %v2329_v21 }
 0x3eb   :  { %v2321_v3 = vmul.f32 %v4298_v40, %v2320_v55  ;;  %v2313_v10 = vadd.f32 %v2306_v50, %v685_v58  ;;  %v2269_v5 = vpop.f32.mrf.mxu0  ;;  %v2282_v49 = vpop.f32.mrf.mxu1 }
 0x3ec   :  { %v2340_v19 = vmul.f32 %v4300_v24, %v2339_v13 }
 0x3ed   :  { %v4302_v61 = vpop.eup %4301  ;;  %v2322_v41 = vadd.f32 %v4298_v40, %v2321_v3  ;;  %v3926_v48 = vmul.f32 -1.442695, %v2313_v10 }
 0x3ee   :  { %v4304_v57 = vpop.eup %4303  ;;  %v2341_v30 = vadd.f32 %v4300_v24, %v2340_v19  ;;  %v2358_v0 = vmul.f32 %v4302_v61, %v6347_v14  ;;  %vm2363_vm12 = vweird.f32 %v4302_v61 }
 0x3ef   :  { %v4306_v55 = vpop.eup %4305  ;;  %v2326_v58 = vsel %vm2325_vm3, %v4298_v40, %v2322_v41  ;;  %4309 = vpow2.f32 %v3926_v48  ;;  %v656_v41 = vadd.f32 %v7123_v16, %v7122_v27  ;;  %vm2364_vm15 = vmor %vm2362_vm14, %vm2363_vm12  ;;  %v7154_v27 = vld [vmem:[#allocation46_spill] sm:$0xff] }
 0x3f0   :  { %v4308_v49 = vpop.eup %4307  ;;  %v2331_v13 = vsel %vm2328_vm4, %v2330_v42, %v2326_v58  ;;  %v2345_v50 = vsel %vm2344_vm6, %v4300_v24, %v2341_v30  ;;  %v2359_v47 = vsub.f32 1.0, %v2358_v0  ;;  %v2380_v3 = vadd.f32 1.0, %v4306_v55 }
 0x3f1   :  { %v2350_v6 = vsel %vm2347_vm7, %v2349_v35, %v2345_v50  ;;  %v2373_v10 = vmul.f32 %v4304_v57, %v2331_v13  ;;  %v2399_v5 = vadd.f32 1.0, %v4308_v49  ;;  %v2368_v35 = vand.u32 2147483648, %v6347_v14 }
 0x3f2   :  { %v2372_v17 = vmul.f32 %v2350_v6, %v6231_v18  ;;  %v2360_v21 = vmul.f32 %v4302_v61, %v2359_v47  ;;  %4311 = vrcp.f32 %v2380_v3  ;;  %v2295_v19 = vpop.f32.mrf.mxu2  ;;  %v2308_v53 = vpop.f32.mrf.mxu3  ;;  %v2366_v18 = vand.u32 2147483647, %v6347_v14 }
 0x3f3   :  { %4313 = vrcp.f32 %v2399_v5  ;;  %v2312_v53 = vadd.f32 %v2293_v43, %v656_v41  ;;  %v2369_v55 = vor.u32 1.1754944e-38, %v2368_v35  ;;  %v2411_v47 = vand.u32 2147483648, %v2399_v5 }
 0x3f4   :  { %v6354_v52 = vadd.f32 %v2373_v10, %v2372_v17  ;;  %v2361_v48 = vadd.f32 %v4302_v61, %v2360_v21  ;;  %vm2367_vm1 = vcmp.eq.f32.partialorder %v2366_v18, 8.507059e+37  ;;  %v2392_v6 = vand.u32 2147483648, %v2380_v3 }
 0x3f5   :  { %v4310_v40 = vpop.eup %4309  ;;  %v2390_v14 = vand.u32 2147483647, %v2380_v3  ;;  %vm2386_vm6 = vweird.f32 %v2380_v3  ;;  %vm2405_vm7 = vweird.f32 %v2399_v5 }
 0x3f6   :  { %4315 = vtanh.f32 %v6354_v52  ;;  %v6360_v0 = vadd.f32 1.0, %v4310_v40  ;;  %v2365_v30 = vsel %vm2364_vm15, %v4302_v61, %v2361_v48  ;;  %v2409_v40 = vand.u32 2147483647, %v2399_v5 }
 0x3f7   :  { %v2370_v10 = vsel %vm2367_vm1, %v2369_v55, %v2365_v30  ;;  %v2393_v48 = vor.u32 1.1754944e-38, %v2392_v6  ;;  %vm2391_vm15 = vcmp.eq.f32.partialorder %v2390_v14, 8.507059e+37 }
 0x3f8   :  { %v4312_v24 = vpop.eup %4311  ;;  %4317 = vrcp.f32 %v6360_v0  ;;  %vm2410_vm1 = vcmp.eq.f32.partialorder %v2409_v40, 8.507059e+37  ;;  %v7129_v40 = vld [vmem:[#allocation21_spill] sm:$0xff] }
 0x3f9   :  { %v4314_v57 = vpop.eup %4313  ;;  %v2382_v42 = vmul.f32 %v4312_v24, %v2380_v3  ;;  %4319 = vtanh.f32 %v2312_v53  ;;  %vm2387_vm3 = vweird.f32 %v4312_v24 }
 0x3fa   :  { %v2401_v58 = vmul.f32 %v4314_v57, %v2399_v5  ;;  %vm2406_vm4 = vweird.f32 %v4314_v57  ;;  %vm2388_vm12 = vmor %vm2386_vm6, %vm2387_vm3  ;;  %vm2425_vm3 = vweird.f32 %v6360_v0 }
 0x3fb   :  { %v2383_v49 = vsub.f32 1.0, %v2382_v42  ;;  %vm2407_vm14 = vmor %vm2405_vm7, %vm2406_vm4  ;;  %v2412_v42 = vor.u32 1.1754944e-38, %v2411_v47 }
 0x3fc   :  { %v4316_v13 = vpop.eup %4315  ;;  %v2402_v50 = vsub.f32 1.0, %v2401_v58 }
 0x3fd   :  { %v2384_v17 = vmul.f32 %v4312_v24, %v2383_v49  ;;  %v2376_v43 = vmul.f32 %v4316_v13, %v2370_v10  ;;  %v2431_v13 = vand.u32 2147483648, %v6360_v0 }
 0x3fe   :  { %v4318_v21 = vpop.eup %4317  ;;  %v2403_v19 = vmul.f32 %v4314_v57, %v2402_v50 }
 0x3ff   :  { %v2385_v16 = vadd.f32 %v4312_v24, %v2384_v17  ;;  %v2421_v61 = vmul.f32 %v4318_v21, %v6360_v0  ;;  %v6369_v41 = vsel %vm2190_vm10, %v2376_v43, %v6258_v62  ;;  %v2446_v18 = vpack.c.bf16 %v2376_v43, %v2376_v43  ;;  %v4320_v53 = vpop.eup %4319  ;;  %v7126_v43 = vld [vmem:[#allocation18_spill] sm:$0xff] }
 0x400   :  { %v2404_v35 = vadd.f32 %v4314_v57, %v2403_v19  ;;  %vm2426_vm10 = vweird.f32 %v4318_v21  ;;  %v2432_v47 = vor.u32 1.1754944e-38, %v2431_v13  ;;  %v7128_v19 = vld [vmem:[#allocation20_spill] sm:$0xff]  ;;  %v7146_v13 = vld [vmem:[#allocation38_spill] sm:$0xff] }
 0x401   :  { %v2389_v30 = vsel %vm2388_vm12, %v4312_v24, %v2385_v16  ;;  %v2422_v55 = vsub.f32 1.0, %v2421_v61  ;;  %2455 = vmatmul.bf16.vlgmr.msra.gmra.mxu0 %v2446_v18  ;;  %2468 = vmatmul.bf16.vlgmr.msra.gmra.mxu1 %v2446_v18  ;;  %vm2427_vm4 = vmor %vm2425_vm3, %vm2426_vm10  ;;  %v7130_v16 = vld [vmem:[#allocation22_spill] sm:$0xff]  ;;  %v7131_v61 = vld [vmem:[#allocation23_spill] sm:$0xff] }
 0x402   :  { %v2394_v58 = vsel %vm2391_vm15, %v2393_v48, %v2389_v30  ;;  %v2408_v3 = vsel %vm2407_vm14, %v4314_v57, %v2404_v35  ;;  %2481 = vmatmul.bf16.vlgmr.msra.gmra.mxu2 %v2446_v18  ;;  %2494 = vmatmul.bf16.vlgmr.msra.gmra.mxu3 %v2446_v18  ;;  %v7132_v48 = vld [vmem:[#allocation24_spill] sm:$0xff]  ;;  %v7133_v35 = vld [vmem:[#allocation25_spill] sm:$0xff]  ;;  %v7134_v18 = vld [vmem:[#allocation26_spill] sm:$0xff] }
 0x403   :  { %v2413_v49 = vsel %vm2410_vm1, %v2412_v42, %v2408_v3  ;;  %v2436_v31 = vmul.f32 %v4320_v53, %v2394_v58  ;;  %v2423_v62 = vmul.f32 %v4318_v21, %v2422_v55  ;;  %2697 = vmatpush.bf16.msra.mxu0 %v4913_v7  ;;  %2710 = vmatpush.bf16.msra.mxu1 %v4924_v11  ;;  %v7135_v53 = vld [vmem:[#allocation27_spill] sm:$0xff]  ;;  %v7136_v42 = vld [vmem:[#allocation28_spill] sm:$0xff]  ;;  %v7137_v30 = vld [vmem:[#allocation29_spill] sm:$0xff] }
 0x404   :  { %v2435_v5 = vmul.f32 %v2413_v49, %v6265_v1  ;;  %2723 = vmatpush.bf16.msra.mxu2 %v4961_v25  ;;  %2736 = vmatpush.bf16.msra.mxu3 %v4926_v12  ;;  %v2429_v1 = vand.u32 2147483647, %v6360_v0  ;;  %v7138_v55 = vld [vmem:[#allocation30_spill] sm:$0xff]  ;;  %v7139_v58 = vld [vmem:[#allocation31_spill] sm:$0xff]  ;;  %v7140_v3 = vld [vmem:[#allocation32_spill] sm:$0xff] }
 0x405   :  { %v2424_v57 = vadd.f32 %v4318_v21, %v2423_v62  ;;  %v7141_v49 = vld [vmem:[#allocation33_spill] sm:$0xff]  ;;  %v7143_v62 = vld [vmem:[#allocation35_spill] sm:$0xff] }
 0x406   :  { %v6376_v24 = vadd.f32 %v2436_v31, %v2435_v5  ;;  %vm2430_vm6 = vcmp.eq.f32.partialorder %v2429_v1, 8.507059e+37  ;;  %v7142_v31 = vld [vmem:[#allocation34_spill] sm:$0xff]  ;;  %v7144_v5 = vld [vmem:[#allocation36_spill] sm:$0xff]  ;;  %v7147_v1 = vld [vmem:[#allocation39_spill] sm:$0xff] }
 0x407   :  { %2698 = vmatpush.bf16.msra.mxu0 %v6940_v33  ;;  %2711 = vmatpush.bf16.msra.mxu1 %v6941_v4  ;;  %v2428_v50 = vsel %vm2427_vm4, %v4318_v21, %v2424_v57  ;;  %v7127_v21 = vld [vmem:[#allocation19_spill] sm:$0xff]  ;;  %v7145_v57 = vld [vmem:[#allocation37_spill] sm:$0xff] }
 0x408   :  { %4321 = vtanh.f32 %v6376_v24  ;;  %2724 = vmatpush.bf16.msra.mxu2 %v6942_v60  ;;  %2737 = vmatpush.bf16.msra.mxu3 %v6943_v56  ;;  %v2433_v10 = vsel %vm2430_vm6, %v2432_v47, %v2428_v50  ;;  %v7148_v50 = vld [vmem:[#allocation40_spill] sm:$0xff]  ;;  %v7149_v47 = vld [vmem:[#allocation41_spill] sm:$0xff] }
 0x40b   :  { %2699 = vmatpush.bf16.msra.mxu0 %v6944_v20  ;;  %2712 = vmatpush.bf16.msra.mxu1 %v4996_v34 }
 0x40c   :  { %2725 = vmatpush.bf16.msra.mxu2 %v6945_v32  ;;  %2738 = vmatpush.bf16.msra.mxu3 %v4998_v36 }
 0x40e   :  { %v4322_v6 = vpop.eup %4321 }
 0x40f   :  { %v2439_v17 = vmul.f32 %v4322_v6, %v2433_v10  ;;  %2700 = vmatpush.bf16.msra.mxu0 %v5023_v44  ;;  %2713 = vmatpush.bf16.msra.mxu1 %v5025_v45  ;;  %v7150_v6 = vld [vmem:[#allocation42_spill] sm:$0xff]  ;;  %v7151_v10 = vld [vmem:[#allocation43_spill] sm:$0xff] }
 0x410   :  { %2726 = vmatpush.bf16.msra.mxu2 %v5055_v54  ;;  %2739 = vmatpush.bf16.msra.mxu3 %v6946_v63 }
 0x411   :  { %v6395_v0 = vsel %vm2183_vm2, %v2439_v17, %v6287_v51  ;;  %v2507_v14 = vpack.c.bf16 %v2439_v17, %v2439_v17  ;;  %v7125_v51 = vld [vmem:[#allocation17_spill] sm:$0xff]  ;;  %v7152_v17 = vld [vmem:[#allocation44_spill] sm:$0xff] }
 0x413   :  { %2516 = vmatmul.bf16.vlgmr.msrb.gmra.mxu0 %v2507_v14  ;;  %2529 = vmatmul.bf16.vlgmr.msrb.gmra.mxu1 %v2507_v14 }
 0x414   :  { %2542 = vmatmul.bf16.vlgmr.msrb.gmra.mxu2 %v2507_v14  ;;  %2555 = vmatmul.bf16.vlgmr.msrb.gmra.mxu3 %v2507_v14  ;;  %v7153_v14 = vld [vmem:[#allocation45_spill] sm:$0xff] }
 0x415   :  { %2701 = vmatpush.bf16.msra.mxu0 %v6947_v22  ;;  %2714 = vmatpush.bf16.msra.mxu1 %v6948_v26 }
 0x416   :  { %2727 = vmatpush.bf16.msra.mxu2 %v6949_v59  ;;  %2740 = vmatpush.bf16.msra.mxu3 %v5095_v2 }
 0x419   :  { %2702 = vmatpush.bf16.msra.mxu0 %v5108_v8  ;;  %2715 = vmatpush.bf16.msra.mxu1 %v5110_v9 }
 0x41a   :  { %2728 = vmatpush.bf16.msra.mxu2 %v5122_v15  ;;  %2741 = vmatpush.bf16.msra.mxu3 %v5133_v23 }
 0x41d   :  { %2703 = vmatpush.bf16.msra.mxu0 %v5145_v29  ;;  %2716 = vmatpush.bf16.msra.mxu1 %v5158_v37 }
 0x41e   :  { %2729 = vmatpush.bf16.msra.mxu2 %v5160_v38  ;;  %2742 = vmatpush.bf16.msra.mxu3 %v5163_v39 }
 0x421   :  { %2704 = vmatpush.bf16.msra.mxu0 %v5179_v46  ;;  %2717 = vmatpush.bf16.msra.mxu1 %v7124_v28 }
 0x422   :  { %2730 = vmatpush.bf16.msra.mxu2 %v7125_v51  ;;  %2743 = vmatpush.bf16.msra.mxu3 %v7126_v43 }
 0x425   :  { %2758 = vmatpush.bf16.msrb.mxu0 %v7127_v21  ;;  %2771 = vmatpush.bf16.msrb.mxu1 %v7128_v19 }
 0x426   :  { %2784 = vmatpush.bf16.msrb.mxu2 %v7129_v40  ;;  %2797 = vmatpush.bf16.msrb.mxu3 %v7130_v16 }
 0x429   :  { %2759 = vmatpush.bf16.msrb.mxu0 %v7131_v61  ;;  %2772 = vmatpush.bf16.msrb.mxu1 %v7132_v48 }
 0x42a   :  { %2785 = vmatpush.bf16.msrb.mxu2 %v7133_v35  ;;  %2798 = vmatpush.bf16.msrb.mxu3 %v7134_v18 }
 0x42d   :  { %2760 = vmatpush.bf16.msrb.mxu0 %v7135_v53  ;;  %2773 = vmatpush.bf16.msrb.mxu1 %v7136_v42 }
 0x42e   :  { %2786 = vmatpush.bf16.msrb.mxu2 %v7137_v30  ;;  %2799 = vmatpush.bf16.msrb.mxu3 %v7138_v55  ;;  %v7164_v55 = vld [vmem:[#allocation74_spill] sm:$0xff] }
 0x431   :  { %2761 = vmatpush.bf16.msrb.mxu0 %v7139_v58  ;;  %2774 = vmatpush.bf16.msrb.mxu1 %v7140_v3 }
 0x432   :  { %2787 = vmatpush.bf16.msrb.mxu2 %v7141_v49  ;;  %2800 = vmatpush.bf16.msrb.mxu3 %v7142_v31  ;;  %v7162_v31 = vld [vmem:[#allocation72_spill] sm:$0xff] }
 0x435   :  { %2762 = vmatpush.bf16.msrb.mxu0 %v7143_v62  ;;  %2775 = vmatpush.bf16.msrb.mxu1 %v7144_v5  ;;  %v7155_v5 = vld [vmem:[#allocation47_spill] sm:$0xff] }
 0x436   :  { %2788 = vmatpush.bf16.msrb.mxu2 %v7145_v57  ;;  %2801 = vmatpush.bf16.msrb.mxu3 %v7146_v13  ;;  %v7156_v57 = vld [vmem:[#allocation48_spill] sm:$0xff]  ;;  %v7157_v13 = vld [vmem:[#allocation49_spill] sm:$0xff] }
 0x439   :  { %2763 = vmatpush.bf16.msrb.mxu0 %v7147_v1  ;;  %2776 = vmatpush.bf16.msrb.mxu1 %v7148_v50  ;;  %v7158_v1 = vld [vmem:[#allocation50_spill] sm:$0xff]  ;;  %v7159_v50 = vld [vmem:[#allocation53_spill] sm:$0xff] }
 0x43a   :  { %2789 = vmatpush.bf16.msrb.mxu2 %v7149_v47  ;;  %2802 = vmatpush.bf16.msrb.mxu3 %v7150_v6  ;;  %v7160_v47 = vld [vmem:[#allocation70_spill] sm:$0xff]  ;;  %v7161_v6 = vld [vmem:[#allocation55_spill] sm:$0xff] }
 0x43b   :  { %v487_v62 = vadd.f32 %v7160_v47, %v7159_v50 }
 0x43d   :  { %2764 = vmatpush.bf16.msrb.mxu0 %v7151_v10  ;;  %2777 = vmatpush.bf16.msrb.mxu1 %v7152_v17  ;;  %v516_v10 = vadd.f32 %v7162_v31, %v7161_v6 }
 0x43e   :  { %2790 = vmatpush.bf16.msrb.mxu2 %v7153_v14  ;;  %2803 = vmatpush.bf16.msrb.mxu3 %v7154_v27 }
 0x441   :  { %2765 = vmatpush.bf16.msrb.mxu0 %v7155_v5  ;;  %2778 = vmatpush.bf16.msrb.mxu1 %v7156_v57  ;;  %v7163_v5 = vld [vmem:[#allocation60_spill] sm:$0xff] }
 0x442   :  { %2791 = vmatpush.bf16.msrb.mxu2 %v7157_v13  ;;  %2804 = vmatpush.bf16.msrb.mxu3 %v7158_v1  ;;  %v574_v57 = vadd.f32 %v7164_v55, %v7163_v5 }
 0x47e   :  { %v2456_v49 = vpop.f32.mrf.mxu0  ;;  %v2469_v17 = vpop.f32.mrf.mxu1 }
 0x47f   :  { %v2499_v3 = vadd.f32 %v2456_v49, %v487_v62  ;;  %v2500_v14 = vadd.f32 %v2469_v17, %v516_v10  ;;  %v7166_v62 = vld [vmem:[#allocation73_spill] sm:$0xff] }
 0x481   :  { %v3927_v58 = vmul.f32 -1.442695, %v2499_v3  ;;  %v3928_v27 = vmul.f32 -1.442695, %v2500_v14 }
 0x483   :  { %4323 = vpow2.f32 %v3927_v58  ;;  %v7165_v58 = vld [vmem:[#allocation59_spill] sm:$0xff] }
 0x484   :  { %4325 = vpow2.f32 %v3928_v27  ;;  %v545_v10 = vadd.f32 %v7166_v62, %v7165_v58 }
 0x485   :  { %v2482_v13 = vpop.f32.mrf.mxu2  ;;  %v2495_v30 = vpop.f32.mrf.mxu3 }
 0x486   :  { %v2502_v1 = vadd.f32 %v2495_v30, %v574_v57  ;;  %v2458_v42 = vpop.f32.mrf.mxu0  ;;  %v2471_v53 = vpop.f32.mrf.mxu1  ;;  %v2501_v14 = vadd.f32 %v2482_v13, %v545_v10  ;;  %v7167_v30 = vld [vmem:[#allocation95_spill] sm:$0xff] }
 0x487   :  { %v7168_v53 = vld [vmem:[#allocation96_spill] sm:$0xff] }
 0x488   :  { %v3929_v47 = vmul.f32 -1.442695, %v2502_v1 }
 0x489   :  { %v4324_v50 = vpop.eup %4323 }
 0x48a   :  { %v4326_v18 = vpop.eup %4325  ;;  %v2567_v31 = vadd.f32 1.0, %v4324_v50  ;;  %4327 = vpow2.f32 %v3929_v47 }
 0x48b   :  { %v2586_v6 = vadd.f32 1.0, %v4326_v18 }
 0x48c   :  { %4329 = vrcp.f32 %v2567_v31  ;;  %v2577_v62 = vand.u32 2147483647, %v2567_v31  ;;  %v2579_v10 = vand.u32 2147483648, %v2567_v31  ;;  %vm2573_vm14 = vweird.f32 %v2567_v31 }
 0x48d   :  { %4331 = vrcp.f32 %v2586_v6  ;;  %v2484_v3 = vpop.f32.mrf.mxu2  ;;  %v2497_v49 = vpop.f32.mrf.mxu3  ;;  %v2598_v13 = vand.u32 2147483648, %v2586_v6  ;;  %vm2592_vm12 = vweird.f32 %v2586_v6 }
 0x48e   :  { %vm2578_vm1 = vcmp.eq.f32.partialorder %v2577_v62, 8.507059e+37 }
 0x48f   :  { %v2599_v19 = vor.u32 1.1754944e-38, %v2598_v13 }
 0x490   :  { %v2517_v55 = vpop.f32.mrf.mxu0  ;;  %v2530_v27 = vpop.f32.mrf.mxu1 }
 0x491   :  { %v4328_v17 = vpop.eup %4327  ;;  %v2560_v42 = vadd.f32 %v2517_v55, %v7167_v30  ;;  %v2561_v57 = vadd.f32 %v2530_v27, %v7168_v53  ;;  %v2596_v30 = vand.u32 2147483647, %v2586_v6 }
 0x492   :  { %v6457_v1 = vadd.f32 1.0, %v4328_v17  ;;  %v4330_v50 = vpop.eup %4329 }
 0x493   :  { %v3930_v47 = vmul.f32 -1.442695, %v2560_v42  ;;  %v3931_v18 = vmul.f32 -1.442695, %v2561_v57  ;;  %v4332_v5 = vpop.eup %4331  ;;  %v2569_v35 = vmul.f32 %v4330_v50, %v2567_v31  ;;  %vm2574_vm2 = vweird.f32 %v4330_v50  ;;  %v7169_v42 = vld [vmem:[#allocation99_spill] sm:$0xff] }
 0x494   :  { %4333 = vrcp.f32 %v6457_v1  ;;  %v2588_v3 = vmul.f32 %v4332_v5, %v2586_v6  ;;  %vm2593_vm7 = vweird.f32 %v4332_v5  ;;  %vm2575_vm15 = vmor %vm2573_vm14, %vm2574_vm2  ;;  %vm2597_vm3 = vcmp.eq.f32.partialorder %v2596_v30, 8.507059e+37 }
 0x495   :  { %4335 = vtanh.f32 %v2501_v14  ;;  %v2570_v49 = vsub.f32 1.0, %v2569_v35  ;;  %vm2594_vm10 = vmor %vm2592_vm12, %vm2593_vm7  ;;  %vm2612_vm6 = vweird.f32 %v6457_v1 }
 0x496   :  { %4337 = vpow2.f32 %v3930_v47  ;;  %v2589_v58 = vsub.f32 1.0, %v2588_v3 }
 0x497   :  { %4339 = vpow2.f32 %v3931_v18  ;;  %v2543_v55 = vpop.f32.mrf.mxu2  ;;  %v2556_v27 = vpop.f32.mrf.mxu3  ;;  %v2571_v17 = vmul.f32 %v4330_v50, %v2570_v49  ;;  %v2580_v18 = vor.u32 1.1754944e-38, %v2579_v10 }
 0x498   :  { %v2563_v53 = vadd.f32 %v2556_v27, %v7169_v42  ;;  %v2519_v57 = vpop.f32.mrf.mxu0  ;;  %v2532_v48 = vpop.f32.mrf.mxu1  ;;  %v2590_v61 = vmul.f32 %v4332_v5, %v2589_v58 }
 0x499   :  { %v2572_v35 = vadd.f32 %v4330_v50, %v2571_v17 }
 0x49a   :  { %v4334_v16 = vpop.eup %4333  ;;  %v3932_v14 = vmul.f32 -1.442695, %v2563_v53  ;;  %v2591_v3 = vadd.f32 %v4332_v5, %v2590_v61 }
 0x49b   :  { %v4336_v47 = vpop.eup %4335  ;;  %v2608_v49 = vmul.f32 %v4334_v16, %v6457_v1  ;;  %v2576_v27 = vsel %vm2575_vm15, %v4330_v50, %v2572_v35  ;;  %vm2613_vm4 = vweird.f32 %v4334_v16 }
 0x49c   :  { %v4338_v40 = vpop.eup %4337  ;;  %4341 = vpow2.f32 %v3932_v14  ;;  %v2581_v58 = vsel %vm2578_vm1, %v2580_v18, %v2576_v27  ;;  %v2595_v42 = vsel %vm2594_vm10, %v4332_v5, %v2591_v3  ;;  %v2618_v5 = vand.u32 2147483648, %v6457_v1  ;;  %vm2614_vm2 = vmor %vm2612_vm6, %vm2613_vm4 }
 0x49d   :  { %v4340_v48 = vpop.eup %4339  ;;  %v2609_v6 = vsub.f32 1.0, %v2608_v49  ;;  %v2630_v17 = vadd.f32 1.0, %v4338_v40  ;;  %v2600_v31 = vsel %vm2597_vm3, %v2599_v19, %v2595_v42  ;;  %v2623_v53 = vmul.f32 %v4336_v47, %v2581_v58  ;;  %v7170_v19 = vld [vmem:[#allocation97_spill] sm:$0xff] }
 0x49e   :  { %v2649_v57 = vadd.f32 1.0, %v4340_v48  ;;  %v2622_v62 = vmul.f32 %v2600_v31, %v6354_v52  ;;  %v2616_v52 = vand.u32 2147483647, %v6457_v1  ;;  %v2562_v30 = vadd.f32 %v2543_v55, %v7170_v19 }
 0x49f   :  { %v2610_v10 = vmul.f32 %v4334_v16, %v2609_v6  ;;  %4343 = vrcp.f32 %v2630_v17  ;;  %v2545_v61 = vpop.f32.mrf.mxu2  ;;  %v2558_v21 = vpop.f32.mrf.mxu3  ;;  %v2619_v18 = vor.u32 1.1754944e-38, %v2618_v5  ;;  %v2642_v42 = vand.u32 2147483648, %v2630_v17 }
 0x4a0   :  { %4345 = vrcp.f32 %v2649_v57  ;;  %v6463_v43 = vadd.f32 %v2623_v53, %v2622_v62  ;;  %vm2617_vm7 = vcmp.eq.f32.partialorder %v2616_v52, 8.507059e+37  ;;  %v2661_v58 = vand.u32 2147483648, %v2649_v57 }
 0x4a1   :  { %v2611_v13 = vadd.f32 %v4334_v16, %v2610_v10  ;;  %v2640_v55 = vand.u32 2147483647, %v2630_v17  ;;  %v2659_v10 = vand.u32 2147483647, %v2649_v57  ;;  %vm2636_vm15 = vweird.f32 %v2630_v17 }
 0x4a2   :  { %v4342_v50 = vpop.eup %4341  ;;  %4347 = vtanh.f32 %v6463_v43  ;;  %vm2655_vm1 = vweird.f32 %v2649_v57 }
 0x4a3   :  { %v6467_v40 = vadd.f32 1.0, %v4342_v50  ;;  %v2615_v47 = vsel %vm2614_vm2, %v4334_v16, %v2611_v13  ;;  %v2643_v13 = vor.u32 1.1754944e-38, %v2642_v42  ;;  %vm2641_vm4 = vcmp.eq.f32.partialorder %v2640_v55, 8.507059e+37  ;;  %v7199_v42 = vld [vmem:[#allocation44_spill] sm:$0xff]  ;;  %v7202_v55 = vld [vmem:[#allocation47_spill] sm:$0xff] }
 0x4a4   :  { %v2620_v6 = vsel %vm2617_vm7, %v2619_v18, %v2615_v47  ;;  %vm2660_vm6 = vcmp.eq.f32.partialorder %v2659_v10, 8.507059e+37 }
 0x4a5   :  { %v4344_v35 = vpop.eup %4343  ;;  %4349 = vrcp.f32 %v6467_v40  ;;  %vm2675_vm2 = vweird.f32 %v6467_v40 }
 0x4a6   :  { %v4346_v21 = vpop.eup %4345  ;;  %v2632_v14 = vmul.f32 %v4344_v35, %v2630_v17  ;;  %4351 = vtanh.f32 %v2562_v30  ;;  %vm2637_vm12 = vweird.f32 %v4344_v35 }
 0x4a7   :  { %v2651_v3 = vmul.f32 %v4346_v21, %v2649_v57  ;;  %vm2656_vm14 = vweird.f32 %v4346_v21  ;;  %vm2638_vm10 = vmor %vm2636_vm15, %vm2637_vm12 }
 0x4a8   :  { %v2633_v49 = vsub.f32 1.0, %v2632_v14  ;;  %v4348_v27 = vpop.eup %4347  ;;  %vm2657_vm3 = vmor %vm2655_vm1, %vm2656_vm14  ;;  %v2662_v14 = vor.u32 1.1754944e-38, %v2661_v58  ;;  %v7198_v58 = vld [vmem:[#allocation43_spill] sm:$0xff] }
 0x4a9   :  { %v2652_v48 = vsub.f32 1.0, %v2651_v3  ;;  %v2626_v31 = vmul.f32 %v4348_v27, %v2620_v6  ;;  %v7200_v6 = vld [vmem:[#allocation45_spill] sm:$0xff] }
 0x4aa   :  { %v2634_v1 = vmul.f32 %v4344_v35, %v2633_v49 }
 0x4ab   :  { %v4350_v53 = vpop.eup %4349  ;;  %v2653_v62 = vmul.f32 %v4346_v21, %v2652_v48  ;;  %v2696_v50 = vpack.c.bf16 %v2626_v31, %v2626_v31  ;;  %v6477_v19 = vsel %vm1928_vm0, %v2626_v31, %v6369_v41  ;;  %v7203_v31 = vld [vmem:[#allocation48_spill] sm:$0xff] }
 0x4ac   :  { %v2635_v61 = vadd.f32 %v4344_v35, %v2634_v1  ;;  %v2671_v16 = vmul.f32 %v4350_v53, %v6467_v40  ;;  %v4352_v30 = vpop.eup %4351  ;;  %vm2676_vm0 = vweird.f32 %v4350_v53  ;;  %v7201_v1 = vld [vmem:[#allocation46_spill] sm:$0xff] }
 0x4ad   :  { %v2654_v5 = vadd.f32 %v4346_v21, %v2653_v62  ;;  %2705 = vmatmul.bf16.vlgmr.msra.gmra.mxu0 %v2696_v50  ;;  %2718 = vmatmul.bf16.vlgmr.msra.gmra.mxu1 %v2696_v50  ;;  %vm2677_vm7 = vmor %vm2675_vm2, %vm2676_vm0  ;;  %v7205_v62 = vld [vmem:[#allocation50_spill] sm:$0xff] }
 0x4ae   :  { %v2639_v47 = vsel %vm2638_vm10, %v4344_v35, %v2635_v61  ;;  %v2672_v18 = vsub.f32 1.0, %v2671_v16  ;;  %2731 = vmatmul.bf16.vlgmr.msra.gmra.mxu2 %v2696_v50  ;;  %2744 = vmatmul.bf16.vlgmr.msra.gmra.mxu3 %v2696_v50  ;;  %v7206_v16 = vld [vmem:[#allocation75_spill] sm:$0xff] }
 0x4af   :  { %v2644_v17 = vsel %vm2641_vm4, %v2643_v13, %v2639_v47  ;;  %v2658_v3 = vsel %vm2657_vm3, %v4346_v21, %v2654_v5  ;;  %2947 = vmatpush.bf16.msra.mxu0 %v4913_v7  ;;  %2960 = vmatpush.bf16.msra.mxu1 %v4924_v11  ;;  %v2681_v7 = vand.u32 2147483648, %v6467_v40  ;;  %v2679_v11 = vand.u32 2147483647, %v6467_v40  ;;  %v7196_v40 = vld [vmem:[#allocation41_spill] sm:$0xff]  ;;  %v7197_v21 = vld [vmem:[#allocation42_spill] sm:$0xff]  ;;  %v7207_v13 = vld [vmem:[#allocation76_spill] sm:$0xff] }
 0x4b0   :  { %v2663_v57 = vsel %vm2660_vm6, %v2662_v14, %v2658_v3  ;;  %v2686_v49 = vmul.f32 %v4352_v30, %v2644_v17  ;;  %v2673_v27 = vmul.f32 %v4350_v53, %v2672_v18  ;;  %2973 = vmatpush.bf16.msra.mxu2 %v4961_v25  ;;  %2986 = vmatpush.bf16.msra.mxu3 %v4926_v12  ;;  %v7208_v18 = vld [vmem:[#allocation79_spill] sm:$0xff] }
 0x4b1   :  { %v2685_v41 = vmul.f32 %v2663_v57, %v6376_v24  ;;  %v2682_v25 = vor.u32 1.1754944e-38, %v2681_v7  ;;  %vm2680_vm12 = vcmp.eq.f32.partialorder %v2679_v11, 8.507059e+37  ;;  %v7192_v24 = vld [vmem:[#allocation37_spill] sm:$0xff] }
 0x4b2   :  { %v2674_v48 = vadd.f32 %v4350_v53, %v2673_v27 }
 0x4b3   :  { %v6484_v35 = vadd.f32 %v2686_v49, %v2685_v41  ;;  %2948 = vmatpush.bf16.msra.mxu0 %v6940_v33  ;;  %2961 = vmatpush.bf16.msra.mxu1 %v6941_v4 }
 0x4b4   :  { %2974 = vmatpush.bf16.msra.mxu2 %v6942_v60  ;;  %2987 = vmatpush.bf16.msra.mxu3 %v6943_v56  ;;  %v2678_v12 = vsel %vm2677_vm7, %v4350_v53, %v2674_v48  ;;  %v7204_v53 = vld [vmem:[#allocation49_spill] sm:$0xff] }
 0x4b5   :  { %4353 = vtanh.f32 %v6484_v35  ;;  %v2683_v4 = vsel %vm2680_vm12, %v2682_v25, %v2678_v12  ;;  %v7209_v25 = vld [vmem:[#allocation81_spill] sm:$0xff] }
 0x4b7   :  { %2949 = vmatpush.bf16.msra.mxu0 %v6944_v20  ;;  %2962 = vmatpush.bf16.msra.mxu1 %v4996_v34 }
 0x4b8   :  { %2975 = vmatpush.bf16.msra.mxu2 %v6945_v32  ;;  %2988 = vmatpush.bf16.msra.mxu3 %v4998_v36  ;;  %v7173_v36 = vld [vmem:[#allocation18_spill] sm:$0xff]  ;;  %v7187_v32 = vld [vmem:[#allocation32_spill] sm:$0xff] }
 0x4bb   :  { %v4354_v33 = vpop.eup %4353  ;;  %2950 = vmatpush.bf16.msra.mxu0 %v5023_v44  ;;  %2963 = vmatpush.bf16.msra.mxu1 %v5025_v45  ;;  %v7174_v44 = vld [vmem:[#allocation19_spill] sm:$0xff]  ;;  %v7175_v45 = vld [vmem:[#allocation20_spill] sm:$0xff] }
 0x4bc   :  { %v2689_v60 = vmul.f32 %v4354_v33, %v2683_v4  ;;  %2976 = vmatpush.bf16.msra.mxu2 %v5055_v54  ;;  %2989 = vmatpush.bf16.msra.mxu3 %v6946_v63  ;;  %v7176_v54 = vld [vmem:[#allocation21_spill] sm:$0xff]  ;;  %v7210_v33 = vld [vmem:[#allocation90_spill] sm:$0xff] }
 0x4bd   :  { %v7188_v63 = vld [vmem:[#allocation33_spill] sm:$0xff]  ;;  %v593_v4 = vadd.f32 %v7210_v33, %v7209_v25 }
 0x4be   :  { %v2757_v56 = vpack.c.bf16 %v2689_v60, %v2689_v60  ;;  %v6505_v20 = vsel %vm1921_vm13, %v2689_v60, %v6395_v0  ;;  %v7193_v0 = vld [vmem:[#allocation38_spill] sm:$0xff] }
 0x4bf   :  { %2951 = vmatpush.bf16.msra.mxu0 %v6947_v22  ;;  %2964 = vmatpush.bf16.msra.mxu1 %v6948_v26  ;;  %v7189_v22 = vld [vmem:[#allocation34_spill] sm:$0xff]  ;;  %v7190_v26 = vld [vmem:[#allocation35_spill] sm:$0xff] }
 0x4c0   :  { %2766 = vmatmul.bf16.vlgmr.msrb.gmra.mxu0 %v2757_v56  ;;  %2779 = vmatmul.bf16.vlgmr.msrb.gmra.mxu1 %v2757_v56  ;;  %v7211_v60 = vld [vmem:[#allocation82_spill] sm:$0xff] }
 0x4c1   :  { %2792 = vmatmul.bf16.vlgmr.msrb.gmra.mxu2 %v2757_v56  ;;  %2805 = vmatmul.bf16.vlgmr.msrb.gmra.mxu3 %v2757_v56  ;;  %v7212_v56 = vld [vmem:[#allocation92_spill] sm:$0xff] }
 0x4c2   :  { %2977 = vmatpush.bf16.msra.mxu2 %v6949_v59  ;;  %2990 = vmatpush.bf16.msra.mxu3 %v5095_v2  ;;  %v7177_v2 = vld [vmem:[#allocation22_spill] sm:$0xff]  ;;  %v7191_v59 = vld [vmem:[#allocation36_spill] sm:$0xff]  ;;  %v622_v34 = vadd.f32 %v7212_v56, %v7211_v60  ;;  %v7217_v60 = vld [vmem:[#allocation93_spill] sm:$0xff] }
 0x4c3   :  { %2952 = vmatpush.bf16.msra.mxu0 %v5108_v8  ;;  %2965 = vmatpush.bf16.msra.mxu1 %v5110_v9  ;;  %v7178_v8 = vld [vmem:[#allocation23_spill] sm:$0xff]  ;;  %v7179_v9 = vld [vmem:[#allocation24_spill] sm:$0xff] }
 0x4c6   :  { %2978 = vmatpush.bf16.msra.mxu2 %v5122_v15  ;;  %2991 = vmatpush.bf16.msra.mxu3 %v5133_v23  ;;  %v7180_v15 = vld [vmem:[#allocation25_spill] sm:$0xff]  ;;  %v7181_v23 = vld [vmem:[#allocation26_spill] sm:$0xff] }
 0x4c7   :  { %2953 = vmatpush.bf16.msra.mxu0 %v5145_v29  ;;  %2966 = vmatpush.bf16.msra.mxu1 %v5158_v37  ;;  %v7182_v29 = vld [vmem:[#allocation27_spill] sm:$0xff]  ;;  %v7183_v37 = vld [vmem:[#allocation28_spill] sm:$0xff] }
 0x4ca   :  { %2979 = vmatpush.bf16.msra.mxu2 %v5160_v38  ;;  %2992 = vmatpush.bf16.msra.mxu3 %v5163_v39  ;;  %v7184_v38 = vld [vmem:[#allocation29_spill] sm:$0xff]  ;;  %v7185_v39 = vld [vmem:[#allocation30_spill] sm:$0xff] }
 0x4cb   :  { %2954 = vmatpush.bf16.msra.mxu0 %v5179_v46  ;;  %2967 = vmatpush.bf16.msra.mxu1 %v7124_v28  ;;  %v7186_v46 = vld [vmem:[#allocation31_spill] sm:$0xff] }
 0x4cc   :  { %v7194_v28 = vld [vmem:[#allocation39_spill] sm:$0xff] }
 0x4ce   :  { %2980 = vmatpush.bf16.msra.mxu2 %v7125_v51  ;;  %2993 = vmatpush.bf16.msra.mxu3 %v7173_v36  ;;  %v7195_v51 = vld [vmem:[#allocation40_spill] sm:$0xff] }
 0x4cf   :  { %3008 = vmatpush.bf16.msrb.mxu0 %v7174_v44  ;;  %3021 = vmatpush.bf16.msrb.mxu1 %v7175_v45 }
 0x4d2   :  { %3034 = vmatpush.bf16.msrb.mxu2 %v7176_v54  ;;  %3047 = vmatpush.bf16.msrb.mxu3 %v7177_v2  ;;  %v7213_v54 = vld [vmem:[#allocation77_spill] sm:$0xff] }
 0x4d3   :  { %3009 = vmatpush.bf16.msrb.mxu0 %v7178_v8  ;;  %3022 = vmatpush.bf16.msrb.mxu1 %v7179_v9 }
 0x4d6   :  { %3035 = vmatpush.bf16.msrb.mxu2 %v7180_v15  ;;  %3048 = vmatpush.bf16.msrb.mxu3 %v7181_v23 }
 0x4d7   :  { %3010 = vmatpush.bf16.msrb.mxu0 %v7182_v29  ;;  %3023 = vmatpush.bf16.msrb.mxu1 %v7183_v37 }
 0x4da   :  { %3036 = vmatpush.bf16.msrb.mxu2 %v7184_v38  ;;  %3049 = vmatpush.bf16.msrb.mxu3 %v7185_v39  ;;  %v7214_v38 = vld [vmem:[#allocation88_spill] sm:$0xff]  ;;  %v7215_v39 = vld [vmem:[#allocation94_spill] sm:$0xff] }
 0x4db   :  { %3011 = vmatpush.bf16.msrb.mxu0 %v7186_v46  ;;  %3024 = vmatpush.bf16.msrb.mxu1 %v7187_v32  ;;  %v680_v46 = vadd.f32 %v7215_v39, %v7214_v38 }
 0x4de   :  { %3037 = vmatpush.bf16.msrb.mxu2 %v7188_v63  ;;  %3050 = vmatpush.bf16.msrb.mxu3 %v7189_v22 }
 0x4df   :  { %3012 = vmatpush.bf16.msrb.mxu0 %v7190_v26  ;;  %3025 = vmatpush.bf16.msrb.mxu1 %v7191_v59 }
 0x4e2   :  { %3038 = vmatpush.bf16.msrb.mxu2 %v7192_v24  ;;  %3051 = vmatpush.bf16.msrb.mxu3 %v7193_v0 }
 0x4e3   :  { %3013 = vmatpush.bf16.msrb.mxu0 %v7194_v28  ;;  %3026 = vmatpush.bf16.msrb.mxu1 %v7195_v51 }
 0x4e6   :  { %3039 = vmatpush.bf16.msrb.mxu2 %v7196_v40  ;;  %3052 = vmatpush.bf16.msrb.mxu3 %v7197_v21 }
 0x4e7   :  { %3014 = vmatpush.bf16.msrb.mxu0 %v7198_v58  ;;  %3027 = vmatpush.bf16.msrb.mxu1 %v7199_v42 }
 0x4ea   :  { %3040 = vmatpush.bf16.msrb.mxu2 %v7200_v6  ;;  %3053 = vmatpush.bf16.msrb.mxu3 %v7201_v1 }
 0x4eb   :  { %3015 = vmatpush.bf16.msrb.mxu0 %v7202_v55  ;;  %3028 = vmatpush.bf16.msrb.mxu1 %v7203_v31 }
 0x4ee   :  { %3041 = vmatpush.bf16.msrb.mxu2 %v7204_v53  ;;  %3054 = vmatpush.bf16.msrb.mxu3 %v7205_v62 }
 0x52a   :  { %v2706_v10 = vpop.f32.mrf.mxu0  ;;  %v2719_v61 = vpop.f32.mrf.mxu1 }
 0x52b   :  { %v2749_v50 = vadd.f32 %v2706_v10, %v7206_v16  ;;  %v2750_v5 = vadd.f32 %v2719_v61, %v7207_v13 }
 0x52d   :  { %v3933_v52 = vmul.f32 -1.442695, %v2749_v50  ;;  %v3934_v30 = vmul.f32 -1.442695, %v2750_v5 }
 0x52f   :  { %4355 = vpow2.f32 %v3933_v52 }
 0x530   :  { %4357 = vpow2.f32 %v3934_v30 }
 0x531   :  { %v2732_v14 = vpop.f32.mrf.mxu2  ;;  %v2745_v47 = vpop.f32.mrf.mxu3 }
 0x532   :  { %v2752_v17 = vadd.f32 %v2745_v47, %v7208_v18  ;;  %v2708_v3 = vpop.f32.mrf.mxu0  ;;  %v2721_v57 = vpop.f32.mrf.mxu1  ;;  %v2751_v2 = vadd.f32 %v2732_v14, %v7213_v54 }
 0x534   :  { %v3935_v49 = vmul.f32 -1.442695, %v2752_v17 }
 0x535   :  { %v4356_v27 = vpop.eup %4355 }
 0x536   :  { %v4358_v41 = vpop.eup %4357  ;;  %v2817_v48 = vadd.f32 1.0, %v4356_v27  ;;  %4359 = vpow2.f32 %v3935_v49 }
 0x537   :  { %v2836_v7 = vadd.f32 1.0, %v4358_v41 }
 0x538   :  { %4361 = vrcp.f32 %v2817_v48  ;;  %v2827_v0 = vand.u32 2147483647, %v2817_v48  ;;  %v2829_v28 = vand.u32 2147483648, %v2817_v48  ;;  %vm2823_vm15 = vweird.f32 %v2817_v48 }
 0x539   :  { %4363 = vrcp.f32 %v2836_v7  ;;  %v2734_v11 = vpop.f32.mrf.mxu2  ;;  %v2747_v12 = vpop.f32.mrf.mxu3  ;;  %v2848_v24 = vand.u32 2147483648, %v2836_v7  ;;  %v2846_v40 = vand.u32 2147483647, %v2836_v7  ;;  %vm2842_vm1 = vweird.f32 %v2836_v7 }
 0x53a   :  { %v2830_v62 = vor.u32 1.1754944e-38, %v2829_v28  ;;  %vm2828_vm4 = vcmp.eq.f32.partialorder %v2827_v0, 8.507059e+37 }
 0x53b   :  { %v2849_v50 = vor.u32 1.1754944e-38, %v2848_v24  ;;  %vm2847_vm6 = vcmp.eq.f32.partialorder %v2846_v40, 8.507059e+37 }
 0x53c   :  { %v4360_v36 = vpop.eup %4359 }
 0x53d   :  { %v2767_v44 = vpop.f32.mrf.mxu0  ;;  %v2780_v45 = vpop.f32.mrf.mxu1  ;;  %v6563_v8 = vadd.f32 1.0, %v4360_v36 }
 0x53e   :  { %v2810_v9 = vadd.f32 %v2767_v44, %v593_v4  ;;  %v2811_v15 = vadd.f32 %v2780_v45, %v622_v34  ;;  %v4362_v23 = vpop.eup %4361  ;;  %v7216_v4 = vld [vmem:[#allocation87_spill] sm:$0xff] }
 0x53f   :  { %v4364_v29 = vpop.eup %4363  ;;  %v2819_v37 = vmul.f32 %v4362_v23, %v2817_v48  ;;  %4365 = vrcp.f32 %v6563_v8  ;;  %vm2824_vm13 = vweird.f32 %v4362_v23  ;;  %v2868_v25 = vand.u32 2147483648, %v6563_v8 }
 0x540   :  { %v2838_v32 = vmul.f32 %v4364_v29, %v2836_v7  ;;  %4367 = vtanh.f32 %v2751_v2  ;;  %v3936_v22 = vmul.f32 -1.442695, %v2810_v9  ;;  %v3937_v26 = vmul.f32 -1.442695, %v2811_v15  ;;  %vm2825_vm10 = vmor %vm2823_vm15, %vm2824_vm13 }
 0x541   :  { %v2820_v63 = vsub.f32 1.0, %v2819_v37  ;;  %vm2843_vm14 = vweird.f32 %v4364_v29  ;;  %v651_v56 = vadd.f32 %v7217_v60, %v7216_v4  ;;  %vm2862_vm2 = vweird.f32 %v6563_v8 }
 0x542   :  { %v2839_v59 = vsub.f32 1.0, %v2838_v32  ;;  %4369 = vpow2.f32 %v3936_v22  ;;  %vm2844_vm3 = vmor %vm2842_vm1, %vm2843_vm14  ;;  %v2869_v54 = vor.u32 1.1754944e-38, %v2868_v25 }
 0x543   :  { %v2821_v51 = vmul.f32 %v4362_v23, %v2820_v63  ;;  %4371 = vpow2.f32 %v3937_v26 }
 0x544   :  { %v2793_v21 = vpop.f32.mrf.mxu2  ;;  %v2806_v58 = vpop.f32.mrf.mxu3  ;;  %v2840_v42 = vmul.f32 %v4364_v29, %v2839_v59 }
 0x545   :  { %v2813_v6 = vadd.f32 %v2806_v58, %v680_v46  ;;  %v2769_v1 = vpop.f32.mrf.mxu0  ;;  %v2782_v55 = vpop.f32.mrf.mxu1  ;;  %v2822_v53 = vadd.f32 %v4362_v23, %v2821_v51  ;;  %v2812_v36 = vadd.f32 %v2793_v21, %v651_v56 }
 0x546   :  { %v4366_v31 = vpop.eup %4365  ;;  %v2841_v10 = vadd.f32 %v4364_v29, %v2840_v42 }
 0x547   :  { %v2858_v61 = vmul.f32 %v4366_v31, %v6563_v8  ;;  %v4368_v16 = vpop.eup %4367  ;;  %v2826_v13 = vsel %vm2825_vm10, %v4362_v23, %v2822_v53  ;;  %v3938_v5 = vmul.f32 -1.442695, %v2813_v6  ;;  %vm2863_vm0 = vweird.f32 %v4366_v31 }
 0x548   :  { %v2831_v52 = vsel %vm2828_vm4, %v2830_v62, %v2826_v13  ;;  %v2845_v30 = vsel %vm2844_vm3, %v4364_v29, %v2841_v10  ;;  %v4370_v47 = vpop.eup %4369  ;;  %vm2864_vm7 = vmor %vm2862_vm2, %vm2863_vm0 }
 0x549   :  { %v2859_v14 = vsub.f32 1.0, %v2858_v61  ;;  %v2850_v18 = vsel %vm2847_vm6, %v2849_v50, %v2845_v30  ;;  %v2873_v17 = vmul.f32 %v4368_v16, %v2831_v52  ;;  %4373 = vpow2.f32 %v3938_v5  ;;  %v4372_v3 = vpop.eup %4371 }
 0x54a   :  { %v2872_v57 = vmul.f32 %v2850_v18, %v6463_v43  ;;  %v2880_v27 = vadd.f32 1.0, %v4370_v47  ;;  %v2899_v41 = vadd.f32 1.0, %v4372_v3  ;;  %v2866_v43 = vand.u32 2147483647, %v6563_v8 }
 0x54b   :  { %v2860_v49 = vmul.f32 %v4366_v31, %v2859_v14 }
 0x54c   :  { %v2795_v48 = vpop.f32.mrf.mxu2  ;;  %v2808_v7 = vpop.f32.mrf.mxu3  ;;  %v6571_v11 = vadd.f32 %v2873_v17, %v2872_v57  ;;  %4375 = vrcp.f32 %v2880_v27  ;;  %vm2867_vm12 = vcmp.eq.f32.partialorder %v2866_v43, 8.507059e+37  ;;  %v2911_v46 = vand.u32 2147483648, %v2899_v41  ;;  %v4148_v57 = vld [vmem:[%s6703_s6 + $0x38] sm:$0xff]  ;;  %v4145_v43 = vld [vmem:[%s6703_s6 + $0x20] sm:$0xff] }
 0x54d   :  { %v2861_v12 = vadd.f32 %v4366_v31, %v2860_v49  ;;  %4377 = vrcp.f32 %v2899_v41  ;;  %v2890_v32 = vand.u32 2147483647, %v2880_v27  ;;  %v2892_v8 = vand.u32 2147483648, %v2880_v27  ;;  %v4147_v49 = vld [vmem:[%s6703_s6 + $0x30] sm:$0xff] }
 0x54e   :  { %4379 = vtanh.f32 %v6571_v11  ;;  %v2909_v28 = vand.u32 2147483647, %v2899_v41  ;;  %vm2886_vm15 = vweird.f32 %v2880_v27  ;;  %vm2905_vm1 = vweird.f32 %v2899_v41  ;;  %v7222_v7 = vld [vmem:[#allocation55_spill] sm:$0xff] }
 0x54f   :  { %v4374_v33 = vpop.eup %4373  ;;  %v2865_v44 = vsel %vm2864_vm7, %v4366_v31, %v2861_v12  ;;  %v2893_v21 = vor.u32 1.1754944e-38, %v2892_v8  ;;  %v2912_v6 = vor.u32 1.1754944e-38, %v2911_v46  ;;  %v7223_v12 = vld [vmem:[#allocation80_spill] sm:$0xff]  ;;  %v4143_v46 = vld [vmem:[%s6703_s6 + $0x10] sm:$0xff] }
 0x550   :  { %v2919_v34 = vadd.f32 1.0, %v4374_v33  ;;  %v2870_v29 = vsel %vm2867_vm12, %v2869_v54, %v2865_v44  ;;  %vm2910_vm4 = vcmp.eq.f32.partialorder %v2909_v28, 8.507059e+37  ;;  %v521_v25 = vadd.f32 %v7223_v12, %v7222_v7  ;;  %v7224_v44 = vld [vmem:[#allocation60_spill] sm:$0xff]  ;;  %v4151_v7 = vld [vmem:[%s6703_s6 + $0x50] sm:$0xff] }
 0x552   :  { %v4376_v45 = vpop.eup %4375  ;;  %4381 = vrcp.f32 %v2919_v34  ;;  %v2931_v13 = vand.u32 2147483648, %v2919_v34  ;;  %vm2925_vm0 = vweird.f32 %v2919_v34  ;;  %v2929_v5 = vand.u32 2147483647, %v2919_v34 }
 0x553   :  { %v4378_v2 = vpop.eup %4377  ;;  %v2882_v9 = vmul.f32 %v4376_v45, %v2880_v27  ;;  %4383 = vtanh.f32 %v2812_v36  ;;  %vm2887_vm13 = vweird.f32 %v4376_v45  ;;  %v4146_v27 = vld [vmem:[%s6703_s6 + $0x28] sm:$0xff] }
 0x554   :  { %v4380_v15 = vpop.eup %4379  ;;  %v2901_v23 = vmul.f32 %v4378_v2, %v2899_v41  ;;  %vm2906_vm14 = vweird.f32 %v4378_v2  ;;  %vm2888_vm10 = vmor %vm2886_vm15, %vm2887_vm13  ;;  %v2932_v30 = vor.u32 1.1754944e-38, %v2931_v13  ;;  %vm2930_vm7 = vcmp.eq.f32.partialorder %v2929_v5, 8.507059e+37  ;;  %v7221_v41 = vld [vmem:[#allocation78_spill] sm:$0xff]  ;;  %v4152_v13 = vld [vmem:[%s6703_s6 + $0x58] sm:$0xff] }
 0x555   :  { %v2883_v37 = vsub.f32 1.0, %v2882_v9  ;;  %v2876_v38 = vmul.f32 %v4380_v15, %v2870_v29  ;;  %vm2907_vm3 = vmor %vm2905_vm1, %vm2906_vm14  ;;  %v4156_v9 = vld [vmem:[%s6703_s6 + $0x78] sm:$0xff] }
 0x556   :  { %v2902_v39 = vsub.f32 1.0, %v2901_v23 }
 0x557   :  { %v2884_v63 = vmul.f32 %v4376_v45, %v2883_v37  ;;  %v2946_v22 = vpack.c.bf16 %v2876_v38, %v2876_v38  ;;  %v6582_v59 = vsel %vm1666_vm11, %v2876_v38, %v6477_v19  ;;  %vm2891_vm11 = vcmp.eq.f32.partialorder %v2890_v32, 8.507059e+37  ;;  %v4155_v32 = vld [vmem:[%s6703_s6 + $0x70] sm:$0xff] }
 0x558   :  { %v4382_v24 = vpop.eup %4381  ;;  %v2903_v0 = vmul.f32 %v4378_v2, %v2902_v39 }
 0x559   :  { %v2885_v51 = vadd.f32 %v4376_v45, %v2884_v63  ;;  %v2921_v40 = vmul.f32 %v4382_v24, %v2919_v34  ;;  %2955 = vmatmul.bf16.vlgmr.msra.gmra.mxu0 %v2946_v22  ;;  %2968 = vmatmul.bf16.vlgmr.msra.gmra.mxu1 %v2946_v22  ;;  %v4384_v42 = vpop.eup %4383  ;;  %vm2926_vm6 = vweird.f32 %v4382_v24 }
 0x55a   :  { %v2904_v58 = vadd.f32 %v4378_v2, %v2903_v0  ;;  %2981 = vmatmul.bf16.vlgmr.msra.gmra.mxu2 %v2946_v22  ;;  %2994 = vmatmul.bf16.vlgmr.msra.gmra.mxu3 %v2946_v22  ;;  %vm2927_vm2 = vmor %vm2925_vm0, %vm2926_vm6  ;;  %v4154_v0 = vld [vmem:[%s6703_s6 + $0x68] sm:$0xff] }
 0x55b   :  { %v2889_v19 = vsel %vm2888_vm10, %v4376_v45, %v2885_v51  ;;  %v2922_v1 = vsub.f32 1.0, %v2921_v40  ;;  %3326 = vmatpush.bf16.msra.mxu0 %v4148_v57  ;;  %v7225_v45 = vld [vmem:[#allocation84_spill] sm:$0xff]  ;;  %3339 = vmatpush.bf16.msra.mxu1 %v4156_v9  ;;  %v7226_v40 = vld [vmem:[#allocation59_spill] sm:$0xff] }
 0x55c   :  { %v2894_v55 = vsel %vm2891_vm11, %v2893_v21, %v2889_v19  ;;  %v2908_v31 = vsel %vm2907_vm3, %v4378_v2, %v2904_v58  ;;  %v579_v54 = vadd.f32 %v7225_v45, %v7224_v44  ;;  %v4144_v2 = vld [vmem:[%s6703_s6 + $0x18] sm:$0xff]  ;;  %v7227_v21 = vld [vmem:[#allocation83_spill] sm:$0xff]  ;;  %v4153_v19 = vld [vmem:[%s6703_s6 + $0x60] sm:$0xff] }
 0x55d   :  { %v2913_v53 = vsel %vm2910_vm4, %v2912_v6, %v2908_v31  ;;  %v2936_v62 = vmul.f32 %v4384_v42, %v2894_v55  ;;  %v2923_v10 = vmul.f32 %v4382_v24, %v2922_v1  ;;  %v550_v58 = vadd.f32 %v7227_v21, %v7226_v40  ;;  %v4141_v6 = vld [vmem:[%s6703_s6] sm:$0xff]  ;;  %v4150_v45 = vld [vmem:[%s6703_s6 + $0x48] sm:$0xff] }
 0x55e   :  { %v2935_v61 = vmul.f32 %v2913_v53, %v6484_v35 }
 0x55f   :  { %v2924_v50 = vadd.f32 %v4382_v24, %v2923_v10  ;;  %3327 = vmatpush.bf16.msra.mxu0 %v4147_v49  ;;  %3340 = vmatpush.bf16.msra.mxu1 %v4155_v32 }
 0x560   :  { %v6585_v16 = vadd.f32 %v2936_v62, %v2935_v61 }
 0x561   :  { %v2928_v52 = vsel %vm2927_vm2, %v4382_v24, %v2924_v50  ;;  %v4142_v24 = vld [vmem:[%s6703_s6 + $0x8] sm:$0xff] }
 0x562   :  { %4385 = vtanh.f32 %v6585_v16  ;;  %v2933_v47 = vsel %vm2930_vm7, %v2932_v30, %v2928_v52  ;;  %v7228_v52 = vld [vmem:[#allocation85_spill] sm:$0xff] }
 0x563   :  { %3328 = vmatpush.bf16.msra.mxu0 %v4146_v27  ;;  %3341 = vmatpush.bf16.msra.mxu1 %v4154_v0 }
 0x567   :  { %3329 = vmatpush.bf16.msra.mxu0 %v4145_v43  ;;  %3342 = vmatpush.bf16.msra.mxu1 %v4153_v19 }
 0x568   :  { %v4386_v14 = vpop.eup %4385 }
 0x569   :  { %v2939_v18 = vmul.f32 %v4386_v14, %v2933_v47  ;;  %v7229_v14 = vld [vmem:[#allocation86_spill] sm:$0xff] }
 0x56b   :  { %v3007_v17 = vpack.c.bf16 %v2939_v18, %v2939_v18  ;;  %v6591_v35 = vsel %vm1659_vm9, %v2939_v18, %v6505_v20  ;;  %v7220_v20 = vld [vmem:[#allocation53_spill] sm:$0xff]  ;;  %3330 = vmatpush.bf16.msra.mxu0 %v4144_v2  ;;  %3343 = vmatpush.bf16.msra.mxu1 %v4152_v13 }
 0x56c   :  { %v492_v48 = vadd.f32 %v7221_v41, %v7220_v20 }
 0x56d   :  { %3016 = vmatmul.bf16.vlgmr.msrb.gmra.mxu0 %v3007_v17  ;;  %3029 = vmatmul.bf16.vlgmr.msrb.gmra.mxu1 %v3007_v17 }
 0x56e   :  { %3042 = vmatmul.bf16.vlgmr.msrb.gmra.mxu2 %v3007_v17  ;;  %3055 = vmatmul.bf16.vlgmr.msrb.gmra.mxu3 %v3007_v17 }
 0x56f   :  { %3331 = vmatpush.bf16.msra.mxu0 %v4143_v46  ;;  %3344 = vmatpush.bf16.msra.mxu1 %v4151_v7 }
 0x573   :  { %3332 = vmatpush.bf16.msra.mxu0 %v4142_v24  ;;  %3345 = vmatpush.bf16.msra.mxu1 %v4150_v45 }
 0x577   :  { %3333 = vmatpush.bf16.msra.mxu0 %v4141_v6 }
 0x5d6   :  { %v2956_v33 = vpop.f32.mrf.mxu0  ;;  %v2969_v4 = vpop.f32.mrf.mxu1 }
 0x5d7   :  { %v2999_v60 = vadd.f32 %v2956_v33, %v492_v48  ;;  %v3000_v56 = vadd.f32 %v2969_v4, %v521_v25 }
 0x5d9   :  { %v3939_v34 = vmul.f32 -1.442695, %v2999_v60  ;;  %v3940_v36 = vmul.f32 -1.442695, %v3000_v56 }
 0x5db   :  { %4387 = vpow2.f32 %v3939_v34 }
 0x5dc   :  { %4389 = vpow2.f32 %v3940_v36 }
 0x5dd   :  { %v2982_v15 = vpop.f32.mrf.mxu2  ;;  %v2995_v23 = vpop.f32.mrf.mxu3 }
 0x5de   :  { %v3002_v29 = vadd.f32 %v2995_v23, %v579_v54  ;;  %v2958_v37 = vpop.f32.mrf.mxu0  ;;  %v2971_v38 = vpop.f32.mrf.mxu1  ;;  %v3001_v1 = vadd.f32 %v2982_v15, %v550_v58  ;;  %v7232_v15 = vld [vmem:[#allocation91_spill] sm:$0xff] }
 0x5e0   :  { %v3941_v39 = vmul.f32 -1.442695, %v3002_v29 }
 0x5e1   :  { %v4388_v8 = vpop.eup %4387 }
 0x5e2   :  { %v4390_v63 = vpop.eup %4389  ;;  %v6623_v22 = vadd.f32 1.0, %v4388_v8  ;;  %4391 = vpow2.f32 %v3941_v39 }
 0x5e3   :  { %v6625_v26 = vadd.f32 1.0, %v4390_v63 }
 0x5e4   :  { %4393 = vrcp.f32 %v6623_v22  ;;  %v3077_v3 = vand.u32 2147483647, %v6623_v22  ;;  %v3079_v57 = vand.u32 2147483648, %v6623_v22  ;;  %vm3073_vm14 = vweird.f32 %v6623_v22 }
 0x5e5   :  { %4395 = vrcp.f32 %v6625_v26  ;;  %v2984_v28 = vpop.f32.mrf.mxu2  ;;  %v2997_v51 = vpop.f32.mrf.mxu3  ;;  %v3098_v17 = vand.u32 2147483648, %v6625_v26  ;;  %v3096_v48 = vand.u32 2147483647, %v6625_v26  ;;  %vm3092_vm13 = vweird.f32 %v6625_v26 }
 0x5e6   :  { %v3080_v56 = vor.u32 1.1754944e-38, %v3079_v57  ;;  %vm3078_vm10 = vcmp.eq.f32.partialorder %v3077_v3, 8.507059e+37 }
 0x5e7   :  { %v3099_v2 = vor.u32 1.1754944e-38, %v3098_v17  ;;  %vm3097_vm3 = vcmp.eq.f32.partialorder %v3096_v48, 8.507059e+37 }
 0x5e8   :  { %v4392_v42 = vpop.eup %4391 }
 0x5e9   :  { %v6643_v55 = vadd.f32 1.0, %v4392_v42 }
 0x5ea   :  { %v4394_v31 = vpop.eup %4393  ;;  %v3017_v53 = vpop.f32.mrf.mxu0 }
 0x5eb   :  { %v3030_v62 = vpop.f32.mrf.mxu1  ;;  %v4396_v10 = vpop.eup %4395  ;;  %v3069_v61 = vmul.f32 %v4394_v31, %v6623_v22  ;;  %4397 = vrcp.f32 %v6643_v55  ;;  %v3060_v30 = vadd.f32 %v3017_v53, %v7228_v52  ;;  %vm3074_vm9 = vweird.f32 %v4394_v31  ;;  %v4149_v22 = vld [vmem:[%s6703_s6 + $0x40] sm:$0xff] }
 0x5ec   :  { %v3088_v50 = vmul.f32 %v4396_v10, %v6625_v26  ;;  %4399 = vtanh.f32 %v3001_v1  ;;  %v3061_v47 = vadd.f32 %v3030_v62, %v7229_v14  ;;  %vm3093_vm12 = vweird.f32 %v4396_v10  ;;  %vm6662_vm15 = vmor %vm3073_vm14, %vm3074_vm9  ;;  %3346 = vmatpush.bf16.msra.mxu1 %v4149_v22 }
 0x5ed   :  { %v3070_v5 = vsub.f32 1.0, %v3069_v61  ;;  %v3942_v27 = vmul.f32 -1.442695, %v3060_v30  ;;  %vm3094_vm1 = vmor %vm3092_vm13, %vm3093_vm12  ;;  %v3118_v42 = vand.u32 2147483648, %v6643_v55  ;;  %vm3112_vm4 = vweird.f32 %v6643_v55  ;;  %v7233_v61 = vld [vmem:[#allocation89_spill] sm:$0xff] }
 0x5ee   :  { %v3089_v18 = vsub.f32 1.0, %v3088_v50  ;;  %v3943_v20 = vmul.f32 -1.442695, %v3061_v47 }
 0x5ef   :  { %v3071_v49 = vmul.f32 %v4394_v31, %v3070_v5  ;;  %4401 = vpow2.f32 %v3942_v27  ;;  %v3119_v1 = vor.u32 1.1754944e-38, %v3118_v42 }
 0x5f0   :  { %v3090_v41 = vmul.f32 %v4396_v10, %v3089_v18  ;;  %4403 = vpow2.f32 %v3943_v20 }
 0x5f1   :  { %v4398_v12 = vpop.eup %4397  ;;  %v3072_v25 = vadd.f32 %v4394_v31, %v3071_v49  ;;  %v3043_v33 = vpop.f32.mrf.mxu2 }
 0x5f2   :  { %v3056_v4 = vpop.f32.mrf.mxu3  ;;  %v3091_v43 = vadd.f32 %v4396_v10, %v3090_v41  ;;  %v3108_v34 = vmul.f32 %v4398_v12, %v6643_v55  ;;  %v3019_v36 = vpop.f32.mrf.mxu0  ;;  %vm3113_vm11 = vweird.f32 %v4398_v12  ;;  %v3062_v50 = vadd.f32 %v3043_v33, %v7233_v61 }
 0x5f3   :  { %v3032_v44 = vpop.f32.mrf.mxu1  ;;  %v4400_v54 = vpop.eup %4399  ;;  %v3076_v9 = vsel %vm6662_vm15, %v4394_v31, %v3072_v25  ;;  %v3063_v23 = vadd.f32 %v3056_v4, %v7232_v15  ;;  %vm3114_vm6 = vmor %vm3112_vm4, %vm3113_vm11 }
 0x5f4   :  { %v3081_v29 = vsel %vm3078_vm10, %v3080_v56, %v3076_v9  ;;  %v3095_v37 = vsel %vm3094_vm1, %v4396_v10, %v3091_v43  ;;  %v3109_v38 = vsub.f32 1.0, %v3108_v34 }
 0x5f5   :  { %v3100_v39 = vsel %vm3097_vm3, %v3099_v2, %v3095_v37  ;;  %v3123_v46 = vmul.f32 %v4400_v54, %v3081_v29  ;;  %v3944_v32 = vmul.f32 -1.442695, %v3063_v23  ;;  %v4402_v26 = vpop.eup %4401 }
 0x5f6   :  { %v3122_v8 = vmul.f32 %v3100_v39, %v6571_v11  ;;  %v3110_v63 = vmul.f32 %v4398_v12, %v3109_v38  ;;  %v4404_v24 = vpop.eup %4403  ;;  %v3130_v28 = vadd.f32 1.0, %v4402_v26  ;;  %v3116_v11 = vand.u32 2147483647, %v6643_v55  ;;  %v4162_v26 = vld [vmem:[%s6704_s7] ss:$0 sm:$0xff] }
 0x5f7   :  { %4405 = vpow2.f32 %v3944_v32  ;;  %v3149_v40 = vadd.f32 1.0, %v4404_v24 }
 0x5f8   :  { %v3124_v0 = vadd.f32 %v3123_v46, %v3122_v8  ;;  %v3111_v51 = vadd.f32 %v4398_v12, %v3110_v63  ;;  %vm3117_vm0 = vcmp.eq.f32.partialorder %v3116_v11, 8.507059e+37  ;;  %v3142_v3 = vand.u32 2147483648, %v3130_v28 }
 0x5f9   :  { %v3045_v21 = vpop.f32.mrf.mxu2  ;;  %v3161_v49 = vand.u32 2147483648, %v3149_v40  ;;  %v3140_v20 = vand.u32 2147483647, %v3130_v28  ;;  %v3159_v48 = vand.u32 2147483647, %v3149_v40  ;;  %vm3136_vm9 = vweird.f32 %v3130_v28 }
 0x5fa   :  { %v3058_v58 = vpop.f32.mrf.mxu3  ;;  %4407 = vtanh.f32 %v3124_v0  ;;  %v3115_v19 = vsel %vm3114_vm6, %v4398_v12, %v3111_v51  ;;  %vm3155_vm12 = vweird.f32 %v3149_v40 }
 0x5fb   :  { %4409 = vrcp.f32 %v3130_v28  ;;  %v3120_v62 = vsel %vm3117_vm0, %v3119_v1, %v3115_v19  ;;  %v3162_v4 = vor.u32 1.1754944e-38, %v3161_v49  ;;  %vm3141_vm14 = vcmp.eq.f32.partialorder %v3140_v20, 8.507059e+37 }
 0x5fc   :  { %4411 = vrcp.f32 %v3149_v40  ;;  %vm3160_vm15 = vcmp.eq.f32.partialorder %v3159_v48, 8.507059e+37 }
 0x5fd   :  { %v4406_v6 = vpop.eup %4405 }
 0x5fe   :  { %v3169_v31 = vadd.f32 1.0, %v4406_v6 }
 0x600   :  { %v4408_v53 = vpop.eup %4407  ;;  %4413 = vrcp.f32 %v3169_v31  ;;  %v3181_v15 = vand.u32 2147483648, %v3169_v31  ;;  %vm3175_vm10 = vweird.f32 %v3169_v31  ;;  %v3179_v23 = vand.u32 2147483647, %v3169_v31 }
 0x601   :  { %v4410_v10 = vpop.eup %4409  ;;  %v3126_v13 = vmul.f32 %v4408_v53, %v3120_v62  ;;  %4415 = vtanh.f32 %v3062_v50 }
 0x602   :  { %v4412_v5 = vpop.eup %4411  ;;  %v3132_v52 = vmul.f32 %v4410_v10, %v3130_v28  ;;  %vm3137_vm2 = vweird.f32 %v4410_v10  ;;  %v3182_v37 = vor.u32 1.1754944e-38, %v3181_v15  ;;  %vm3180_vm11 = vcmp.eq.f32.partialorder %v3179_v23, 8.507059e+37 }
 0x603   :  { %v3151_v30 = vmul.f32 %v4412_v5, %v3149_v40  ;;  %v3190_v14 = vsel %vm1404_vm8, %v3126_v13, %v6582_v59  ;;  %vm3156_vm7 = vweird.f32 %v4412_v5  ;;  %vm3138_vm13 = vmor %vm3136_vm9, %vm3137_vm2  ;;  %v3143_v59 = vor.u32 1.1754944e-38, %v3142_v3 }
 0x604   :  { %v3133_v47 = vsub.f32 1.0, %v3132_v52  ;;  %v3192_v18 = vpack.c.bf16 %v3190_v14, %v3190_v14  ;;  %vm3157_vm8 = vmor %vm3155_vm12, %vm3156_vm7 }
 0x605   :  { %v3152_v17 = vsub.f32 1.0, %v3151_v30 }
 0x606   :  { %v4414_v57 = vpop.eup %4413  ;;  %v3134_v27 = vmul.f32 %v4410_v10, %v3133_v47  ;;  %3334 = vmatmul.bf16.vlgmr.msra.gmra.mxu0 %v3192_v18 }
 0x607   :  { %v3153_v41 = vmul.f32 %v4412_v5, %v3152_v17  ;;  %v3171_v7 = vmul.f32 %v4414_v57, %v3169_v31  ;;  %v4416_v56 = vpop.eup %4415  ;;  %vm3176_vm1 = vweird.f32 %v4414_v57 }
 0x608   :  { %v3135_v12 = vadd.f32 %v4410_v10, %v3134_v27  ;;  %vm3177_vm3 = vmor %vm3175_vm10, %vm3176_vm1 }
 0x609   :  { %v3154_v25 = vadd.f32 %v4412_v5, %v3153_v41  ;;  %v3172_v33 = vsub.f32 1.0, %v3171_v7 }
 0x60a   :  { %v3139_v60 = vsel %vm3138_vm13, %v4410_v10, %v3135_v12 }
 0x60b   :  { %v3144_v43 = vsel %vm3141_vm14, %v3143_v59, %v3139_v60  ;;  %v3158_v34 = vsel %vm3157_vm8, %v4412_v5, %v3154_v25  ;;  %v3173_v45 = vmul.f32 %v4414_v57, %v3172_v33 }
 0x60c   :  { %v3163_v36 = vsel %vm3160_vm15, %v3162_v4, %v3158_v34  ;;  %v3186_v44 = vmul.f32 %v4416_v56, %v3144_v43 }
 0x60d   :  { %v3185_v54 = vmul.f32 %v3163_v36, %v6585_v16  ;;  %v3174_v9 = vadd.f32 %v4414_v57, %v3173_v45 }
 0x60f   :  { %v3187_v2 = vadd.f32 %v3186_v44, %v3185_v54  ;;  %v3178_v29 = vsel %vm3177_vm3, %v4414_v57, %v3174_v9 }
 0x610   :  { %v3183_v39 = vsel %vm3180_vm11, %v3182_v37, %v3178_v29 }
 0x611   :  { %4417 = vtanh.f32 %v3187_v2 }
 0x617   :  { %v4418_v38 = vpop.eup %4417 }
 0x618   :  { %v3189_v46 = vmul.f32 %v4418_v38, %v3183_v39 }
 0x61a   :  { %v3191_v8 = vsel %vm1397_vm5, %v3189_v46, %v6591_v35 }
 0x61b   :  { %v3193_v63 = vpack.c.bf16 %v3191_v8, %v3191_v8 }
 0x61d   :  { %3347 = vmatmul.bf16.vlgmr.msra.gmra.mxu1 %v3193_v63 }
 0x683   :  { %v3335_v16 = vpop.f32.mrf.mxu0 }
 0x684   :  { %v3336_v24 = vadd.f32 %v4162_v26, %v3335_v16 }
 0x68b   :  { %v3337_v22 = vpop.f32.mrf.mxu0 }
 0x69a   :  { %v3348_v0 = vpop.f32.mrf.mxu1 }
 0x69b   :  { %v3349_v28 = vadd.f32 %v3348_v0, %v3336_v24 }
 0x69d   :  { %3352 = vst [vmem:[#allocation3] sm:$0xff] %v3349_v28 }
 0x69e   :  { %3363 = dma.vmem_to_hbm [thread:$0]  %s3359_s23, 128, %s3361_s25, [#allocation4]  }
 0x6a2   :  { %v3350_v35 = vpop.f32.mrf.mxu1 }
 0x6a3   :  { %4444 = dma.done.wait [#allocation4], 128  }
 0x6a4   :  { %4445 = vsyncadd [#allocation4], 4294967168 }
 0x6a5   :  { %3368 = vsyncpa [#allocation4], 1 }

</bundles_post_ra>
